<compile_context>
chip_gen: v7x
topology: tpu7x:2x2x1
jax: 0.10.0
libtpu: 0.0.40
codegen_flags: <defaults>
</compile_context>

<pallas_src>
import numpy as np
import jax
import jax.numpy as jnp
from jax.experimental import pallas as pl
from jax.experimental.pallas import tpu as pltpu

EPS = 1e-5
_LANE = 128

# Per-generation VMEM sizing (v5e/v6e: 128 MiB physical, v7x: 64 MiB per TC).
try:
    _VMEM_CAP = int(pltpu.get_tpu_info().vmem_capacity_bytes)
except Exception:  # pragma: no cover - conservative fallback
    _VMEM_CAP = 64 * 1024 * 1024
_VMEM_LIMIT = min(96 * 1024 * 1024, (_VMEM_CAP * 3) // 4)
_TILE_BUDGET = max(8 * 1024 * 1024, _VMEM_LIMIT // 6)


# ----------------------------- Pallas kernel -------------------------------

def conv3x3_kernel(x_ref, w_ref, y_ref, sum_ref, sq_ref):
    """3x3 'same' conv on one zero-padded halo row-tile.

    x_ref  : (1, t_h+2, W+2, Cin)   bf16, spatial zero border already applied
    w_ref  : (9*Cin, Cout_pad)      bf16, tap-major (ky, kx, cin) rows (resident)
    y_ref  : (1, t_h*W, Cout_pad)   bf16 conv output (lane-dense: Cout_pad % 128 == 0)
    sum_ref/sq_ref : (1, 1, Cout_pad) f32 per-tile partial BatchNorm statistics

    The nine shifted taps are formed in VMEM (never in HBM) and folded into a single
    MXU matmul with contraction K = 9*Cin; BN stats are taken from the f32 accumulator
    before the bf16 down-cast.
    """
    x = x_ref[0]                                   # (t_h+2, W+2, Cin)
    th2, wp2, cin = x.shape
    th, wo = th2 - 2, wp2 - 2
    taps = [x[ky:ky + th, kx:kx + wo, :] for ky in range(3) for kx in range(3)]
    xcol = jnp.concatenate(taps, axis=-1).reshape(th * wo, 9 * cin)
    acc = jnp.dot(xcol, w_ref[...], preferred_element_type=jnp.float32)
    y_ref[0] = acc.astype(y_ref.dtype)
    sum_ref[0] = jnp.sum(acc, axis=0, keepdims=True)
    sq_ref[0] = jnp.sum(acc * acc, axis=0, keepdims=True)


# ------------------------------ Host wrappers -------------------------------

def _pad_lanes(c):
    return ((c + _LANE - 1) // _LANE) * _LANE


def _tile_bytes(t, wd, cin, cp):
    """Rough per-grid-step VMEM footprint (double-buffered in/out blocks + in-VMEM xcol)."""
    in_blk = (t + 2) * (wd + 2) * cin * 2 * 2
    xcol = t * wd * 9 * cin * 2
    acc = t * wd * cp * 4
    out = t * wd * cp * 2 * 2
    wgt = 9 * cin * cp * 2 * 2
    return in_blk + xcol + acc + out + wgt


def _pick_rows(h, wd, cin, cp):
    """Largest row-tile dividing H that fits the VMEM budget, preferring tiles whose
    M = t*W is a multiple of 8 (bf16 sublane packing)."""
    divs = [t for t in range(h, 0, -1) if h % t == 0]
    for require_mult8 in (True, False):
        for t in divs:
            if require_mult8 and (t * wd) % 8 != 0:
                continue
            if _tile_bytes(t, wd, cin, cp) <= _TILE_BUDGET:
                return t
    return 1


def _halo_tiles(a_nhwc, t_h):
    """(N,H,W,C) activated -> (N*nt, t_h+2, W+2, C) bf16 zero-padded halo row tiles.

    Pure data rearrangement (+bf16 cast); the preceding BN+SiLU pointwise math fuses
    into this producer under jit, so the activated tensor takes no separate HBM round
    trip. Halo duplication costs only ~2/t_h extra bytes (vs 9x for im2col)."""
    n, h, wd, c = a_nhwc.shape
    nt = h // t_h
    ap = jnp.pad(a_nhwc.astype(jnp.bfloat16), ((0, 0), (1, 1), (1, 1), (0, 0)))
    rows = [ap[:, j * t_h: j * t_h + t_h + 2] for j in range(nt)]
    x = jnp.stack(rows, axis=1)                    # (N, nt, t_h+2, W+2, C)
    return x.reshape(n * nt, t_h + 2, wd + 2, c)


def _conv3x3(tiles, w, t_h, out_w):
    """tiles: (M, t_h+2, W+2, Cin) bf16 halo tiles, w: (9*Cin, Cout_pad) bf16.
    Returns conv output (M, t_h*W, Cout_pad) bf16 and per-tile f32 BN partials."""
    m, th2, wp2, cin = tiles.shape
    k, cp = w.shape
    rows = t_h * out_w
    return pl.pallas_call(
        conv3x3_kernel,
        out_shape=(jax.ShapeDtypeStruct((m, rows, cp), jnp.bfloat16),
                   jax.ShapeDtypeStruct((m, 1, cp), jnp.float32),
                   jax.ShapeDtypeStruct((m, 1, cp), jnp.float32)),
        grid=(m,),
        in_specs=[pl.BlockSpec((1, th2, wp2, cin), lambda i: (i, 0, 0, 0)),
                  pl.BlockSpec((k, cp), lambda i: (0, 0))],     # weight kept resident
        out_specs=(pl.BlockSpec((1, rows, cp), lambda i: (i, 0, 0)),
                   pl.BlockSpec((1, 1, cp), lambda i: (i, 0, 0)),
                   pl.BlockSpec((1, 1, cp), lambda i: (i, 0, 0))),
        compiler_params=pltpu.CompilerParams(
            dimension_semantics=("parallel",),                  # flat M axis: megacore-safe
            vmem_limit_bytes=_VMEM_LIMIT),
    )(tiles, w)


def _conv_bn_silu(a_nhwc, w, gamma, beta):
    """Conv3x3(pad=1) -> BatchNorm(batch stats) -> SiLU. Returns (N,H,W,Cout_pad) f32."""
    n, h, wd, c = a_nhwc.shape
    cp = w.shape[1]
    t_h = _pick_rows(h, wd, c, cp)
    tiles = _halo_tiles(a_nhwc, t_h)
    y, ssum, ssq = _conv3x3(tiles, w, t_h, wd)
    count = float(n * h * wd)
    mean = jnp.sum(ssum, axis=(0, 1)) / count
    var = jnp.maximum(jnp.sum(ssq, axis=(0, 1)) / count - mean * mean, 0.0)
    scale = gamma / jnp.sqrt(var + EPS)
    shift = beta - mean * scale
    z = y.astype(jnp.float32) * scale + shift
    z = z * jax.nn.sigmoid(z)                       # SiLU; fused by XLA into consumers
    return z.reshape(n, h, wd, cp)


def _avgpool2x2(a):
    n, h, wd, c = a.shape
    return a.reshape(n, h // 2, 2, wd // 2, 2, c).mean(axis=(2, 4))


def init_params(key, in_channels, out_channels_list):
    """Conv weights in tap-major (ky,kx,cin) layout, zero-padded to lane-dense (128x)
    channel counts. Conv bias omitted: it is exactly cancelled by the following
    training-mode BatchNorm's batch-mean subtraction."""
    params = []
    cin_real, cin_pad = in_channels, in_channels    # image channels kept natural
    for cout_real in out_channels_list:
        cout_pad = _pad_lanes(cout_real)
        block = {}
        for idx in range(2):
            ci_r, ci_p = (cin_real, cin_pad) if idx == 0 else (cout_real, cout_pad)
            key, k1 = jax.random.split(key)
            wt = jax.random.normal(k1, (3, 3, ci_r, cout_real), jnp.float32) / np.sqrt(9.0 * ci_r)
            wt = jnp.pad(wt, ((0, 0), (0, 0), (0, ci_p - ci_r), (0, cout_pad - cout_real)))
            block[f"w{idx}"] = wt.reshape(9 * ci_p, cout_pad).astype(jnp.bfloat16)
            block[f"gamma{idx}"] = jnp.ones((cout_pad,), jnp.float32)
            block[f"beta{idx}"] = jnp.zeros((cout_pad,), jnp.float32)
        params.append(block)
        cin_real, cin_pad = cout_real, cout_pad
    return params


def image_encoder(x_nchw, params, out_channels_list):
    """Matches ImageEncoder.forward: returns ([x, f1, f2, f3] in NCHW, global_feat)."""
    a = jnp.transpose(x_nchw, (0, 2, 3, 1)).astype(jnp.float32)   # NHWC, channels on lanes
    features = [x_nchw]
    for block, cout in zip(params, out_channels_list):
        a = _conv_bn_silu(a, block["w0"], block["gamma0"], block["beta0"])
        a = _conv_bn_silu(a, block["w1"], block["gamma1"], block["beta1"])
        a = _avgpool2x2(a)                                        # (N, H/2, W/2, Cpad) f32
        features.append(jnp.transpose(a[..., :cout], (0, 3, 1, 2)))
    # adaptive_avg_pool2d(1,1): plain fused global mean (dedicated kernel dropped per review)
    global_feat = jnp.mean(a[..., :out_channels_list[-1]], axis=(1, 2))
    return features, global_feat


# ----------------------------------- main -----------------------------------

if __name__ == "__main__":
    key = jax.random.PRNGKey(0)
    N, CIN, H, W = 2, 4, 16, 16
    out_channels_list = (8, 16, 32)          # small stand-in for [64, 128, 256]

    kx, kp = jax.random.split(key)
    x = jax.random.normal(kx, (N, CIN, H, W), jnp.float32)   # NCHW like PyTorch
    params = init_params(kp, CIN, out_channels_list)

    run = jax.jit(image_encoder, static_argnames="out_channels_list")
    features, global_feat = run(x, params, out_channels_list=out_channels_list)
    jax.block_until_ready(global_feat)
    for f in features:
        jax.block_until_ready(f)

    # sanity: shapes must mirror the PyTorch module
    assert features[0].shape == (N, CIN, H, W)
    assert features[1].shape == (N, 8, 8, 8)
    assert features[2].shape == (N, 16, 4, 4)
    assert features[3].shape == (N, 32, 2, 2)
    assert global_feat.shape == (N, 32)
    assert all(bool(jnp.all(jnp.isfinite(f.astype(jnp.float32)))) for f in features)
    assert bool(jnp.all(jnp.isfinite(global_feat)))

    print("KERNEL_OK")
</pallas_src>

<mosaic_0001>
module attributes {stable_mosaic.version = 11 : i64} {
  func.func @conv3x3_kernel(%arg0: i32, %arg1: memref<1x18x18x4xbf16, #tpu.memory_space<vmem>>, %arg2: memref<36x128xbf16, #tpu.memory_space<vmem>>, %arg3: memref<1x256x128xbf16, #tpu.memory_space<vmem>>, %arg4: memref<1x1x128xf32, #tpu.memory_space<vmem>>, %arg5: memref<1x1x128xf32, #tpu.memory_space<vmem>>) attributes {dimension_semantics = [#tpu.dimension_semantics<parallel>], iteration_bounds = array<i64: 2>, scalar_prefetch = 0 : i64, scratch_operands = 0 : i64, tpu.core_type = #tpu.core_type<tc>, window_params = [{transform_indices = @transform_0, window_bounds = array<i64: 1, 18, 18, 4>}, {pipeline_mode = #tpu.pipeline_mode<synchronous>, transform_indices = @transform_1, window_bounds = array<i64: 36, 128>}, {transform_indices = @transform_2, window_bounds = array<i64: 1, 256, 128>}, {transform_indices = @transform_3, window_bounds = array<i64: 1, 1, 128>}, {transform_indices = @transform_4, window_bounds = array<i64: 1, 1, 128>}]} {
    %c0 = arith.constant 0 : index
    %c0_0 = arith.constant 0 : index
    %c0_1 = arith.constant 0 : index
    %c0_2 = arith.constant 0 : index
    %0 = vector.load %arg1[%c0, %c0_0, %c0_1, %c0_2] : memref<1x18x18x4xbf16, #tpu.memory_space<vmem>>, vector<1x18x18x4xbf16>
    %1 = vector.shape_cast %0 : vector<1x18x18x4xbf16> to vector<18x18x4xbf16>
    %2 = vector.extract_strided_slice %1 {offsets = [0, 0, 0], sizes = [16, 16, 4], strides = [1, 1, 1]} : vector<18x18x4xbf16> to vector<16x16x4xbf16>
    %3 = vector.extract_strided_slice %1 {offsets = [0, 1, 0], sizes = [16, 16, 4], strides = [1, 1, 1]} : vector<18x18x4xbf16> to vector<16x16x4xbf16>
    %4 = vector.extract_strided_slice %1 {offsets = [0, 2, 0], sizes = [16, 16, 4], strides = [1, 1, 1]} : vector<18x18x4xbf16> to vector<16x16x4xbf16>
    %5 = vector.extract_strided_slice %1 {offsets = [1, 0, 0], sizes = [16, 16, 4], strides = [1, 1, 1]} : vector<18x18x4xbf16> to vector<16x16x4xbf16>
    %6 = vector.extract_strided_slice %1 {offsets = [1, 1, 0], sizes = [16, 16, 4], strides = [1, 1, 1]} : vector<18x18x4xbf16> to vector<16x16x4xbf16>
    %7 = vector.extract_strided_slice %1 {offsets = [1, 2, 0], sizes = [16, 16, 4], strides = [1, 1, 1]} : vector<18x18x4xbf16> to vector<16x16x4xbf16>
    %8 = vector.extract_strided_slice %1 {offsets = [2, 0, 0], sizes = [16, 16, 4], strides = [1, 1, 1]} : vector<18x18x4xbf16> to vector<16x16x4xbf16>
    %9 = vector.extract_strided_slice %1 {offsets = [2, 1, 0], sizes = [16, 16, 4], strides = [1, 1, 1]} : vector<18x18x4xbf16> to vector<16x16x4xbf16>
    %10 = vector.extract_strided_slice %1 {offsets = [2, 2, 0], sizes = [16, 16, 4], strides = [1, 1, 1]} : vector<18x18x4xbf16> to vector<16x16x4xbf16>
    %11 = tpu.concatenate %2, %3, %4, %5, %6, %7, %8, %9, %10 in 2 : vector<16x16x4xbf16>, vector<16x16x4xbf16>, vector<16x16x4xbf16>, vector<16x16x4xbf16>, vector<16x16x4xbf16>, vector<16x16x4xbf16>, vector<16x16x4xbf16>, vector<16x16x4xbf16>, vector<16x16x4xbf16> -> vector<16x16x36xbf16>
    %12 = vector.shape_cast %11 : vector<16x16x36xbf16> to vector<256x36xbf16>
    %c0_3 = arith.constant 0 : index
    %c0_4 = arith.constant 0 : index
    %13 = vector.load %arg2[%c0_3, %c0_4] : memref<36x128xbf16, #tpu.memory_space<vmem>>, vector<36x128xbf16>
    %cst = arith.constant dense<0.000000e+00> : vector<256x128xf32>
    %14 = tpu.matmul %12, %13, %cst {dimension_numbers = #tpu.dot_dimension_numbers<[1], [0], [0], [1], [0, 0, 1, 1], [], []>} : vector<256x36xbf16>, vector<36x128xbf16>, vector<256x128xf32> -> vector<256x128xf32>
    %15 = arith.truncf %14 : vector<256x128xf32> to vector<256x128xbf16>
    %c0_5 = arith.constant 0 : index
    %c0_6 = arith.constant 0 : index
    %c0_7 = arith.constant 0 : index
    %16 = vector.load %arg3[%c0_5, %c0_6, %c0_7] : memref<1x256x128xbf16, #tpu.memory_space<vmem>>, vector<1x256x128xbf16>
    %17 = vector.shape_cast %16 : vector<1x256x128xbf16> to vector<256x128xbf16>
    %18 = vector.shape_cast %15 : vector<256x128xbf16> to vector<1x256x128xbf16>
    tpu.vector_store %arg3[%c0_5, %c0_6, %c0_7], %18 {strides = array<i32>} : memref<1x256x128xbf16, #tpu.memory_space<vmem>>, vector<1x256x128xbf16>,
    %cst_8 = arith.constant dense<0.000000e+00> : vector<128xf32>
    %19 = vector.multi_reduction <add>, %14, %cst_8 [0] : vector<256x128xf32> to vector<128xf32>
    %20 = vector.shape_cast %19 : vector<128xf32> to vector<1x128xf32>
    %c0_9 = arith.constant 0 : index
    %c0_10 = arith.constant 0 : index
    %c0_11 = arith.constant 0 : index
    %21 = vector.load %arg4[%c0_9, %c0_10, %c0_11] : memref<1x1x128xf32, #tpu.memory_space<vmem>>, vector<1x1x128xf32>
    %22 = vector.shape_cast %21 : vector<1x1x128xf32> to vector<1x128xf32>
    %23 = vector.shape_cast %20 : vector<1x128xf32> to vector<1x1x128xf32>
    tpu.vector_store %arg4[%c0_9, %c0_10, %c0_11], %23 {strides = array<i32>} : memref<1x1x128xf32, #tpu.memory_space<vmem>>, vector<1x1x128xf32>,
    %24 = arith.mulf %14, %14 : vector<256x128xf32>
    %cst_12 = arith.constant dense<0.000000e+00> : vector<128xf32>
    %25 = vector.multi_reduction <add>, %24, %cst_12 [0] : vector<256x128xf32> to vector<128xf32>
    %26 = vector.shape_cast %25 : vector<128xf32> to vector<1x128xf32>
    %c0_13 = arith.constant 0 : index
    %c0_14 = arith.constant 0 : index
    %c0_15 = arith.constant 0 : index
    %27 = vector.load %arg5[%c0_13, %c0_14, %c0_15] : memref<1x1x128xf32, #tpu.memory_space<vmem>>, vector<1x1x128xf32>
    %28 = vector.shape_cast %27 : vector<1x1x128xf32> to vector<1x128xf32>
    %29 = vector.shape_cast %26 : vector<1x128xf32> to vector<1x1x128xf32>
    tpu.vector_store %arg5[%c0_13, %c0_14, %c0_15], %29 {strides = array<i32>} : memref<1x1x128xf32, #tpu.memory_space<vmem>>, vector<1x1x128xf32>,
    return
  }
  func.func @transform_0(%arg0: i32) -> (i32, i32, i32, i32) {
    %c0_i32 = arith.constant 0 : i32
    %c0_i32_0 = arith.constant 0 : i32
    %c0_i32_1 = arith.constant 0 : i32
    %c0_i32_2 = arith.constant 0 : i32
    return %arg0, %c0_i32, %c0_i32_0, %c0_i32_1 : i32, i32, i32, i32
  }
  func.func @transform_1(%arg0: i32) -> (i32, i32) {
    %c0_i32 = arith.constant 0 : i32
    %c0_i32_0 = arith.constant 0 : i32
    %c0_i32_1 = arith.constant 0 : i32
    return %c0_i32, %c0_i32_0 : i32, i32
  }
  func.func @transform_2(%arg0: i32) -> (i32, i32, i32) {
    %c0_i32 = arith.constant 0 : i32
    %c0_i32_0 = arith.constant 0 : i32
    %c0_i32_1 = arith.constant 0 : i32
    return %arg0, %c0_i32, %c0_i32_0 : i32, i32, i32
  }
  func.func @transform_3(%arg0: i32) -> (i32, i32, i32) {
    %c0_i32 = arith.constant 0 : i32
    %c0_i32_0 = arith.constant 0 : i32
    %c0_i32_1 = arith.constant 0 : i32
    return %arg0, %c0_i32, %c0_i32_0 : i32, i32, i32
  }
  func.func @transform_4(%arg0: i32) -> (i32, i32, i32) {
    %c0_i32 = arith.constant 0 : i32
    %c0_i32_0 = arith.constant 0 : i32
    %c0_i32_1 = arith.constant 0 : i32
    return %arg0, %c0_i32, %c0_i32_0 : i32, i32, i32
  }
}

module attributes {stable_mosaic.version = 11 : i64} {
  func.func @conv3x3_kernel(%arg0: i32, %arg1: memref<1x18x18x128xbf16, #tpu.memory_space<vmem>>, %arg2: memref<1152x128xbf16, #tpu.memory_space<vmem>>, %arg3: memref<1x256x128xbf16, #tpu.memory_space<vmem>>, %arg4: memref<1x1x128xf32, #tpu.memory_space<vmem>>, %arg5: memref<1x1x128xf32, #tpu.memory_space<vmem>>) attributes {dimension_semantics = [#tpu.dimension_semantics<parallel>], iteration_bounds = array<i64: 2>, scalar_prefetch = 0 : i64, scratch_operands = 0 : i64, tpu.core_type = #tpu.core_type<tc>, window_params = [{transform_indices = @transform_0, window_bounds = array<i64: 1, 18, 18, 128>}, {pipeline_mode = #tpu.pipeline_mode<synchronous>, transform_indices = @transform_1, window_bounds = array<i64: 1152, 128>}, {transform_indices = @transform_2, window_bounds = array<i64: 1, 256, 128>}, {transform_indices = @transform_3, window_bounds = array<i64: 1, 1, 128>}, {transform_indices = @transform_4, window_bounds = array<i64: 1, 1, 128>}]} {
    %c0 = arith.constant 0 : index
    %c0_0 = arith.constant 0 : index
    %c0_1 = arith.constant 0 : index
    %c0_2 = arith.constant 0 : index
    %0 = vector.load %arg1[%c0, %c0_0, %c0_1, %c0_2] : memref<1x18x18x128xbf16, #tpu.memory_space<vmem>>, vector<1x18x18x128xbf16>
    %1 = vector.shape_cast %0 : vector<1x18x18x128xbf16> to vector<18x18x128xbf16>
    %2 = vector.extract_strided_slice %1 {offsets = [0, 0, 0], sizes = [16, 16, 128], strides = [1, 1, 1]} : vector<18x18x128xbf16> to vector<16x16x128xbf16>
    %3 = vector.extract_strided_slice %1 {offsets = [0, 1, 0], sizes = [16, 16, 128], strides = [1, 1, 1]} : vector<18x18x128xbf16> to vector<16x16x128xbf16>
    %4 = vector.extract_strided_slice %1 {offsets = [0, 2, 0], sizes = [16, 16, 128], strides = [1, 1, 1]} : vector<18x18x128xbf16> to vector<16x16x128xbf16>
    %5 = vector.extract_strided_slice %1 {offsets = [1, 0, 0], sizes = [16, 16, 128], strides = [1, 1, 1]} : vector<18x18x128xbf16> to vector<16x16x128xbf16>
    %6 = vector.extract_strided_slice %1 {offsets = [1, 1, 0], sizes = [16, 16, 128], strides = [1, 1, 1]} : vector<18x18x128xbf16> to vector<16x16x128xbf16>
    %7 = vector.extract_strided_slice %1 {offsets = [1, 2, 0], sizes = [16, 16, 128], strides = [1, 1, 1]} : vector<18x18x128xbf16> to vector<16x16x128xbf16>
    %8 = vector.extract_strided_slice %1 {offsets = [2, 0, 0], sizes = [16, 16, 128], strides = [1, 1, 1]} : vector<18x18x128xbf16> to vector<16x16x128xbf16>
    %9 = vector.extract_strided_slice %1 {offsets = [2, 1, 0], sizes = [16, 16, 128], strides = [1, 1, 1]} : vector<18x18x128xbf16> to vector<16x16x128xbf16>
    %10 = vector.extract_strided_slice %1 {offsets = [2, 2, 0], sizes = [16, 16, 128], strides = [1, 1, 1]} : vector<18x18x128xbf16> to vector<16x16x128xbf16>
    %11 = tpu.concatenate %2, %3, %4, %5, %6, %7, %8, %9, %10 in 2 : vector<16x16x128xbf16>, vector<16x16x128xbf16>, vector<16x16x128xbf16>, vector<16x16x128xbf16>, vector<16x16x128xbf16>, vector<16x16x128xbf16>, vector<16x16x128xbf16>, vector<16x16x128xbf16>, vector<16x16x128xbf16> -> vector<16x16x1152xbf16>
    %12 = vector.shape_cast %11 : vector<16x16x1152xbf16> to vector<256x1152xbf16>
    %c0_3 = arith.constant 0 : index
    %c0_4 = arith.constant 0 : index
    %13 = vector.load %arg2[%c0_3, %c0_4] : memref<1152x128xbf16, #tpu.memory_space<vmem>>, vector<1152x128xbf16>
    %cst = arith.constant dense<0.000000e+00> : vector<256x128xf32>
    %14 = tpu.matmul %12, %13, %cst {dimension_numbers = #tpu.dot_dimension_numbers<[1], [0], [0], [1], [0, 0, 1, 1], [], []>} : vector<256x1152xbf16>, vector<1152x128xbf16>, vector<256x128xf32> -> vector<256x128xf32>
    %15 = arith.truncf %14 : vector<256x128xf32> to vector<256x128xbf16>
    %c0_5 = arith.constant 0 : index
    %c0_6 = arith.constant 0 : index
    %c0_7 = arith.constant 0 : index
    %16 = vector.load %arg3[%c0_5, %c0_6, %c0_7] : memref<1x256x128xbf16, #tpu.memory_space<vmem>>, vector<1x256x128xbf16>
    %17 = vector.shape_cast %16 : vector<1x256x128xbf16> to vector<256x128xbf16>
    %18 = vector.shape_cast %15 : vector<256x128xbf16> to vector<1x256x128xbf16>
    tpu.vector_store %arg3[%c0_5, %c0_6, %c0_7], %18 {strides = array<i32>} : memref<1x256x128xbf16, #tpu.memory_space<vmem>>, vector<1x256x128xbf16>,
    %cst_8 = arith.constant dense<0.000000e+00> : vector<128xf32>
    %19 = vector.multi_reduction <add>, %14, %cst_8 [0] : vector<256x128xf32> to vector<128xf32>
    %20 = vector.shape_cast %19 : vector<128xf32> to vector<1x128xf32>
    %c0_9 = arith.constant 0 : index
    %c0_10 = arith.constant 0 : index
    %c0_11 = arith.constant 0 : index
    %21 = vector.load %arg4[%c0_9, %c0_10, %c0_11] : memref<1x1x128xf32, #tpu.memory_space<vmem>>, vector<1x1x128xf32>
    %22 = vector.shape_cast %21 : vector<1x1x128xf32> to vector<1x128xf32>
    %23 = vector.shape_cast %20 : vector<1x128xf32> to vector<1x1x128xf32>
    tpu.vector_store %arg4[%c0_9, %c0_10, %c0_11], %23 {strides = array<i32>} : memref<1x1x128xf32, #tpu.memory_space<vmem>>, vector<1x1x128xf32>,
    %24 = arith.mulf %14, %14 : vector<256x128xf32>
    %cst_12 = arith.constant dense<0.000000e+00> : vector<128xf32>
    %25 = vector.multi_reduction <add>, %24, %cst_12 [0] : vector<256x128xf32> to vector<128xf32>
    %26 = vector.shape_cast %25 : vector<128xf32> to vector<1x128xf32>
    %c0_13 = arith.constant 0 : index
    %c0_14 = arith.constant 0 : index
    %c0_15 = arith.constant 0 : index
    %27 = vector.load %arg5[%c0_13, %c0_14, %c0_15] : memref<1x1x128xf32, #tpu.memory_space<vmem>>, vector<1x1x128xf32>
    %28 = vector.shape_cast %27 : vector<1x1x128xf32> to vector<1x128xf32>
    %29 = vector.shape_cast %26 : vector<1x128xf32> to vector<1x1x128xf32>
    tpu.vector_store %arg5[%c0_13, %c0_14, %c0_15], %29 {strides = array<i32>} : memref<1x1x128xf32, #tpu.memory_space<vmem>>, vector<1x1x128xf32>,
    return
  }
  func.func @transform_0(%arg0: i32) -> (i32, i32, i32, i32) {
    %c0_i32 = arith.constant 0 : i32
    %c0_i32_0 = arith.constant 0 : i32
    %c0_i32_1 = arith.constant 0 : i32
    %c0_i32_2 = arith.constant 0 : i32
    return %arg0, %c0_i32, %c0_i32_0, %c0_i32_1 : i32, i32, i32, i32
  }
  func.func @transform_1(%arg0: i32) -> (i32, i32) {
    %c0_i32 = arith.constant 0 : i32
    %c0_i32_0 = arith.constant 0 : i32
    %c0_i32_1 = arith.constant 0 : i32
    return %c0_i32, %c0_i32_0 : i32, i32
  }
  func.func @transform_2(%arg0: i32) -> (i32, i32, i32) {
    %c0_i32 = arith.constant 0 : i32
    %c0_i32_0 = arith.constant 0 : i32
    %c0_i32_1 = arith.constant 0 : i32
    return %arg0, %c0_i32, %c0_i32_0 : i32, i32, i32
  }
  func.func @transform_3(%arg0: i32) -> (i32, i32, i32) {
    %c0_i32 = arith.constant 0 : i32
    %c0_i32_0 = arith.constant 0 : i32
    %c0_i32_1 = arith.constant 0 : i32
    return %arg0, %c0_i32, %c0_i32_0 : i32, i32, i32
  }
  func.func @transform_4(%arg0: i32) -> (i32, i32, i32) {
    %c0_i32 = arith.constant 0 : i32
    %c0_i32_0 = arith.constant 0 : i32
    %c0_i32_1 = arith.constant 0 : i32
    return %arg0, %c0_i32, %c0_i32_0 : i32, i32, i32
  }
}

module attributes {stable_mosaic.version = 11 : i64} {
  func.func @conv3x3_kernel(%arg0: i32, %arg1: memref<1x10x10x128xbf16, #tpu.memory_space<vmem>>, %arg2: memref<1152x128xbf16, #tpu.memory_space<vmem>>, %arg3: memref<1x64x128xbf16, #tpu.memory_space<vmem>>, %arg4: memref<1x1x128xf32, #tpu.memory_space<vmem>>, %arg5: memref<1x1x128xf32, #tpu.memory_space<vmem>>) attributes {dimension_semantics = [#tpu.dimension_semantics<parallel>], iteration_bounds = array<i64: 2>, scalar_prefetch = 0 : i64, scratch_operands = 0 : i64, tpu.core_type = #tpu.core_type<tc>, window_params = [{transform_indices = @transform_0, window_bounds = array<i64: 1, 10, 10, 128>}, {pipeline_mode = #tpu.pipeline_mode<synchronous>, transform_indices = @transform_1, window_bounds = array<i64: 1152, 128>}, {transform_indices = @transform_2, window_bounds = array<i64: 1, 64, 128>}, {transform_indices = @transform_3, window_bounds = array<i64: 1, 1, 128>}, {transform_indices = @transform_4, window_bounds = array<i64: 1, 1, 128>}]} {
    %c0 = arith.constant 0 : index
    %c0_0 = arith.constant 0 : index
    %c0_1 = arith.constant 0 : index
    %c0_2 = arith.constant 0 : index
    %0 = vector.load %arg1[%c0, %c0_0, %c0_1, %c0_2] : memref<1x10x10x128xbf16, #tpu.memory_space<vmem>>, vector<1x10x10x128xbf16>
    %1 = vector.shape_cast %0 : vector<1x10x10x128xbf16> to vector<10x10x128xbf16>
    %2 = vector.extract_strided_slice %1 {offsets = [0, 0, 0], sizes = [8, 8, 128], strides = [1, 1, 1]} : vector<10x10x128xbf16> to vector<8x8x128xbf16>
    %3 = vector.extract_strided_slice %1 {offsets = [0, 1, 0], sizes = [8, 8, 128], strides = [1, 1, 1]} : vector<10x10x128xbf16> to vector<8x8x128xbf16>
    %4 = vector.extract_strided_slice %1 {offsets = [0, 2, 0], sizes = [8, 8, 128], strides = [1, 1, 1]} : vector<10x10x128xbf16> to vector<8x8x128xbf16>
    %5 = vector.extract_strided_slice %1 {offsets = [1, 0, 0], sizes = [8, 8, 128], strides = [1, 1, 1]} : vector<10x10x128xbf16> to vector<8x8x128xbf16>
    %6 = vector.extract_strided_slice %1 {offsets = [1, 1, 0], sizes = [8, 8, 128], strides = [1, 1, 1]} : vector<10x10x128xbf16> to vector<8x8x128xbf16>
    %7 = vector.extract_strided_slice %1 {offsets = [1, 2, 0], sizes = [8, 8, 128], strides = [1, 1, 1]} : vector<10x10x128xbf16> to vector<8x8x128xbf16>
    %8 = vector.extract_strided_slice %1 {offsets = [2, 0, 0], sizes = [8, 8, 128], strides = [1, 1, 1]} : vector<10x10x128xbf16> to vector<8x8x128xbf16>
    %9 = vector.extract_strided_slice %1 {offsets = [2, 1, 0], sizes = [8, 8, 128], strides = [1, 1, 1]} : vector<10x10x128xbf16> to vector<8x8x128xbf16>
    %10 = vector.extract_strided_slice %1 {offsets = [2, 2, 0], sizes = [8, 8, 128], strides = [1, 1, 1]} : vector<10x10x128xbf16> to vector<8x8x128xbf16>
    %11 = tpu.concatenate %2, %3, %4, %5, %6, %7, %8, %9, %10 in 2 : vector<8x8x128xbf16>, vector<8x8x128xbf16>, vector<8x8x128xbf16>, vector<8x8x128xbf16>, vector<8x8x128xbf16>, vector<8x8x128xbf16>, vector<8x8x128xbf16>, vector<8x8x128xbf16>, vector<8x8x128xbf16> -> vector<8x8x1152xbf16>
    %12 = vector.shape_cast %11 : vector<8x8x1152xbf16> to vector<64x1152xbf16>
    %c0_3 = arith.constant 0 : index
    %c0_4 = arith.constant 0 : index
    %13 = vector.load %arg2[%c0_3, %c0_4] : memref<1152x128xbf16, #tpu.memory_space<vmem>>, vector<1152x128xbf16>
    %cst = arith.constant dense<0.000000e+00> : vector<64x128xf32>
    %14 = tpu.matmul %12, %13, %cst {dimension_numbers = #tpu.dot_dimension_numbers<[1], [0], [0], [1], [0, 0, 1, 1], [], []>} : vector<64x1152xbf16>, vector<1152x128xbf16>, vector<64x128xf32> -> vector<64x128xf32>
    %15 = arith.truncf %14 : vector<64x128xf32> to vector<64x128xbf16>
    %c0_5 = arith.constant 0 : index
    %c0_6 = arith.constant 0 : index
    %c0_7 = arith.constant 0 : index
    %16 = vector.load %arg3[%c0_5, %c0_6, %c0_7] : memref<1x64x128xbf16, #tpu.memory_space<vmem>>, vector<1x64x128xbf16>
    %17 = vector.shape_cast %16 : vector<1x64x128xbf16> to vector<64x128xbf16>
    %18 = vector.shape_cast %15 : vector<64x128xbf16> to vector<1x64x128xbf16>
    tpu.vector_store %arg3[%c0_5, %c0_6, %c0_7], %18 {strides = array<i32>} : memref<1x64x128xbf16, #tpu.memory_space<vmem>>, vector<1x64x128xbf16>,
    %cst_8 = arith.constant dense<0.000000e+00> : vector<128xf32>
    %19 = vector.multi_reduction <add>, %14, %cst_8 [0] : vector<64x128xf32> to vector<128xf32>
    %20 = vector.shape_cast %19 : vector<128xf32> to vector<1x128xf32>
    %c0_9 = arith.constant 0 : index
    %c0_10 = arith.constant 0 : index
    %c0_11 = arith.constant 0 : index
    %21 = vector.load %arg4[%c0_9, %c0_10, %c0_11] : memref<1x1x128xf32, #tpu.memory_space<vmem>>, vector<1x1x128xf32>
    %22 = vector.shape_cast %21 : vector<1x1x128xf32> to vector<1x128xf32>
    %23 = vector.shape_cast %20 : vector<1x128xf32> to vector<1x1x128xf32>
    tpu.vector_store %arg4[%c0_9, %c0_10, %c0_11], %23 {strides = array<i32>} : memref<1x1x128xf32, #tpu.memory_space<vmem>>, vector<1x1x128xf32>,
    %24 = arith.mulf %14, %14 : vector<64x128xf32>
    %cst_12 = arith.constant dense<0.000000e+00> : vector<128xf32>
    %25 = vector.multi_reduction <add>, %24, %cst_12 [0] : vector<64x128xf32> to vector<128xf32>
    %26 = vector.shape_cast %25 : vector<128xf32> to vector<1x128xf32>
    %c0_13 = arith.constant 0 : index
    %c0_14 = arith.constant 0 : index
    %c0_15 = arith.constant 0 : index
    %27 = vector.load %arg5[%c0_13, %c0_14, %c0_15] : memref<1x1x128xf32, #tpu.memory_space<vmem>>, vector<1x1x128xf32>
    %28 = vector.shape_cast %27 : vector<1x1x128xf32> to vector<1x128xf32>
    %29 = vector.shape_cast %26 : vector<1x128xf32> to vector<1x1x128xf32>
    tpu.vector_store %arg5[%c0_13, %c0_14, %c0_15], %29 {strides = array<i32>} : memref<1x1x128xf32, #tpu.memory_space<vmem>>, vector<1x1x128xf32>,
    return
  }
  func.func @transform_0(%arg0: i32) -> (i32, i32, i32, i32) {
    %c0_i32 = arith.constant 0 : i32
    %c0_i32_0 = arith.constant 0 : i32
    %c0_i32_1 = arith.constant 0 : i32
    %c0_i32_2 = arith.constant 0 : i32
    return %arg0, %c0_i32, %c0_i32_0, %c0_i32_1 : i32, i32, i32, i32
  }
  func.func @transform_1(%arg0: i32) -> (i32, i32) {
    %c0_i32 = arith.constant 0 : i32
    %c0_i32_0 = arith.constant 0 : i32
    %c0_i32_1 = arith.constant 0 : i32
    return %c0_i32, %c0_i32_0 : i32, i32
  }
  func.func @transform_2(%arg0: i32) -> (i32, i32, i32) {
    %c0_i32 = arith.constant 0 : i32
    %c0_i32_0 = arith.constant 0 : i32
    %c0_i32_1 = arith.constant 0 : i32
    return %arg0, %c0_i32, %c0_i32_0 : i32, i32, i32
  }
  func.func @transform_3(%arg0: i32) -> (i32, i32, i32) {
    %c0_i32 = arith.constant 0 : i32
    %c0_i32_0 = arith.constant 0 : i32
    %c0_i32_1 = arith.constant 0 : i32
    return %arg0, %c0_i32, %c0_i32_0 : i32, i32, i32
  }
  func.func @transform_4(%arg0: i32) -> (i32, i32, i32) {
    %c0_i32 = arith.constant 0 : i32
    %c0_i32_0 = arith.constant 0 : i32
    %c0_i32_1 = arith.constant 0 : i32
    return %arg0, %c0_i32, %c0_i32_0 : i32, i32, i32
  }
}

module attributes {stable_mosaic.version = 11 : i64} {
  func.func @conv3x3_kernel(%arg0: i32, %arg1: memref<1x6x6x128xbf16, #tpu.memory_space<vmem>>, %arg2: memref<1152x128xbf16, #tpu.memory_space<vmem>>, %arg3: memref<1x16x128xbf16, #tpu.memory_space<vmem>>, %arg4: memref<1x1x128xf32, #tpu.memory_space<vmem>>, %arg5: memref<1x1x128xf32, #tpu.memory_space<vmem>>) attributes {dimension_semantics = [#tpu.dimension_semantics<parallel>], iteration_bounds = array<i64: 2>, scalar_prefetch = 0 : i64, scratch_operands = 0 : i64, tpu.core_type = #tpu.core_type<tc>, window_params = [{transform_indices = @transform_0, window_bounds = array<i64: 1, 6, 6, 128>}, {pipeline_mode = #tpu.pipeline_mode<synchronous>, transform_indices = @transform_1, window_bounds = array<i64: 1152, 128>}, {transform_indices = @transform_2, window_bounds = array<i64: 1, 16, 128>}, {transform_indices = @transform_3, window_bounds = array<i64: 1, 1, 128>}, {transform_indices = @transform_4, window_bounds = array<i64: 1, 1, 128>}]} {
    %c0 = arith.constant 0 : index
    %c0_0 = arith.constant 0 : index
    %c0_1 = arith.constant 0 : index
    %c0_2 = arith.constant 0 : index
    %0 = vector.load %arg1[%c0, %c0_0, %c0_1, %c0_2] : memref<1x6x6x128xbf16, #tpu.memory_space<vmem>>, vector<1x6x6x128xbf16>
    %1 = vector.shape_cast %0 : vector<1x6x6x128xbf16> to vector<6x6x128xbf16>
    %2 = vector.extract_strided_slice %1 {offsets = [0, 0, 0], sizes = [4, 4, 128], strides = [1, 1, 1]} : vector<6x6x128xbf16> to vector<4x4x128xbf16>
    %3 = vector.extract_strided_slice %1 {offsets = [0, 1, 0], sizes = [4, 4, 128], strides = [1, 1, 1]} : vector<6x6x128xbf16> to vector<4x4x128xbf16>
    %4 = vector.extract_strided_slice %1 {offsets = [0, 2, 0], sizes = [4, 4, 128], strides = [1, 1, 1]} : vector<6x6x128xbf16> to vector<4x4x128xbf16>
    %5 = vector.extract_strided_slice %1 {offsets = [1, 0, 0], sizes = [4, 4, 128], strides = [1, 1, 1]} : vector<6x6x128xbf16> to vector<4x4x128xbf16>
    %6 = vector.extract_strided_slice %1 {offsets = [1, 1, 0], sizes = [4, 4, 128], strides = [1, 1, 1]} : vector<6x6x128xbf16> to vector<4x4x128xbf16>
    %7 = vector.extract_strided_slice %1 {offsets = [1, 2, 0], sizes = [4, 4, 128], strides = [1, 1, 1]} : vector<6x6x128xbf16> to vector<4x4x128xbf16>
    %8 = vector.extract_strided_slice %1 {offsets = [2, 0, 0], sizes = [4, 4, 128], strides = [1, 1, 1]} : vector<6x6x128xbf16> to vector<4x4x128xbf16>
    %9 = vector.extract_strided_slice %1 {offsets = [2, 1, 0], sizes = [4, 4, 128], strides = [1, 1, 1]} : vector<6x6x128xbf16> to vector<4x4x128xbf16>
    %10 = vector.extract_strided_slice %1 {offsets = [2, 2, 0], sizes = [4, 4, 128], strides = [1, 1, 1]} : vector<6x6x128xbf16> to vector<4x4x128xbf16>
    %11 = tpu.concatenate %2, %3, %4, %5, %6, %7, %8, %9, %10 in 2 : vector<4x4x128xbf16>, vector<4x4x128xbf16>, vector<4x4x128xbf16>, vector<4x4x128xbf16>, vector<4x4x128xbf16>, vector<4x4x128xbf16>, vector<4x4x128xbf16>, vector<4x4x128xbf16>, vector<4x4x128xbf16> -> vector<4x4x1152xbf16>
    %12 = vector.shape_cast %11 : vector<4x4x1152xbf16> to vector<16x1152xbf16>
    %c0_3 = arith.constant 0 : index
    %c0_4 = arith.constant 0 : index
    %13 = vector.load %arg2[%c0_3, %c0_4] : memref<1152x128xbf16, #tpu.memory_space<vmem>>, vector<1152x128xbf16>
    %cst = arith.constant dense<0.000000e+00> : vector<16x128xf32>
    %14 = tpu.matmul %12, %13, %cst {dimension_numbers = #tpu.dot_dimension_numbers<[1], [0], [0], [1], [0, 0, 1, 1], [], []>} : vector<16x1152xbf16>, vector<1152x128xbf16>, vector<16x128xf32> -> vector<16x128xf32>
    %15 = arith.truncf %14 : vector<16x128xf32> to vector<16x128xbf16>
    %c0_5 = arith.constant 0 : index
    %c0_6 = arith.constant 0 : index
    %c0_7 = arith.constant 0 : index
    %16 = vector.load %arg3[%c0_5, %c0_6, %c0_7] : memref<1x16x128xbf16, #tpu.memory_space<vmem>>, vector<1x16x128xbf16>
    %17 = vector.shape_cast %16 : vector<1x16x128xbf16> to vector<16x128xbf16>
    %18 = vector.shape_cast %15 : vector<16x128xbf16> to vector<1x16x128xbf16>
    tpu.vector_store %arg3[%c0_5, %c0_6, %c0_7], %18 {strides = array<i32>} : memref<1x16x128xbf16, #tpu.memory_space<vmem>>, vector<1x16x128xbf16>,
    %cst_8 = arith.constant dense<0.000000e+00> : vector<128xf32>
    %19 = vector.multi_reduction <add>, %14, %cst_8 [0] : vector<16x128xf32> to vector<128xf32>
    %20 = vector.shape_cast %19 : vector<128xf32> to vector<1x128xf32>
    %c0_9 = arith.constant 0 : index
    %c0_10 = arith.constant 0 : index
    %c0_11 = arith.constant 0 : index
    %21 = vector.load %arg4[%c0_9, %c0_10, %c0_11] : memref<1x1x128xf32, #tpu.memory_space<vmem>>, vector<1x1x128xf32>
    %22 = vector.shape_cast %21 : vector<1x1x128xf32> to vector<1x128xf32>
    %23 = vector.shape_cast %20 : vector<1x128xf32> to vector<1x1x128xf32>
    tpu.vector_store %arg4[%c0_9, %c0_10, %c0_11], %23 {strides = array<i32>} : memref<1x1x128xf32, #tpu.memory_space<vmem>>, vector<1x1x128xf32>,
    %24 = arith.mulf %14, %14 : vector<16x128xf32>
    %cst_12 = arith.constant dense<0.000000e+00> : vector<128xf32>
    %25 = vector.multi_reduction <add>, %24, %cst_12 [0] : vector<16x128xf32> to vector<128xf32>
    %26 = vector.shape_cast %25 : vector<128xf32> to vector<1x128xf32>
    %c0_13 = arith.constant 0 : index
    %c0_14 = arith.constant 0 : index
    %c0_15 = arith.constant 0 : index
    %27 = vector.load %arg5[%c0_13, %c0_14, %c0_15] : memref<1x1x128xf32, #tpu.memory_space<vmem>>, vector<1x1x128xf32>
    %28 = vector.shape_cast %27 : vector<1x1x128xf32> to vector<1x128xf32>
    %29 = vector.shape_cast %26 : vector<1x128xf32> to vector<1x1x128xf32>
    tpu.vector_store %arg5[%c0_13, %c0_14, %c0_15], %29 {strides = array<i32>} : memref<1x1x128xf32, #tpu.memory_space<vmem>>, vector<1x1x128xf32>,
    return
  }
  func.func @transform_0(%arg0: i32) -> (i32, i32, i32, i32) {
    %c0_i32 = arith.constant 0 : i32
    %c0_i32_0 = arith.constant 0 : i32
    %c0_i32_1 = arith.constant 0 : i32
    %c0_i32_2 = arith.constant 0 : i32
    return %arg0, %c0_i32, %c0_i32_0, %c0_i32_1 : i32, i32, i32, i32
  }
  func.func @transform_1(%arg0: i32) -> (i32, i32) {
    %c0_i32 = arith.constant 0 : i32
    %c0_i32_0 = arith.constant 0 : i32
    %c0_i32_1 = arith.constant 0 : i32
    return %c0_i32, %c0_i32_0 : i32, i32
  }
  func.func @transform_2(%arg0: i32) -> (i32, i32, i32) {
    %c0_i32 = arith.constant 0 : i32
    %c0_i32_0 = arith.constant 0 : i32
    %c0_i32_1 = arith.constant 0 : i32
    return %arg0, %c0_i32, %c0_i32_0 : i32, i32, i32
  }
  func.func @transform_3(%arg0: i32) -> (i32, i32, i32) {
    %c0_i32 = arith.constant 0 : i32
    %c0_i32_0 = arith.constant 0 : i32
    %c0_i32_1 = arith.constant 0 : i32
    return %arg0, %c0_i32, %c0_i32_0 : i32, i32, i32
  }
  func.func @transform_4(%arg0: i32) -> (i32, i32, i32) {
    %c0_i32 = arith.constant 0 : i32
    %c0_i32_0 = arith.constant 0 : i32
    %c0_i32_1 = arith.constant 0 : i32
    return %arg0, %c0_i32, %c0_i32_0 : i32, i32, i32
  }
}

</mosaic_0001>

<bundles_post_ra>
// kernel: image_encoder.6
= control target key start
LH: loop header
LB: loop body
LE: loop exit
PB: predicated region body
PF: predicated region fallthrough
CT: control target
= control target key end

     0   :  { %s2184_s15 = smov 0   ;;  %s2718_s0 = inlined_call_operand.vmem [shape: bf16[2,18,18,4], index: 0, kind: input, shape index: {}]   ;;  %s2719_s1 = inlined_call_operand.vmem [shape: bf16[36,128], index: 1, kind: input, shape index: {}]   ;;  %s2720_s2 = inlined_call_operand.vmem [shape: bf16[2,256,128], index: 2, kind: output, shape index: {0}]   ;;  %s2721_s3 = inlined_call_operand.vmem [shape: f32[2,1,128], index: 3, kind: output, shape index: {1}]   ;;  %s2722_s4 = inlined_call_operand.vmem [shape: f32[2,1,128], index: 4, kind: output, shape index: {2}]  }
   0x1 LB: > { %s1797_s16 = sadd.s32 4294967295, %s2149_s15   ;;  %p1801_p0 = scmp.ge.s32.totalorder %s2149_s15, 1  ;;  %s2149_s15 = sphi %s2184_s15, %s15_s15  }
   0x2   : > { %p167_p1 = scmp.lt.s32.totalorder %s2149_s15, 3 }
   0x4   : > { %p168_p2 = pnand %p1801_p0, %p167_p1 }
   0x5   : > { %p199_p3 = scmp.lt.s32.totalorder (!%p168_p2), %s1797_s16, 1  ;;  %vm623_vm0 = vcmask (!%p168_p2), 1046528   ;;  %s2151_s21 = smov (!%p168_p2), 12   ;;  %vm398_vm1 = vsmask.f32 (!%p168_p2), 7424  ;;  %v2124_v44 = vld [vmem:[%s2719_s1] sm:$0xff] (!%p168_p2)  }
   0x6   : > { %171 = sbr.rel (%p168_p2) target bundleno = 623 (0x26f), region = 28  ;;  %s2152_s22 = smov (!%p168_p2), 20   ;;  %2041 = vmatprep.subr.bf16.mxu0 (!%p168_p2), %v2124_v44  ;;  %v2126_v46 = vld [vmem:[%s2719_s1 + $0x8] sm:$0xff] (!%p168_p2)   ;;  %2079 = vmatprep.subr.bf16.mxu1 (!%p168_p2), %v2124_v44  ;;  %v2128_v50 = vld [vmem:[%s2719_s1 + $0x10] ss:$0 sps:$4 sm:$0x33] (!%p168_p2)  }
   0x7   : > { %s2153_s23 = smov (!%p168_p2), 8   ;;  %s2154_s24 = smov (!%p168_p2), 4   ;;  %2042 = vmatpush3.bf16.msra.mxu0 (!%p168_p2), %v2124_v44  ;;  %2082 = vmatpush3.bf16.msra.mxu1 (!%p168_p2), %v2124_v44  ;;  %vm1259_vm2 = vcmask (!%p168_p2), 1041408   ;;  %vm942_vm3 = vcmask (!%p168_p2), 31744   ;;  %vm975_vm4 = vcmask (!%p168_p2), 64512   ;;  %vm1008_vm5 = vcmask (!%p168_p2), 97280  }
   0x8   : > { %s2155_s25 = smov (!%p168_p2), 16   ;;  %s2156_s28 = smov (!%p168_p2), 24   ;;  %2043 = vmatprep.subr.bf16.mxu0 (!%p168_p2), %v2126_v46  ;;  %2080 = vmatprep.subr.bf16.mxu1 (!%p168_p2), %v2126_v46  ;;  %v1261_v54 = vsel (!%p168_p2), %vm1259_vm2, %v2128_v50, 0  ;;  %vm1041_vm6 = vcmask (!%p168_p2), 130048   ;;  %vm1074_vm7 = vcmask (!%p168_p2), 162816   ;;  %vm1107_vm8 = vcmask (!%p168_p2), 195584  }
   0x9   : > { %s2157_s5 = smov (!%p168_p2), 28   ;;  %s2158_s8 = smov (!%p168_p2), 32   ;;  %vm1140_vm9 = vcmask (!%p168_p2), 228352   ;;  %vm1173_vm10 = vcmask (!%p168_p2), 261120   ;;  %vm1226_vm11 = vcmask (!%p168_p2), 293888  }
   0xb   : > { %2044 = vmatpush3.bf16.msra.mxu0 (!%p168_p2), %v2126_v46  ;;  %2083 = vmatpush3.bf16.msra.mxu1 (!%p168_p2), %v2126_v46 }
   0xc   : > { %2085 = vmatprep.subr.msk.bf16.mxu0 (!%p168_p2), %vm1259_vm2, %v2128_v50  ;;  %2086 = vmatprep.subr.msk.bf16.mxu1 (!%p168_p2), %vm1259_vm2, %v2128_v50 }
   0xd   : > { %s2724_s16 = smov (!%p199_p3, %s1797_s16), 1 }
   0xe   : > { %s2087_s17 = smul.u32 216, %s2724_s16  ;;  %s1894_s9 = sshll.u32 %s2724_s16, 7 }
   0xf   : > { %2046 = vmatpush3.bf16.msra.mxu0 %v1261_v54  ;;  %2084 = vmatpush3.bf16.msra.mxu1 %v1261_v54  ;;  %s2677_s12 = scalar_lea.vmem %s2720_s2, %s1894_s9 }
  0x10   : > { %s2198_s20 = scalar_lea.vmem %s2718_s0, %s2087_s17  ;;  %s211_s17 = scalar_lea.vmem %s2721_s3, %s2724_s16 }
  0x11   : > { %v2201_v0 = vld [vmem:[%s2198_s20 + $0x18] sm:$0xff]   ;;  %v2204_v1 = vld [vmem:[%s2198_s20 + $0xc] sm:$0xff]   ;;  %v2106_v2 = vld [vmem:[%s2198_s20 + $0x14] ss:$0 sps:$4 sm:$0x11]  }
  0x12   : > { %711 = vrot.lane.b32.xlu1 %v2201_v0, %s2151_s21  ;;  %v2210_v3 = vld [vmem:[%s2198_s20] sm:$0xff]   ;;  %709 = vrot.lane.b32.xlu0 %v2204_v1, %s2151_s21  ;;  %v627_v4 = vrot.slane %v2204_v1, 1  ;;  %v628_v5 = vrot.slane %v2106_v2, 1  ;;  %v2108_v6 = vld [vmem:[%s2198_s20 + $0x8] ss:$0 sps:$4 sm:$0x11]  }
  0x13   : > { %v624_v7 = vrot.slane %v2210_v3, 1  ;;  %v400_v8 = vshrl.u32 %v2210_v3, 16  ;;  %v402_v9 = vshll.u32 %v2210_v3, 16  ;;  %v412_v10 = vshrl.u32 %v2204_v1, 16  ;;  %v2230_v30 = vld [vmem:[%s2198_s20 + $0x24] sm:$0xff]   ;;  %v2260_v49 = vld [vmem:[%s2198_s20 + $0x30] sm:$0xff]  }
  0x14   : > { %v629_v11 = vsel %vm623_vm0, %v627_v4, %v628_v5  ;;  %v625_v12 = vrot.slane %v2108_v6, 1  ;;  %v407_v13 = vshll.u32 %v2108_v6, 16  ;;  %v2109_v14 = vld [vmem:[%s2198_s20 + $0x20] ss:$0 sps:$4 sm:$0x11]   ;;  %v414_v15 = vshll.u32 %v2204_v1, 16 }
  0x15   : > { %v404_v16 = vrot.slane %v402_v9, 1  ;;  %v419_v17 = vshll.u32 %v2106_v2, 16  ;;  %v426_v18 = vshll.u32 %v2201_v0, 16  ;;  %v630_v23 = vrot.slane %v2201_v0, 1  ;;  %v2276_v60 = vld [vmem:[%s2198_s20 + $0x3c] sm:$0xff]  }
  0x16   : > { %791 = vrot.lane.b32.xlu0 %v629_v11, %s2152_s22  ;;  %v626_v19 = vsel %vm623_vm0, %v624_v7, %v625_v12  ;;  %v409_v20 = vrot.slane %v407_v13, 1  ;;  %v416_v21 = vrot.slane %v414_v15, 1  ;;  %v424_v25 = vshrl.u32 %v2201_v0, 16  ;;  %v2111_v33 = vld [vmem:[%s2198_s20 + $0x2c] ss:$0 sps:$4 sm:$0x11]  }
  0x17   : > { %672 = vrot.lane.b32.xlu1 %v626_v19, %s2153_s23  ;;  %v405_v22 = vor.u32 %v404_v16, %v400_v8  ;;  %v421_v24 = vrot.slane %v419_v17, 1  ;;  %v631_v26 = vrot.slane %v2109_v14, 1  ;;  %v428_v28 = vrot.slane %v426_v18, 1  ;;  %v2113_v51 = vld [vmem:[%s2198_s20 + $0x38] ss:$0 sps:$4 sm:$0x11]  }
  0x18   : > { %v417_v27 = vor.u32 %v416_v21, %v412_v10  ;;  %v431_v29 = vshll.u32 %v2109_v14, 16  ;;  %v438_v37 = vshll.u32 %v2230_v30, 16  ;;  %v436_v39 = vshrl.u32 %v2230_v30, 16  ;;  %v2115_v2 = vld [vmem:[%s2198_s20 + $0x44] ss:$0 sps:$4 sm:$0x11]  }
  0x19   : > { %v410_v31 = vsel %vm398_vm1, %v405_v22, %v409_v20  ;;  %v632_v34 = vsel %vm623_vm0, %v630_v23, %v631_v26  ;;  %v429_v35 = vor.u32 %v428_v28, %v424_v25  ;;  %v443_v41 = vshll.u32 %v2111_v33, 16  ;;  %v2301_v14 = vld [vmem:[%s2198_s20 + $0x48] sm:$0xff]   ;;  %v2117_v16 = vld [vmem:[%s2198_s20 + $0x50] ss:$0 sps:$4 sm:$0x11]   ;;  %v2314_v23 = vld [vmem:[%s2198_s20 + $0x54] sm:$0xff]  }
  0x1a   : > { %591 = vrot.lane.b32.xlu0 %v410_v31, %s2154_s24  ;;  %v422_v32 = vsel %vm398_vm1, %v417_v27, %v421_v24  ;;  %v433_v36 = vrot.slane %v431_v29, 1  ;;  %v440_v40 = vrot.slane %v438_v37, 1  ;;  %v633_v47 = vrot.slane %v2230_v30, 1  ;;  %v2119_v27 = vld [vmem:[%s2198_s20 + $0x5c] ss:$0 sps:$4 sm:$0x11]  }
  0x1b   : > { %674 = vrot.lane.b32.xlu1 %v629_v11, %s2153_s23  ;;  %v445_v43 = vrot.slane %v443_v41, 1  ;;  %v634_v48 = vrot.slane %v2111_v33, 1  ;;  %v450_v53 = vshll.u32 %v2260_v49, 16  ;;  %v448_v55 = vshrl.u32 %v2260_v49, 16 }
  0x1c   : > { %v434_v38 = vsel %vm398_vm1, %v429_v35, %v433_v36  ;;  %v441_v42 = vor.u32 %v440_v40, %v436_v39  ;;  %v455_v57 = vshll.u32 %v2113_v51, 16  ;;  %v636_v62 = vrot.slane %v2260_v49, 1  ;;  %v2339_v39 = vld [vmem:[%s2198_s20 + $0x60] sm:$0xff]   ;;  %v2121_v41 = vld [vmem:[%s2198_s20 + $0x68] ss:$0 sps:$4 sm:$0x11]  }
  0x1d   : > { %v635_v52 = vsel %vm623_vm0, %v633_v47, %v634_v48  ;;  %v452_v56 = vrot.slane %v450_v53, 1  ;;  %v637_v63 = vrot.slane %v2113_v51, 1  ;;  %v462_v4 = vshll.u32 %v2276_v60, 16  ;;  %v2352_v48 = vld [vmem:[%s2198_s20 + $0x6c] sm:$0xff]  }
  0x1e   : > { %593 = vrot.lane.b32.xlu0 %v422_v32, %s2154_s24  ;;  %v446_v45 = vsel %vm398_vm1, %v441_v42, %v445_v43  ;;  %v457_v59 = vrot.slane %v455_v57, 1  ;;  %v460_v6 = vshrl.u32 %v2276_v60, 16  ;;  %v467_v8 = vshll.u32 %v2115_v2, 16  ;;  %v2123_v53 = vld [vmem:[%s2198_s20 + $0x74] ss:$0 sps:$4 sm:$0x11]  }
  0x1f   : > { %793 = vrot.lane.b32.xlu1 %v632_v34, %s2152_s22  ;;  %v453_v58 = vor.u32 %v452_v56, %v448_v55  ;;  %v638_v5 = vsel %vm623_vm0, %v636_v62, %v637_v63  ;;  %v464_v7 = vrot.slane %v462_v4, 1  ;;  %v639_v12 = vrot.slane %v2276_v60, 1 }
  0x20   : > { %v469_v10 = vrot.slane %v467_v8, 1  ;;  %v640_v13 = vrot.slane %v2115_v2, 1  ;;  %v474_v17 = vshll.u32 %v2301_v14, 16  ;;  %v472_v18 = vshrl.u32 %v2301_v14, 16 }
  0x21   : > { %v458_v61 = vsel %vm398_vm1, %v453_v58, %v457_v59  ;;  %v465_v9 = vor.u32 %v464_v7, %v460_v6  ;;  %v479_v20 = vshll.u32 %v2117_v16, 16  ;;  %v642_v25 = vrot.slane %v2301_v14, 1 }
  0x22   : > { %756 = vrot.lane.b32.xlu0 %v422_v32, %s2155_s25  ;;  %v641_v15 = vsel %vm623_vm0, %v639_v12, %v640_v13  ;;  %v476_v19 = vrot.slane %v474_v17, 1  ;;  %v643_v26 = vrot.slane %v2117_v16, 1  ;;  %v486_v28 = vshll.u32 %v2314_v23, 16  ;;  %v2127_v13 = vld [vmem:[%s2198_s20 + $0x80] ss:$0 sps:$4 sm:$0x11]  }
  0x23   : > { %758 = vrot.lane.b32.xlu1 %v434_v38, %s2155_s25  ;;  %v470_v11 = vsel %vm398_vm1, %v465_v9, %v469_v10  ;;  %v481_v22 = vrot.slane %v479_v20, 1  ;;  %v484_v31 = vshrl.u32 %v2314_v23, 16  ;;  %v491_v33 = vshll.u32 %v2119_v27, 16  ;;  %v2377_v9 = vld [vmem:[%s2198_s20 + $0x78] sm:$0xff]  }
  0x24   : > { %v477_v21 = vor.u32 %v476_v19, %v472_v18  ;;  %v644_v29 = vsel %vm623_vm0, %v642_v25, %v643_v26  ;;  %v488_v32 = vrot.slane %v486_v28, 1  ;;  %v645_v37 = vrot.slane %v2314_v23, 1  ;;  %v2395_v28 = vld [vmem:[%s2198_s20 + $0x84] sm:$0xff]  }
  0x25   : > { %v493_v35 = vrot.slane %v491_v33, 1  ;;  %v498_v42 = vshll.u32 %v2339_v39, 16  ;;  %v496_v43 = vshrl.u32 %v2339_v39, 16  ;;  %v648_v51 = vrot.slane %v2339_v39, 1 }
  0x26   : > { %828 = vrot.lane.b32.xlu0 %v2201_v0, %s2156_s28  ;;  %v482_v24 = vsel %vm398_vm1, %v477_v21, %v481_v22  ;;  %v510_v54 = vshll.u32 %v2352_v48, 16  ;;  %v508_v56 = vshrl.u32 %v2352_v48, 16  ;;  %v515_v58 = vshll.u32 %v2123_v53, 16 }
  0x27   : > { %830 = vrot.lane.b32.xlu1 %v2230_v30, %s2156_s28  ;;  %v500_v44 = vrot.slane %v498_v42, 1  ;;  %v651_v6 = vrot.slane %v2352_v48, 1  ;;  %v652_v7 = vrot.slane %v2123_v53, 1  ;;  %v520_v19 = vshrl.u32 %v2377_v9, 16 }
  0x28   : > { %v512_v57 = vrot.slane %v510_v54, 1  ;;  %v517_v63 = vrot.slane %v515_v58, 1  ;;  %v527_v21 = vshll.u32 %v2127_v13, 16  ;;  %v654_v33 = vrot.slane %v2377_v9, 1 }
  0x29   : > { %v501_v46 = vor.u32 %v500_v44, %v496_v43 }
  0x2a   : > { %875 = vrot.lane.b32.xlu0 %v434_v38, %s2157_s5  ;;  %v513_v62 = vor.u32 %v512_v57, %v508_v56 }
  0x2b   : > { %877 = vrot.lane.b32.xlu1 %v446_v45, %s2157_s5 }
  0x2c   : > { %v518_v4 = vsel %vm398_vm1, %v513_v62, %v517_v63 }
  0x2e   : > { %910 = vrot.lane.b32.xlu0 %v632_v34, %s2158_s8 }
  0x2f   : > { %595 = vrot.lane.b32.xlu1 %v434_v38, %s2154_s24  ;;  %v646_v38 = vrot.slane %v2119_v27, 1 }
  0x31   : > { %v647_v40 = vsel %vm623_vm0, %v645_v37, %v646_v38  ;;  %v2130_v38 = vld [vmem:[%s2198_s20 + $0x8c] ss:$0 sps:$4 sm:$0x11]  }
  0x32   : > { %912 = vrot.lane.b32.xlu0 %v635_v52, %s2158_s8 }
  0x33   : > { %597 = vrot.lane.b32.xlu1 %v446_v45, %s2154_s24 }
  0x36   : > { %676 = vrot.lane.b32.xlu0 %v632_v34, %s2153_s23  ;;  %v489_v34 = vor.u32 %v488_v32, %v484_v31 }
  0x37   : > { %678 = vrot.lane.b32.xlu1 %v635_v52, %s2153_s23 }
  0x38   : > { %v494_v36 = vsel %vm398_vm1, %v489_v34, %v493_v35  ;;  %v655_v34 = vrot.slane %v2127_v13, 1 }
  0x3a   : > { %713 = vrot.lane.b32.xlu0 %v2230_v30, %s2151_s21 }
  0x3b   : > { %715 = vrot.lane.b32.xlu1 %v2260_v49, %s2151_s21 }
  0x3e   : > { %760 = vrot.lane.b32.xlu0 %v446_v45, %s2155_s25  ;;  %v503_v45 = vshll.u32 %v2121_v41, 16 }
  0x3f   : > { %762 = vrot.lane.b32.xlu1 %v458_v61, %s2155_s25 }
  0x40   : > { %v505_v47 = vrot.slane %v503_v45, 1  ;;  %v656_v45 = vsel %vm623_vm0, %v654_v33, %v655_v34 }
  0x42   : > { %795 = vrot.lane.b32.xlu0 %v635_v52, %s2152_s22  ;;  %v506_v50 = vsel %vm398_vm1, %v501_v46, %v505_v47  ;;  %v649_v52 = vrot.slane %v2121_v41, 1 }
  0x43   : > { %797 = vrot.lane.b32.xlu1 %v638_v5, %s2152_s22 }
  0x44   : > { %v650_v55 = vsel %vm623_vm0, %v648_v51, %v649_v52  ;;  %v539_v52 = vshll.u32 %v2130_v38, 16 }
  0x46   : > { %832 = vrot.lane.b32.xlu0 %v2260_v49, %s2156_s28 }
  0x47   : > { %834 = vrot.lane.b32.xlu1 %v2276_v60, %s2156_s28 }
  0x4a   : > { %879 = vrot.lane.b32.xlu0 %v458_v61, %s2157_s5 }
  0x4b   : > { %881 = vrot.lane.b32.xlu1 %v470_v11, %s2157_s5 }
  0x4e   : > { %914 = vrot.lane.b32.xlu0 %v638_v5, %s2158_s8 }
  0x4f   : > { %599 = vrot.lane.b32.xlu1 %v458_v61, %s2154_s24 }
  0x52   : > { %916 = vrot.lane.b32.xlu0 %v641_v15, %s2158_s8 }
  0x53   : > { %601 = vrot.lane.b32.xlu1 %v470_v11, %s2154_s24 }
  0x56   : > { %680 = vrot.lane.b32.xlu0 %v638_v5, %s2153_s23 }
  0x57   : > { %682 = vrot.lane.b32.xlu1 %v641_v15, %s2153_s23 }
  0x5a   : > { %717 = vrot.lane.b32.xlu0 %v2276_v60, %s2151_s21 }
  0x5b   : > { %719 = vrot.lane.b32.xlu1 %v2301_v14, %s2151_s21 }
  0x5e   : > { %764 = vrot.lane.b32.xlu0 %v470_v11, %s2155_s25  ;;  %v653_v11 = vsel %vm623_vm0, %v651_v6, %v652_v7  ;;  %v657_v6 = vrot.slane %v2395_v28, 1  ;;  %v658_v7 = vrot.slane %v2130_v38, 1 }
  0x5f   : > { %766 = vrot.lane.b32.xlu1 %v482_v24, %s2155_s25 }
  0x62   : > { %799 = vrot.lane.b32.xlu0 %v641_v15, %s2152_s22  ;;  %v522_v15 = vshll.u32 %v2377_v9, 16 }
  0x63   : > { %801 = vrot.lane.b32.xlu1 %v644_v29, %s2152_s22 }
  0x64   : > { %v524_v20 = vrot.slane %v522_v15, 1  ;;  %v2132_v15 = vld [vmem:[%s2198_s20 + $0x98] ss:$0 sps:$4 sm:$0x11]  }
  0x66   : > { %836 = vrot.lane.b32.xlu0 %v2301_v14, %s2156_s28  ;;  %v525_v27 = vor.u32 %v524_v20, %v520_v19 }
  0x67   : > { %838 = vrot.lane.b32.xlu1 %v2314_v23, %s2156_s28 }
  0x6a   : > { %883 = vrot.lane.b32.xlu0 %v482_v24, %s2157_s5 }
  0x6b   : > { %885 = vrot.lane.b32.xlu1 %v494_v36, %s2157_s5 }
  0x6e   : > { %918 = vrot.lane.b32.xlu0 %v644_v29, %s2158_s8 }
  0x6f   : > { %603 = vrot.lane.b32.xlu1 %v482_v24, %s2154_s24 }
  0x72   : > { %920 = vrot.lane.b32.xlu0 %v647_v40, %s2158_s8 }
  0x73   : > { %605 = vrot.lane.b32.xlu1 %v494_v36, %s2154_s24 }
  0x76   : > { %684 = vrot.lane.b32.xlu0 %v644_v29, %s2153_s23 }
  0x77   : > { %686 = vrot.lane.b32.xlu1 %v647_v40, %s2153_s23 }
  0x7a   : > { %721 = vrot.lane.b32.xlu0 %v2314_v23, %s2151_s21 }
  0x7b   : > { %723 = vrot.lane.b32.xlu1 %v2339_v39, %s2151_s21 }
  0x7e   : > { %768 = vrot.lane.b32.xlu0 %v494_v36, %s2155_s25 }
  0x7f   : > { %770 = vrot.lane.b32.xlu1 %v506_v50, %s2155_s25 }
  0x82   : > { %803 = vrot.lane.b32.xlu0 %v647_v40, %s2152_s22  ;;  %v534_v40 = vshll.u32 %v2395_v28, 16 }
  0x83   : > { %805 = vrot.lane.b32.xlu1 %v650_v55, %s2152_s22 }
  0x84   : > { %v712_v59 = vpop.permute.xlu1 %711  ;;  %v710_v61 = vpop.permute.xlu0 %709  ;;  %v536_v51 = vrot.slane %v534_v40, 1 }
  0x86   : > { %840 = vrot.lane.b32.xlu0 %v2339_v39, %s2156_s28 }
  0x87   : > { %842 = vrot.lane.b32.xlu1 %v2352_v48, %s2156_s28 }
  0x88   : > { %v792_v2 = vpop.permute.xlu0 %791 }
  0x89   : > { %v673_v5 = vpop.permute.xlu1 %672 }
  0x8a   : > { %887 = vrot.lane.b32.xlu0 %v506_v50, %s2157_s5 }
  0x8b   : > { %889 = vrot.lane.b32.xlu1 %v518_v4, %s2157_s5 }
  0x8c   : > { %v592_v8 = vpop.permute.xlu0 %591 }
  0x8d   : > { %v675_v10 = vpop.permute.xlu1 %674  ;;  %v944_v17 = vsel %vm942_vm3, %v2210_v3, %v592_v8  ;;  %v529_v3 = vrot.slane %v527_v21, 1  ;;  %v551_v21 = vshll.u32 %v2132_v15, 16 }
  0x8e   : > { %922 = vrot.lane.b32.xlu0 %v650_v55, %s2158_s8  ;;  %v977_v25 = vsel %vm975_vm4, %v944_v17, %v673_v5 }
  0x8f   : > { %607 = vrot.lane.b32.xlu1 %v506_v50, %s2154_s24  ;;  %v1010_v32 = vsel %vm1008_vm5, %v977_v25, %v710_v61  ;;  %v530_v37 = vsel %vm398_vm1, %v525_v27, %v529_v3  ;;  %v532_v50 = vshrl.u32 %v2395_v28, 16  ;;  %v541_v61 = vrot.slane %v539_v52, 1  ;;  %v2448_v27 = vld [vmem:[%s2198_s20 + $0x9c] sm:$0xff]  }
  0x90   : > { %v594_v12 = vpop.permute.xlu0 %593 }
  0x91   : > { %v794_v16 = vpop.permute.xlu1 %793  ;;  %v946_v24 = vsel %vm942_vm3, %v2204_v1, %v594_v12  ;;  %v659_v12 = vsel %vm623_vm0, %v657_v6, %v658_v7  ;;  %v663_v6 = vrot.slane %v2448_v27, 1 }
  0x92   : > { %924 = vrot.lane.b32.xlu0 %v653_v11, %s2158_s8  ;;  %v979_v29 = vsel %vm975_vm4, %v946_v24, %v675_v10  ;;  %v2435_v10 = vld [vmem:[%s2198_s20 + $0x90] sm:$0xff]  }
  0x93   : > { %609 = vrot.lane.b32.xlu1 %v518_v4, %s2154_s24  ;;  %v1012_v35 = vsel %vm1008_vm5, %v979_v29, %v712_v59  ;;  %v537_v59 = vor.u32 %v536_v51, %v532_v50  ;;  %v544_v19 = vshrl.u32 %v2435_v10, 16 }
  0x94   : > { %v757_v18 = vpop.permute.xlu0 %756 }
  0x95   : > { %v759_v22 = vpop.permute.xlu1 %758  ;;  %v1043_v1 = vsel %vm1041_vm6, %v1010_v32, %v757_v18  ;;  %v660_v32 = vrot.slane %v2435_v10, 1 }
  0x96   : > { %688 = vrot.lane.b32.xlu0 %v650_v55, %s2153_s23  ;;  %v1076_v42 = vsel %vm1074_vm7, %v1043_v1, %v792_v2  ;;  %v1045_v43 = vsel %vm1041_vm6, %v1012_v35, %v759_v22  ;;  %v661_v1 = vrot.slane %v2132_v15, 1 }
  0x97   : > { %690 = vrot.lane.b32.xlu1 %v653_v11, %s2153_s23  ;;  %v1078_v55 = vsel %vm1074_vm7, %v1045_v43, %v794_v16  ;;  %v546_v16 = vshll.u32 %v2435_v10, 16 }
  0x98   : > { %v829_v26 = vpop.permute.xlu0 %828 }
  0x99   : > { %v831_v31 = vpop.permute.xlu1 %830  ;;  %v1109_v44 = vsel %vm1107_vm8, %v1076_v42, %v829_v26  ;;  %v548_v20 = vrot.slane %v546_v16, 1  ;;  %v553_v26 = vrot.slane %v551_v21, 1  ;;  %v2136_v16 = vld [vmem:[%s2198_s20 + $0xb0] ss:$0 sps:$4 sm:$0x11]  }
  0x9a   : > { %725 = vrot.lane.b32.xlu0 %v2352_v48, %s2151_s21  ;;  %v1111_v56 = vsel %vm1107_vm8, %v1078_v55, %v831_v31 }
  0x9b   : > { %727 = vrot.lane.b32.xlu1 %v2377_v9, %s2151_s21  ;;  %v549_v25 = vor.u32 %v548_v20, %v544_v19 }
  0x9c   : > { %v876_v36 = vpop.permute.xlu0 %875 }
  0x9d   : > { %v878_v41 = vpop.permute.xlu1 %877  ;;  %v1142_v46 = vsel %vm1140_vm9, %v1109_v44, %v876_v36  ;;  %v554_v35 = vsel %vm398_vm1, %v549_v25, %v553_v26  ;;  %v2134_v36 = vld [vmem:[%s2198_s20 + $0xa4] ss:$0 sps:$4 sm:$0x11]   ;;  %v662_v44 = vsel %vm623_vm0, %v660_v32, %v661_v1 }
  0x9e   : > { %772 = vrot.lane.b32.xlu0 %v518_v4, %s2155_s25  ;;  %v1144_v57 = vsel %vm1140_vm9, %v1111_v56, %v878_v41  ;;  %v542_v4 = vsel %vm398_vm1, %v537_v59, %v541_v61  ;;  %v563_v51 = vshll.u32 %v2134_v36, 16  ;;  %v664_v7 = vrot.slane %v2134_v36, 1 }
  0x9f   : > { %774 = vrot.lane.b32.xlu1 %v530_v37, %s2155_s25 }
  0xa0   : > { %v911_v47 = vpop.permute.xlu0 %910  ;;  %v565_v61 = vrot.slane %v563_v51, 1 }
  0xa1   : > { %v596_v53 = vpop.permute.xlu1 %595  ;;  %v1175_v54 = vsel %vm1173_vm10, %v1142_v46, %v911_v47 }
  0xa2   : > { %807 = vrot.lane.b32.xlu0 %v653_v11, %s2152_s22  ;;  %2047 = vmatprep.mubr.msk.bf16.mxu0 %vm1226_vm11, %v1175_v54  ;;  %v948_v29 = vsel %vm942_vm3, %v2201_v0, %v596_v53 }
  0xa3   : > { %809 = vrot.lane.b32.xlu1 %v656_v45, %s2152_s22 }
  0xa4   : > { %v913_v58 = vpop.permute.xlu0 %912 }
  0xa5   : > { %v598_v62 = vpop.permute.xlu1 %597  ;;  %v1177_v63 = vsel %vm1173_vm10, %v1144_v57, %v913_v58 }
  0xa6   : > { %844 = vrot.lane.b32.xlu0 %v2377_v9, %s2156_s28  ;;  %2048 = vmatmul.mubr.msk.bf16.vlgmr.msra.gmra.mrb[0].mxu0 %vm1226_vm11, %v1177_v63  ;;  %v950_v40 = vsel %vm942_vm3, %v2230_v30, %v598_v62 }
  0xa7   : > { %846 = vrot.lane.b32.xlu1 %v2395_v28, %s2156_s28 }
  0xa8   : > { %v677_v2 = vpop.permute.xlu0 %676 }
  0xa9   : > { %v679_v5 = vpop.permute.xlu1 %678  ;;  %v981_v31 = vsel %vm975_vm4, %v948_v29, %v677_v2  ;;  %v2506_v29 = vld [vmem:[%s2198_s20 + $0xb4] sm:$0xff]  }
  0xaa   : > { %891 = vrot.lane.b32.xlu0 %v530_v37, %s2157_s5  ;;  %v983_v42 = vsel %vm975_vm4, %v950_v40, %v679_v5 }
  0xab   : > { %893 = vrot.lane.b32.xlu1 %v542_v4, %s2157_s5 }
  0xac   : > { %v714_v8 = vpop.permute.xlu0 %713 }
  0xad   : > { %v716_v11 = vpop.permute.xlu1 %715  ;;  %v1014_v33 = vsel %vm1008_vm5, %v981_v31, %v714_v8 }
  0xae   : > { %926 = vrot.lane.b32.xlu0 %v656_v45, %s2158_s8  ;;  %v1016_v46 = vsel %vm1008_vm5, %v983_v42, %v716_v11  ;;  %v2493_v11 = vld [vmem:[%s2198_s20 + $0xa8] sm:$0xff]  }
  0xaf   : > { %611 = vrot.lane.b32.xlu1 %v530_v37, %s2154_s24  ;;  %v558_v37 = vshll.u32 %v2448_v27, 16  ;;  %v568_v20 = vshrl.u32 %v2493_v11, 16 }
  0xb0   : > { %v761_v13 = vpop.permute.xlu0 %760 }
  0xb1   : > { %v763_v17 = vpop.permute.xlu1 %762  ;;  %v1047_v0 = vsel %vm1041_vm6, %v1014_v33, %v761_v13  ;;  %v560_v30 = vrot.slane %v558_v37, 1  ;;  %v665_v13 = vsel %vm623_vm0, %v663_v6, %v664_v7  ;;  %v666_v33 = vrot.slane %v2493_v11, 1 }
  0xb2   : > { %928 = vrot.lane.b32.xlu0 %v659_v12, %s2158_s8  ;;  %v1049_v52 = vsel %vm1041_vm6, %v1016_v46, %v763_v17  ;;  %v570_v17 = vshll.u32 %v2493_v11, 16  ;;  %v580_v46 = vshrl.u32 %v2506_v29, 16  ;;  %v669_v6 = vrot.slane %v2506_v29, 1 }
  0xb3   : > { %613 = vrot.lane.b32.xlu1 %v542_v4, %s2154_s24 }
  0xb4   : > { %v796_v18 = vpop.permute.xlu0 %795  ;;  %v572_v21 = vrot.slane %v570_v17, 1  ;;  %v2140_v17 = vld [vmem:[%s2198_s20 + $0xc8] ss:$0 sps:$4 sm:$0x11]  }
  0xb5   : > { %v798_v22 = vpop.permute.xlu1 %797  ;;  %v1080_v41 = vsel %vm1074_vm7, %v1047_v0, %v796_v18  ;;  %v2138_v0 = vld [vmem:[%s2198_s20 + $0xbc] ss:$0 sps:$4 sm:$0x11]  }
  0xb6   : > { %692 = vrot.lane.b32.xlu0 %v656_v45, %s2153_s23  ;;  %v556_v45 = vshrl.u32 %v2448_v27, 16  ;;  %v1082_v55 = vsel %vm1074_vm7, %v1049_v52, %v798_v22  ;;  %v575_v22 = vshll.u32 %v2136_v16, 16  ;;  %v573_v26 = vor.u32 %v572_v21, %v568_v20 }
  0xb7   : > { %694 = vrot.lane.b32.xlu1 %v659_v12, %s2153_s23  ;;  %v587_v51 = vshll.u32 %v2138_v0, 16  ;;  %v670_v7 = vrot.slane %v2138_v0, 1 }
  0xb8   : > { %v833_v24 = vpop.permute.xlu0 %832  ;;  %v561_v59 = vor.u32 %v560_v30, %v556_v45 }
  0xb9   : > { %v835_v3 = vpop.permute.xlu1 %834  ;;  %v1113_v43 = vsel %vm1107_vm8, %v1080_v41, %v833_v24 }
  0xba   : > { %729 = vrot.lane.b32.xlu0 %v2395_v28, %s2151_s21  ;;  %v1115_v56 = vsel %vm1107_vm8, %v1082_v55, %v835_v3  ;;  %v577_v3 = vrot.slane %v575_v22, 1 }
  0xbb   : > { %731 = vrot.lane.b32.xlu1 %v2435_v10, %s2151_s21 }
  0xbc   : > { %v880_v34 = vpop.permute.xlu0 %879  ;;  %v578_v37 = vsel %vm398_vm1, %v573_v26, %v577_v3 }
  0xbd   : > { %v882_v38 = vpop.permute.xlu1 %881  ;;  %v1146_v47 = vsel %vm1140_vm9, %v1113_v43, %v880_v34  ;;  %v667_v34 = vrot.slane %v2136_v16, 1 }
  0xbe   : > { %776 = vrot.lane.b32.xlu0 %v542_v4, %s2155_s25  ;;  %v1148_v57 = vsel %vm1140_vm9, %v1115_v56, %v882_v38  ;;  %v566_v4 = vsel %vm398_vm1, %v561_v59, %v565_v61  ;;  %v582_v38 = vshll.u32 %v2506_v29, 16  ;;  %v589_v61 = vrot.slane %v587_v51, 1 }
  0xbf   : > { %778 = vrot.lane.b32.xlu1 %v554_v35, %s2155_s25  ;;  %v668_v45 = vsel %vm623_vm0, %v666_v33, %v667_v34 }
  0xc0   : > { %v915_v50 = vpop.permute.xlu0 %914 }
  0xc1   : > { %v600_v53 = vpop.permute.xlu1 %599  ;;  %v1179_v54 = vsel %vm1173_vm10, %v1146_v47, %v915_v50 }
  0xc2   : > { %811 = vrot.lane.b32.xlu0 %v659_v12, %s2152_s22  ;;  %2051 = vmatprep.mubr.msk.bf16.mxu0 %vm1226_vm11, %v1179_v54  ;;  %v952_v32 = vsel %vm942_vm3, %v2260_v49, %v600_v53 }
  0xc3   : > { %813 = vrot.lane.b32.xlu1 %v662_v44, %s2152_s22 }
  0xc4   : > { %v917_v58 = vpop.permute.xlu0 %916 }
  0xc5   : > { %v602_v62 = vpop.permute.xlu1 %601  ;;  %v1181_v63 = vsel %vm1173_vm10, %v1148_v57, %v917_v58 }
  0xc6   : > { %848 = vrot.lane.b32.xlu0 %v2435_v10, %s2156_s28  ;;  %2052 = vmatmul.mubr.msk.bf16.gmra.mrb[4].mxu0 %vm1226_vm11, %v1181_v63  ;;  %v954_v41 = vsel %vm942_vm3, %v2276_v60, %v602_v62  ;;  %v584_v60 = vrot.slane %v582_v38, 1 }
  0xc7   : > { %850 = vrot.lane.b32.xlu1 %v2448_v27, %s2156_s28 }
  0xc8   : > { %v681_v2 = vpop.permute.xlu0 %680  ;;  %v585_v59 = vor.u32 %v584_v60, %v580_v46 }
  0xc9   : > { %v683_v5 = vpop.permute.xlu1 %682  ;;  %v985_v1 = vsel %vm975_vm4, %v952_v32, %v681_v2  ;;  %v2141_v32 = vld [vmem:[%s2198_s20 + $0xcc] sm:$0xff]  }
  0xca   : > { %895 = vrot.lane.b32.xlu0 %v554_v35, %s2157_s5  ;;  %v987_v43 = vsel %vm975_vm4, %v954_v41, %v683_v5 }
  0xcb   : > { %897 = vrot.lane.b32.xlu1 %v566_v4, %s2157_s5 }
  0xcc   : > { %v718_v8 = vpop.permute.xlu0 %717 }
  0xcd   : > { %v720_v12 = vpop.permute.xlu1 %719 }
  0xce   : > { %930 = vrot.lane.b32.xlu0 %v662_v44, %s2158_s8  ;;  %v1020_v47 = vsel %vm1008_vm5, %v987_v43, %v720_v12  ;;  %v2551_v12 = vld [vmem:[%s2198_s20 + $0xc0] sm:$0xff]  }
  0xcf   : > { %615 = vrot.lane.b32.xlu1 %v554_v35, %s2154_s24  ;;  %v1018_v35 = vsel %vm1008_vm5, %v985_v1, %v718_v8  ;;  %v745_v21 = vshrl.u32 %v2551_v12, 16 }
  0xd0   : > { %v765_v15 = vpop.permute.xlu0 %764 }
  0xd1   : > { %v767_v18 = vpop.permute.xlu1 %766  ;;  %v1051_v49 = vsel %vm1041_vm6, %v1018_v35, %v765_v15  ;;  %v671_v15 = vsel %vm623_vm0, %v669_v6, %v670_v7  ;;  %v788_v35 = vrot.slane %v2551_v12, 1 }
  0xd2   : > { %932 = vrot.lane.b32.xlu0 %v665_v13, %s2158_s8  ;;  %v1053_v52 = vsel %vm1041_vm6, %v1020_v47, %v767_v18  ;;  %v747_v18 = vshll.u32 %v2551_v12, 16  ;;  %v864_v47 = vshrl.u32 %v2141_v32, 16 }
  0xd3   : > { %617 = vrot.lane.b32.xlu1 %v566_v4, %s2154_s24 }
  0xd4   : > { %v800_v19 = vpop.permute.xlu0 %799  ;;  %v749_v22 = vrot.slane %v747_v18, 1 }
  0xd5   : > { %v802_v24 = vpop.permute.xlu1 %801  ;;  %v1084_v42 = vsel %vm1074_vm7, %v1051_v49, %v800_v19  ;;  %v2142_v49 = vld [vmem:[%s2198_s20 + $0xd4] ss:$0 sps:$4 sm:$0x11]   ;;  %s214_s20 = scalar_lea.vmem %s2722_s4, %s2724_s16 }
  0xd6   : > { %696 = vrot.lane.b32.xlu0 %v662_v44, %s2153_s23  ;;  %v1086_v55 = vsel %vm1074_vm7, %v1053_v52, %v802_v24  ;;  %v752_v24 = vshll.u32 %v2140_v17, 16  ;;  %v750_v3 = vor.u32 %v749_v22, %v745_v21  ;;  %v908_v6 = vrot.slane %v2142_v49, 1 }
  0xd7   : > { %698 = vrot.lane.b32.xlu1 %v665_v13, %s2153_s23 }
  0xd8   : > { %v837_v25 = vpop.permute.xlu0 %836 }
  0xd9   : > { %v839_v31 = vpop.permute.xlu1 %838  ;;  %v1117_v44 = vsel %vm1107_vm8, %v1084_v42, %v837_v25 }
  0xda   : > { %733 = vrot.lane.b32.xlu0 %v2448_v27, %s2151_s21  ;;  %v1119_v56 = vsel %vm1107_vm8, %v1086_v55, %v839_v31  ;;  %v754_v31 = vrot.slane %v752_v24, 1 }
  0xdb   : > { %735 = vrot.lane.b32.xlu1 %v2493_v11, %s2151_s21 }
  0xdc   : > { %v884_v36 = vpop.permute.xlu0 %883  ;;  %v755_v38 = vsel %vm398_vm1, %v750_v3, %v754_v31 }
  0xdd   : > { %v886_v40 = vpop.permute.xlu1 %885  ;;  %v1150_v50 = vsel %vm1140_vm9, %v1117_v44, %v884_v36  ;;  %v789_v36 = vrot.slane %v2140_v17, 1 }
  0xde   : > { %780 = vrot.lane.b32.xlu0 %v566_v4, %s2155_s25  ;;  %v1152_v57 = vsel %vm1140_vm9, %v1119_v56, %v886_v40  ;;  %v590_v4 = vsel %vm398_vm1, %v585_v59, %v589_v61  ;;  %v866_v40 = vshll.u32 %v2141_v32, 16 }
  0xdf   : > { %782 = vrot.lane.b32.xlu1 %v578_v37, %s2155_s25  ;;  %v790_v46 = vsel %vm623_vm0, %v788_v35, %v789_v36 }
  0xe0   : > { %v919_v30 = vpop.permute.xlu0 %918  ;;  %v868_v51 = vrot.slane %v866_v40, 1 }
  0xe1   : > { %v604_v53 = vpop.permute.xlu1 %603  ;;  %v1183_v54 = vsel %vm1173_vm10, %v1150_v50, %v919_v30 }
  0xe2   : > { %815 = vrot.lane.b32.xlu0 %v665_v13, %s2152_s22  ;;  %2055 = vmatprep.mubr.msk.bf16.mxu0 %vm1226_vm11, %v1183_v54  ;;  %v956_v33 = vsel %vm942_vm3, %v2301_v14, %v604_v53  ;;  %v869_v59 = vor.u32 %v868_v51, %v864_v47 }
  0xe3   : > { %817 = vrot.lane.b32.xlu1 %v668_v45, %s2152_s22 }
  0xe4   : > { %v921_v58 = vpop.permute.xlu0 %920 }
  0xe5   : > { %v606_v62 = vpop.permute.xlu1 %605  ;;  %v1185_v63 = vsel %vm1173_vm10, %v1152_v57, %v921_v58 }
  0xe6   : > { %852 = vrot.lane.b32.xlu0 %v2493_v11, %s2156_s28  ;;  %2056 = vmatmul.mubr.msk.bf16.gmra.mrb[8].mxu0 %vm1226_vm11, %v1185_v63  ;;  %v958_v42 = vsel %vm942_vm3, %v2314_v23, %v606_v62  ;;  %v871_v23 = vshll.u32 %v2142_v49, 16 }
  0xe7   : > { %854 = vrot.lane.b32.xlu1 %v2506_v29, %s2156_s28 }
  0xe8   : > { %v685_v2 = vpop.permute.xlu0 %684  ;;  %v873_v61 = vrot.slane %v871_v23, 1 }
  0xe9   : > { %v687_v5 = vpop.permute.xlu1 %686  ;;  %v989_v34 = vsel %vm975_vm4, %v956_v33, %v685_v2 }
  0xea   : > { %899 = vrot.lane.b32.xlu0 %v578_v37, %s2157_s5  ;;  %v991_v44 = vsel %vm975_vm4, %v958_v42, %v687_v5  ;;  %v907_v5 = vrot.slane %v2141_v32, 1 }
  0xeb   : > { %901 = vrot.lane.b32.xlu1 %v590_v4, %s2157_s5 }
  0xec   : > { %v722_v8 = vpop.permute.xlu0 %721 }
  0xed   : > { %v724_v13 = vpop.permute.xlu1 %723 }
  0xee   : > { %934 = vrot.lane.b32.xlu0 %v668_v45, %s2158_s8  ;;  %v1024_v50 = vsel %vm1008_vm5, %v991_v44, %v724_v13  ;;  %v909_v13 = vsel %vm623_vm0, %v907_v5, %v908_v6 }
  0xef   : > { %619 = vrot.lane.b32.xlu1 %v578_v37, %s2154_s24  ;;  %v1022_v37 = vsel %vm1008_vm5, %v989_v34, %v722_v8 }
  0xf0   : > { %v769_v16 = vpop.permute.xlu0 %768 }
  0xf1   : > { %v771_v19 = vpop.permute.xlu1 %770  ;;  %v1055_v14 = vsel %vm1041_vm6, %v1022_v37, %v769_v16 }
  0xf2   : > { %936 = vrot.lane.b32.xlu0 %v671_v15, %s2158_s8  ;;  %v1057_v52 = vsel %vm1041_vm6, %v1024_v50, %v771_v19 }
  0xf3   : > { %621 = vrot.lane.b32.xlu1 %v590_v4, %s2154_s24 }
  0xf4   : > { %v804_v20 = vpop.permute.xlu0 %803 }
  0xf5   : > { %v806_v25 = vpop.permute.xlu1 %805  ;;  %v1088_v43 = vsel %vm1074_vm7, %v1055_v14, %v804_v20 }
  0xf6   : > { %700 = vrot.lane.b32.xlu0 %v668_v45, %s2153_s23  ;;  %v1090_v55 = vsel %vm1074_vm7, %v1057_v52, %v806_v25 }
  0xf7   : > { %702 = vrot.lane.b32.xlu1 %v671_v15, %s2153_s23 }
  0xf8   : > { %v841_v26 = vpop.permute.xlu0 %840 }
  0xf9   : > { %v843_v1 = vpop.permute.xlu1 %842  ;;  %v1121_v45 = vsel %vm1107_vm8, %v1088_v43, %v841_v26 }
  0xfa   : > { %737 = vrot.lane.b32.xlu0 %v2506_v29, %s2151_s21  ;;  %v1123_v56 = vsel %vm1107_vm8, %v1090_v55, %v843_v1 }
  0xfb   : > { %739 = vrot.lane.b32.xlu1 %v2551_v12, %s2151_s21 }
  0xfc   : > { %v888_v0 = vpop.permute.xlu0 %887 }
  0xfd   : > { %v890_v41 = vpop.permute.xlu1 %889  ;;  %v1154_v30 = vsel %vm1140_vm9, %v1121_v45, %v888_v0 }
  0xfe   : > { %784 = vrot.lane.b32.xlu0 %v590_v4, %s2155_s25  ;;  %v1156_v57 = vsel %vm1140_vm9, %v1123_v56, %v890_v41  ;;  %v874_v4 = vsel %vm398_vm1, %v869_v59, %v873_v61 }
  0xff   : > { %786 = vrot.lane.b32.xlu1 %v755_v38, %s2155_s25 }
 0x100   : > { %v923_v60 = vpop.permute.xlu0 %922 }
 0x101   : > { %v608_v53 = vpop.permute.xlu1 %607  ;;  %v1187_v54 = vsel %vm1173_vm10, %v1154_v30, %v923_v60 }
 0x102   : > { %819 = vrot.lane.b32.xlu0 %v671_v15, %s2152_s22  ;;  %2059 = vmatprep.mubr.msk.bf16.mxu0 %vm1226_vm11, %v1187_v54  ;;  %v960_v21 = vsel %vm942_vm3, %v2339_v39, %v608_v53 }
 0x103   : > { %821 = vrot.lane.b32.xlu1 %v790_v46, %s2152_s22 }
 0x104   : > { %v925_v58 = vpop.permute.xlu0 %924 }
 0x105   : > { %v610_v62 = vpop.permute.xlu1 %609  ;;  %v1189_v63 = vsel %vm1173_vm10, %v1156_v57, %v925_v58 }
 0x106   : > { %856 = vrot.lane.b32.xlu0 %v2551_v12, %s2156_s28  ;;  %2060 = vmatmul.mubr.msk.bf16.gmra.mrb[12].mxu0 %vm1226_vm11, %v1189_v63  ;;  %v962_v31 = vsel %vm942_vm3, %v2352_v48, %v610_v62 }
 0x107   : > { %858 = vrot.lane.b32.xlu1 %v2141_v32, %s2156_s28 }
 0x108   : > { %v689_v2 = vpop.permute.xlu0 %688 }
 0x109   : > { %v691_v7 = vpop.permute.xlu1 %690  ;;  %v993_v22 = vsel %vm975_vm4, %v960_v21, %v689_v2 }
 0x10a   : > { %903 = vrot.lane.b32.xlu0 %v755_v38, %s2157_s5  ;;  %v995_v1 = vsel %vm975_vm4, %v962_v31, %v691_v7 }
 0x10b   : > { %905 = vrot.lane.b32.xlu1 %v874_v4, %s2157_s5 }
 0x10c   : > { %v726_v8 = vpop.permute.xlu0 %725 }
 0x10d   : > { %v728_v15 = vpop.permute.xlu1 %727  ;;  %v1026_v24 = vsel %vm1008_vm5, %v993_v22, %v726_v8 }
 0x10e   : > { %938 = vrot.lane.b32.xlu0 %v790_v46, %s2158_s8  ;;  %v1028_v34 = vsel %vm1008_vm5, %v995_v1, %v728_v15 }
 0x10f   : > { %940 = vrot.lane.b32.xlu1 %v909_v13, %s2158_s8 }
 0x110   : > { %v773_v12 = vpop.permute.xlu0 %772 }
 0x111   : > { %v775_v16 = vpop.permute.xlu1 %774  ;;  %v1059_v26 = vsel %vm1041_vm6, %v1026_v24, %v773_v12 }
 0x112   : > { %v1061_v36 = vsel %vm1041_vm6, %v1028_v34, %v775_v16 }
 0x114   : > { %v808_v17 = vpop.permute.xlu0 %807 }
 0x115   : > { %v810_v18 = vpop.permute.xlu1 %809  ;;  %v1092_v32 = vsel %vm1074_vm7, %v1059_v26, %v808_v17 }
 0x116   : > { %v1094_v38 = vsel %vm1074_vm7, %v1061_v36, %v810_v18 }
 0x118   : > { %v845_v19 = vpop.permute.xlu0 %844 }
 0x119   : > { %v847_v20 = vpop.permute.xlu1 %846  ;;  %v1125_v33 = vsel %vm1107_vm8, %v1092_v32, %v845_v19 }
 0x11a   : > { %v1127_v48 = vsel %vm1107_vm8, %v1094_v38, %v847_v20 }
 0x11c   : > { %v892_v25 = vpop.permute.xlu0 %891 }
 0x11d   : > { %v894_v3 = vpop.permute.xlu1 %893  ;;  %v1158_v39 = vsel %vm1140_vm9, %v1125_v33, %v892_v25 }
 0x11e   : > { %v1160_v49 = vsel %vm1140_vm9, %v1127_v48, %v894_v3 }
 0x120   : > { %v927_v35 = vpop.permute.xlu0 %926 }
 0x121   : > { %v612_v37 = vpop.permute.xlu1 %611  ;;  %v1191_v0 = vsel %vm1173_vm10, %v1158_v39, %v927_v35 }
 0x122   : > { %2063 = vmatprep.mubr.msk.bf16.mxu1 %vm1226_vm11, %v1191_v0  ;;  %v964_v23 = vsel %vm942_vm3, %v2377_v9, %v612_v37 }
 0x124   : > { %v929_v40 = vpop.permute.xlu0 %928 }
 0x125   : > { %v614_v14 = vpop.permute.xlu1 %613  ;;  %v1193_v41 = vsel %vm1173_vm10, %v1160_v49, %v929_v40 }
 0x126   : > { %2064 = vmatmul.mubr.msk.bf16.vlgmr.msra.gmra.mrb[0].mxu1 %vm1226_vm11, %v1193_v41  ;;  %v966_v57 = vsel %vm942_vm3, %v2395_v28, %v614_v14 }
 0x128   : > { %v693_v42 = vpop.permute.xlu0 %692 }
 0x129   : > { %v695_v43 = vpop.permute.xlu1 %694  ;;  %v997_v52 = vsel %vm975_vm4, %v964_v23, %v693_v42 }
 0x12a   : > { %v999_v59 = vsel %vm975_vm4, %v966_v57, %v695_v43 }
 0x12c   : > { %v730_v44 = vpop.permute.xlu0 %729 }
 0x12d   : > { %v732_v45 = vpop.permute.xlu1 %731  ;;  %v1030_v53 = vsel %vm1008_vm5, %v997_v52, %v730_v44 }
 0x12e   : > { %v1032_v62 = vsel %vm1008_vm5, %v999_v59, %v732_v45 }
 0x130   : > { %v777_v46 = vpop.permute.xlu0 %776 }
 0x131   : > { %v779_v47 = vpop.permute.xlu1 %778  ;;  %v1063_v55 = vsel %vm1041_vm6, %v1030_v53, %v777_v46 }
 0x132   : > { %v1065_v2 = vsel %vm1041_vm6, %v1032_v62, %v779_v47 }
 0x134   : > { %v812_v50 = vpop.permute.xlu0 %811 }
 0x135   : > { %v814_v30 = vpop.permute.xlu1 %813  ;;  %v1096_v58 = vsel %vm1074_vm7, %v1063_v55, %v812_v50 }
 0x136   : > { %v1098_v6 = vsel %vm1074_vm7, %v1065_v2, %v814_v30 }
 0x138   : > { %v849_v60 = vpop.permute.xlu0 %848 }
 0x139   : > { %v851_v51 = vpop.permute.xlu1 %850  ;;  %v1129_v61 = vsel %vm1107_vm8, %v1096_v58, %v849_v60 }
 0x13a   : > { %v1131_v28 = vsel %vm1107_vm8, %v1098_v6, %v851_v51 }
 0x13c   : > { %v896_v54 = vpop.permute.xlu0 %895 }
 0x13d   : > { %v898_v56 = vpop.permute.xlu1 %897  ;;  %v1162_v9 = vsel %vm1140_vm9, %v1129_v61, %v896_v54 }
 0x13e   : > { %v1164_v7 = vsel %vm1140_vm9, %v1131_v28, %v898_v56 }
 0x140   : > { %v931_v63 = vpop.permute.xlu0 %930 }
 0x141   : > { %v616_v4 = vpop.permute.xlu1 %615  ;;  %v1195_v5 = vsel %vm1173_vm10, %v1162_v9, %v931_v63 }
 0x142   : > { %2067 = vmatprep.mubr.msk.bf16.mxu1 %vm1226_vm11, %v1195_v5  ;;  %v968_v26 = vsel %vm942_vm3, %v2435_v10, %v616_v4 }
 0x144   : > { %v933_v8 = vpop.permute.xlu0 %932 }
 0x145   : > { %v618_v13 = vpop.permute.xlu1 %617  ;;  %v1197_v15 = vsel %vm1173_vm10, %v1164_v7, %v933_v8 }
 0x146   : > { %2068 = vmatmul.mubr.msk.bf16.gmra.mrb[4].mxu1 %vm1226_vm11, %v1197_v15  ;;  %v970_v34 = vsel %vm942_vm3, %v2448_v27, %v618_v13 }
 0x148   : > { %v697_v12 = vpop.permute.xlu0 %696 }
 0x149   : > { %v699_v16 = vpop.permute.xlu1 %698  ;;  %v1001_v3 = vsel %vm975_vm4, %v968_v26, %v697_v12 }
 0x14a   : > { %v1003_v35 = vsel %vm975_vm4, %v970_v34, %v699_v16 }
 0x14c   : > { %v734_v17 = vpop.permute.xlu0 %733 }
 0x14d   : > { %v736_v18 = vpop.permute.xlu1 %735  ;;  %v1034_v31 = vsel %vm1008_vm5, %v1001_v3, %v734_v17 }
 0x14e   : > { %v1036_v37 = vsel %vm1008_vm5, %v1003_v35, %v736_v18 }
 0x150   : > { %v781_v19 = vpop.permute.xlu0 %780 }
 0x151   : > { %v783_v20 = vpop.permute.xlu1 %782  ;;  %v1067_v1 = vsel %vm1041_vm6, %v1034_v31, %v781_v19 }
 0x152   : > { %v1069_v38 = vsel %vm1041_vm6, %v1036_v37, %v783_v20 }
 0x154   : > { %v816_v21 = vpop.permute.xlu0 %815 }
 0x155   : > { %v818_v22 = vpop.permute.xlu1 %817  ;;  %v1100_v39 = vsel %vm1074_vm7, %v1067_v1, %v816_v21 }
 0x156   : > { %v1102_v40 = vsel %vm1074_vm7, %v1069_v38, %v818_v22 }
 0x158   : > { %v853_v24 = vpop.permute.xlu0 %852 }
 0x159   : > { %v855_v25 = vpop.permute.xlu1 %854  ;;  %v1133_v36 = vsel %vm1107_vm8, %v1100_v39, %v853_v24 }
 0x15a   : > { %v1135_v27 = vsel %vm1107_vm8, %v1102_v40, %v855_v25 }
 0x15c   : > { %v900_v32 = vpop.permute.xlu0 %899 }
 0x15d   : > { %v902_v33 = vpop.permute.xlu1 %901  ;;  %v1166_v10 = vsel %vm1140_vm9, %v1133_v36, %v900_v32 }
 0x15e   : > { %v1168_v14 = vsel %vm1140_vm9, %v1135_v27, %v902_v33 }
 0x160   : > { %v935_v0 = vpop.permute.xlu0 %934 }
 0x161   : > { %v620_v48 = vpop.permute.xlu1 %619  ;;  %v1199_v49 = vsel %vm1173_vm10, %v1166_v10, %v935_v0 }
 0x162   : > { %2071 = vmatprep.mubr.msk.bf16.mxu1 %vm1226_vm11, %v1199_v49  ;;  %v972_v52 = vsel %vm942_vm3, %v2493_v11, %v620_v48 }
 0x164   : > { %v937_v41 = vpop.permute.xlu0 %936 }
 0x165   : > { %v622_v42 = vpop.permute.xlu1 %621  ;;  %v1201_v43 = vsel %vm1173_vm10, %v1168_v14, %v937_v41 }
 0x166   : > { %2072 = vmatmul.mubr.msk.bf16.gmra.mrb[8].mxu1 %vm1226_vm11, %v1201_v43  ;;  %v974_v53 = vsel %vm942_vm3, %v2506_v29, %v622_v42 }
 0x168   : > { %v701_v44 = vpop.permute.xlu0 %700 }
 0x169   : > { %v703_v45 = vpop.permute.xlu1 %702  ;;  %v1005_v57 = vsel %vm975_vm4, %v972_v52, %v701_v44 }
 0x16a   : > { %v1007_v56 = vsel %vm975_vm4, %v974_v53, %v703_v45 }
 0x16c   : > { %v738_v46 = vpop.permute.xlu0 %737 }
 0x16d   : > { %v740_v47 = vpop.permute.xlu1 %739  ;;  %v1038_v61 = vsel %vm1008_vm5, %v1005_v57, %v738_v46 }
 0x16e   : > { %v1040_v59 = vsel %vm1008_vm5, %v1007_v56, %v740_v47 }
 0x170   : > { %v785_v50 = vpop.permute.xlu0 %784 }
 0x171   : > { %v787_v30 = vpop.permute.xlu1 %786  ;;  %v1071_v62 = vsel %vm1041_vm6, %v1038_v61, %v785_v50 }
 0x172   : > { %v1073_v29 = vsel %vm1041_vm6, %v1040_v59, %v787_v30 }
 0x174   : > { %v820_v60 = vpop.permute.xlu0 %819 }
 0x175   : > { %v822_v51 = vpop.permute.xlu1 %821  ;;  %v1104_v13 = vsel %vm1074_vm7, %v1071_v62, %v820_v60 }
 0x176   : > { %v1106_v8 = vsel %vm1074_vm7, %v1073_v29, %v822_v51 }
 0x178   : > { %v857_v23 = vpop.permute.xlu0 %856 }
 0x179   : > { %v859_v54 = vpop.permute.xlu1 %858  ;;  %v2049_v55 = vpop.f32.mrb[0].mxu0  ;;  %v1137_v15 = vsel %vm1107_vm8, %v1104_v13, %v857_v23 }
 0x17a   : > { %v1297_v58 = vpop.f32.mrb[1].mxu0  ;;  %v1624_v12 = vmul.f32 %v2049_v55, %v2049_v55  ;;  %v1139_v18 = vsel %vm1107_vm8, %v1106_v8, %v859_v54 }
 0x17b   : > { %v2050_v11 = vpop.f32.mrb[2].mxu0  ;;  %v1622_v4 = vmul.f32 %v1297_v58, %v1297_v58 }
 0x17c   : > { %v1935_v9 = vpack.c.bf16 %v2050_v11, %v2049_v55  ;;  %v1300_v63 = vpop.f32.mrb[3].mxu0  ;;  %v904_v2 = vpop.permute.xlu0 %903  ;;  %v1625_v19 = vmul.f32 %v2050_v11, %v2050_v11 }
 0x17d   : > { %v906_v5 = vpop.permute.xlu1 %905  ;;  %v1930_v6 = vpack.c.bf16 %v1300_v63, %v1297_v58  ;;  %v1584_v28 = vadd.f32 %v1300_v63, %v1297_v58  ;;  %v1623_v7 = vmul.f32 %v1300_v63, %v1300_v63  ;;  %v1170_v20 = vsel %vm1140_vm9, %v1137_v15, %v904_v2 }
 0x17e   : > { %2007 = vst [vmem:[%s2677_s12 + $0x8] sm:$0xff] %v1935_v9   ;;  %v1172_v22 = vsel %vm1140_vm9, %v1139_v18, %v906_v5 }
 0x17f   : > { %1931 = vst [vmem:[%s2677_s12] sm:$0xff] %v1930_v6   ;;  %v1585_v16 = vadd.f32 %v2049_v55, %v1584_v28  ;;  %v1654_v17 = vadd.f32 %v1623_v7, %v1622_v4 }
 0x180   : > { %v939_v21 = vpop.permute.xlu0 %938 }
 0x181   : > { %v1655_v24 = vadd.f32 %v1654_v17, %v1624_v12  ;;  %v941_v25 = vpop.permute.xlu1 %940  ;;  %v1203_v26 = vsel %vm1173_vm10, %v1170_v20, %v939_v21  ;;  %v1586_v3 = vadd.f32 %v2050_v11, %v1585_v16 }
 0x182   : > { %v1205_v31 = vsel %vm1173_vm10, %v1172_v22, %v941_v25  ;;  %2075 = vmatprep.mubr.msk.bf16.mxu1 %vm1226_vm11, %v1203_v26 }
 0x183   : > { %2076 = vmatmul.mubr.msk.bf16.gmra.mrb[12].mxu1 %vm1226_vm11, %v1205_v31  ;;  %v1656_v32 = vadd.f32 %v1655_v24, %v1625_v19 }
 0x199   : > { %v2053_v1 = vpop.f32.mrb[4].mxu0 }
 0x19a   : > { %v1313_v33 = vpop.f32.mrb[5].mxu0  ;;  %v1628_v49 = vmul.f32 %v2053_v1, %v2053_v1 }
 0x19b   : > { %v1587_v34 = vadd.f32 %v1586_v3, %v1313_v33  ;;  %v1626_v39 = vmul.f32 %v1313_v33, %v1313_v33  ;;  %v2054_v35 = vpop.f32.mrb[6].mxu0 }
 0x19c   : > { %v1945_v36 = vpack.c.bf16 %v2054_v35, %v2053_v1  ;;  %v1316_v37 = vpop.f32.mrb[7].mxu0  ;;  %v1629_v14 = vmul.f32 %v2054_v35, %v2054_v35 }
 0x19d   : > { %v1657_v10 = vadd.f32 %v1656_v32, %v1626_v39  ;;  %v1940_v0 = vpack.c.bf16 %v1316_v37, %v1313_v33  ;;  %v1588_v38 = vadd.f32 %v1587_v34, %v1316_v37  ;;  %v1627_v48 = vmul.f32 %v1316_v37, %v1316_v37 }
 0x19e   : > { %2009 = vst [vmem:[%s2677_s12 + $0x18] sm:$0xff] %v1945_v36  }
 0x19f   : > { %2008 = vst [vmem:[%s2677_s12 + $0x10] sm:$0xff] %v1940_v0   ;;  %v1589_v40 = vadd.f32 %v2053_v1, %v1588_v38  ;;  %v1658_v27 = vadd.f32 %v1657_v10, %v1627_v48 }
 0x1a1   : > { %v1659_v41 = vadd.f32 %v1658_v27, %v1628_v49  ;;  %v1590_v42 = vadd.f32 %v2054_v35, %v1589_v40 }
 0x1a3   : > { %v1660_v43 = vadd.f32 %v1659_v41, %v1629_v14 }
 0x1b9   : > { %v2057_v44 = vpop.f32.mrb[8].mxu0 }
 0x1ba   : > { %v1329_v45 = vpop.f32.mrb[9].mxu0  ;;  %v1632_v54 = vmul.f32 %v2057_v44, %v2057_v44 }
 0x1bb   : > { %v1591_v46 = vadd.f32 %v1590_v42, %v1329_v45  ;;  %v1630_v47 = vmul.f32 %v1329_v45, %v1329_v45  ;;  %v2058_v50 = vpop.f32.mrb[10].mxu0 }
 0x1bc   : > { %v1955_v30 = vpack.c.bf16 %v2058_v50, %v2057_v44  ;;  %v1332_v60 = vpop.f32.mrb[11].mxu0  ;;  %v1633_v57 = vmul.f32 %v2058_v50, %v2058_v50 }
 0x1bd   : > { %v1661_v51 = vadd.f32 %v1660_v43, %v1630_v47  ;;  %v1950_v23 = vpack.c.bf16 %v1332_v60, %v1329_v45  ;;  %v1592_v52 = vadd.f32 %v1591_v46, %v1332_v60  ;;  %v1631_v53 = vmul.f32 %v1332_v60, %v1332_v60 }
 0x1be   : > { %2011 = vst [vmem:[%s2677_s12 + $0x28] sm:$0xff] %v1955_v30  }
 0x1bf   : > { %2010 = vst [vmem:[%s2677_s12 + $0x20] sm:$0xff] %v1950_v23   ;;  %v1593_v55 = vadd.f32 %v2057_v44, %v1592_v52  ;;  %v1662_v56 = vadd.f32 %v1661_v51, %v1631_v53 }
 0x1c1   : > { %v1663_v58 = vadd.f32 %v1662_v56, %v1632_v54  ;;  %v1594_v59 = vadd.f32 %v2058_v50, %v1593_v55 }
 0x1c3   : > { %v1664_v61 = vadd.f32 %v1663_v58, %v1633_v57 }
 0x1d9   : > { %v2061_v11 = vpop.f32.mrb[12].mxu0 }
 0x1da   : > { %v1345_v29 = vpop.f32.mrb[13].mxu0  ;;  %v1636_v8 = vmul.f32 %v2061_v11, %v2061_v11 }
 0x1db   : > { %v1595_v62 = vadd.f32 %v1594_v59, %v1345_v29  ;;  %v1634_v9 = vmul.f32 %v1345_v29, %v1345_v29  ;;  %v2062_v63 = vpop.f32.mrb[14].mxu0 }
 0x1dc   : > { %v1965_v2 = vpack.c.bf16 %v2062_v63, %v2061_v11  ;;  %v1348_v4 = vpop.f32.mrb[15].mxu0  ;;  %v1637_v12 = vmul.f32 %v2062_v63, %v2062_v63 }
 0x1dd   : > { %v1665_v5 = vadd.f32 %v1664_v61, %v1634_v9  ;;  %v1960_v6 = vpack.c.bf16 %v1348_v4, %v1345_v29  ;;  %v1596_v28 = vadd.f32 %v1595_v62, %v1348_v4  ;;  %v1635_v7 = vmul.f32 %v1348_v4, %v1348_v4 }
 0x1de   : > { %2013 = vst [vmem:[%s2677_s12 + $0x38] sm:$0xff] %v1965_v2  }
 0x1df   : > { %2012 = vst [vmem:[%s2677_s12 + $0x30] sm:$0xff] %v1960_v6   ;;  %v1597_v13 = vadd.f32 %v2061_v11, %v1596_v28  ;;  %v1666_v15 = vadd.f32 %v1665_v5, %v1635_v7 }
 0x1e1   : > { %v1667_v16 = vadd.f32 %v1666_v15, %v1636_v8  ;;  %v1598_v17 = vadd.f32 %v2062_v63, %v1597_v13 }
 0x1e3   : > { %v1668_v18 = vadd.f32 %v1667_v16, %v1637_v12 }
 0x1f9   : > { %v2065_v19 = vpop.f32.mrb[0].mxu1 }
 0x1fa   : > { %v1361_v20 = vpop.f32.mrb[1].mxu1  ;;  %v1640_v33 = vmul.f32 %v2065_v19, %v2065_v19 }
 0x1fb   : > { %v1599_v21 = vadd.f32 %v1598_v17, %v1361_v20  ;;  %v1638_v22 = vmul.f32 %v1361_v20, %v1361_v20  ;;  %v2066_v24 = vpop.f32.mrb[2].mxu1 }
 0x1fc   : > { %v1975_v25 = vpack.c.bf16 %v2066_v24, %v2065_v19  ;;  %v1364_v26 = vpop.f32.mrb[3].mxu1  ;;  %v1641_v35 = vmul.f32 %v2066_v24, %v2066_v24 }
 0x1fd   : > { %v1669_v3 = vadd.f32 %v1668_v18, %v1638_v22  ;;  %v1970_v31 = vpack.c.bf16 %v1364_v26, %v1361_v20  ;;  %v1600_v32 = vadd.f32 %v1599_v21, %v1364_v26  ;;  %v1639_v1 = vmul.f32 %v1364_v26, %v1364_v26 }
 0x1fe   : > { %2015 = vst [vmem:[%s2677_s12 + $0x48] sm:$0xff] %v1975_v25  }
 0x1ff   : > { %2014 = vst [vmem:[%s2677_s12 + $0x40] sm:$0xff] %v1970_v31   ;;  %v1601_v34 = vadd.f32 %v2065_v19, %v1600_v32  ;;  %v1670_v39 = vadd.f32 %v1669_v3, %v1639_v1 }
 0x201   : > { %v1671_v36 = vadd.f32 %v1670_v39, %v1640_v33  ;;  %v1602_v37 = vadd.f32 %v2066_v24, %v1601_v34 }
 0x203   : > { %v1672_v10 = vadd.f32 %v1671_v36, %v1641_v35 }
 0x219   : > { %v2069_v0 = vpop.f32.mrb[4].mxu1 }
 0x21a   : > { %v1377_v38 = vpop.f32.mrb[5].mxu1  ;;  %v1644_v45 = vmul.f32 %v2069_v0, %v2069_v0 }
 0x21b   : > { %v1603_v48 = vadd.f32 %v1602_v37, %v1377_v38  ;;  %v1642_v49 = vmul.f32 %v1377_v38, %v1377_v38  ;;  %v2070_v40 = vpop.f32.mrb[6].mxu1 }
 0x21c   : > { %v1985_v27 = vpack.c.bf16 %v2070_v40, %v2069_v0  ;;  %v1380_v14 = vpop.f32.mrb[7].mxu1  ;;  %v1645_v50 = vmul.f32 %v2070_v40, %v2070_v40 }
 0x21d   : > { %v1673_v41 = vadd.f32 %v1672_v10, %v1642_v49  ;;  %v1980_v42 = vpack.c.bf16 %v1380_v14, %v1377_v38  ;;  %v1604_v43 = vadd.f32 %v1603_v48, %v1380_v14  ;;  %v1643_v44 = vmul.f32 %v1380_v14, %v1380_v14 }
 0x21e   : > { %2017 = vst [vmem:[%s2677_s12 + $0x58] sm:$0xff] %v1985_v27  }
 0x21f   : > { %2016 = vst [vmem:[%s2677_s12 + $0x50] sm:$0xff] %v1980_v42   ;;  %v1605_v46 = vadd.f32 %v2069_v0, %v1604_v43  ;;  %v1674_v47 = vadd.f32 %v1673_v41, %v1643_v44 }
 0x221   : > { %v1675_v30 = vadd.f32 %v1674_v47, %v1644_v45  ;;  %v1606_v60 = vadd.f32 %v2070_v40, %v1605_v46 }
 0x223   : > { %v1676_v51 = vadd.f32 %v1675_v30, %v1645_v50 }
 0x239   : > { %v2073_v23 = vpop.f32.mrb[8].mxu1 }
 0x23a   : > { %v1393_v52 = vpop.f32.mrb[9].mxu1  ;;  %v1648_v29 = vmul.f32 %v2073_v23, %v2073_v23 }
 0x23b   : > { %v1607_v53 = vadd.f32 %v1606_v60, %v1393_v52  ;;  %v1646_v54 = vmul.f32 %v1393_v52, %v1393_v52  ;;  %v2074_v55 = vpop.f32.mrb[10].mxu1 }
 0x23c   : > { %v1995_v56 = vpack.c.bf16 %v2074_v55, %v2073_v23  ;;  %v1396_v57 = vpop.f32.mrb[11].mxu1  ;;  %v1649_v63 = vmul.f32 %v2074_v55, %v2074_v55 }
 0x23d   : > { %v1677_v58 = vadd.f32 %v1676_v51, %v1646_v54  ;;  %v1990_v59 = vpack.c.bf16 %v1396_v57, %v1393_v52  ;;  %v1608_v61 = vadd.f32 %v1607_v53, %v1396_v57  ;;  %v1647_v11 = vmul.f32 %v1396_v57, %v1396_v57 }
 0x23e   : > { %2019 = vst [vmem:[%s2677_s12 + $0x68] sm:$0xff] %v1995_v56  }
 0x23f   : > { %2018 = vst [vmem:[%s2677_s12 + $0x60] sm:$0xff] %v1990_v59   ;;  %v1609_v62 = vadd.f32 %v2073_v23, %v1608_v61  ;;  %v1678_v9 = vadd.f32 %v1677_v58, %v1647_v11 }
 0x241   : > { %v1679_v2 = vadd.f32 %v1678_v9, %v1648_v29  ;;  %v1610_v4 = vadd.f32 %v2074_v55, %v1609_v62 }
 0x243   : > { %v1680_v5 = vadd.f32 %v1679_v2, %v1649_v63 }
 0x256   : > { %v2077_v6 = vpop.f32.mrb[12].mxu1 }
 0x257   : > { %v1409_v28 = vpop.f32.mrb[13].mxu1  ;;  %v1652_v20 = vmul.f32 %v2077_v6, %v2077_v6 }
 0x258   : > { %v1611_v7 = vadd.f32 %v1610_v4, %v1409_v28  ;;  %v1650_v8 = vmul.f32 %v1409_v28, %v1409_v28  ;;  %v2078_v13 = vpop.f32.mrb[14].mxu1 }
 0x259   : > { %v2005_v15 = vpack.c.bf16 %v2078_v13, %v2077_v6  ;;  %v1412_v12 = vpop.f32.mrb[15].mxu1  ;;  %v1653_v24 = vmul.f32 %v2078_v13, %v2078_v13 }
 0x25a   : > { %v1681_v16 = vadd.f32 %v1680_v5, %v1650_v8  ;;  %v2000_v17 = vpack.c.bf16 %v1412_v12, %v1409_v28  ;;  %v1612_v18 = vadd.f32 %v1611_v7, %v1412_v12  ;;  %v1651_v19 = vmul.f32 %v1412_v12, %v1412_v12 }
 0x25b   : > { %2021 = vst [vmem:[%s2677_s12 + $0x78] sm:$0xff] %v2005_v15  }
 0x25c   : > { %2020 = vst [vmem:[%s2677_s12 + $0x70] sm:$0xff] %v2000_v17   ;;  %v1613_v21 = vadd.f32 %v2077_v6, %v1612_v18  ;;  %v1682_v22 = vadd.f32 %v1681_v16, %v1651_v19 }
 0x25e   : > { %v1614_v25 = vadd.f32 %v2078_v13, %v1613_v21  ;;  %v1683_v26 = vadd.f32 %v1682_v22, %v1652_v20 }
 0x260   : > { %v1615_v3 = vrot.slane %v1614_v25, 4  ;;  %v1684_v31 = vadd.f32 %v1683_v26, %v1653_v24 }
 0x262   : > { %v1616_v32 = vadd.f32 %v1615_v3, %v1614_v25  ;;  %v1685_v1 = vrot.slane %v1684_v31, 4 }
 0x264   : > { %v1617_v33 = vrot.slane %v1616_v32, 2  ;;  %v1686_v34 = vadd.f32 %v1685_v1, %v1684_v31 }
 0x266   : > { %v1618_v39 = vadd.f32 %v1617_v33, %v1616_v32  ;;  %v1687_v35 = vrot.slane %v1686_v34, 2 }
 0x268   : > { %v1619_v36 = vrot.slane %v1618_v39, 1  ;;  %v1688_v37 = vadd.f32 %v1687_v35, %v1686_v34 }
 0x26a   : > { %v1620_v10 = vadd.f32 %v1619_v36, %v1618_v39  ;;  %v1689_v0 = vrot.slane %v1688_v37, 1 }
 0x26c   : > { %1621 = vst [vmem:[%s211_s17] sm:$0x1] %v1620_v10  ;;  %v1690_v38 = vadd.f32 %v1689_v0, %v1688_v37 }
 0x26e   : > { %1691 = vst [vmem:[%s214_s20] sm:$0x1] %v1690_v38 }
 0x26f PF: > { %s15_s15 = sadd.s32 1, %s2149_s15  }
 0x270   : > { %p12_p4 = scmp.ge.s32.totalorder %s15_s15, 4  }
 0x272   :  { %14 = sbr.rel (!%p12_p4) target bundleno = 1 (0x1), region = 82 }

// kernel: image_encoder.7
= control target key start
LH: loop header
LB: loop body
LE: loop exit
PB: predicated region body
PF: predicated region fallthrough
CT: control target
= control target key end

     0   :  { %s3463_s15 = smov 0   ;;  %s4498_s0 = inlined_call_operand.vmem [shape: bf16[2,18,18,128], index: 0, kind: input, shape index: {}]   ;;  %s4499_s1 = inlined_call_operand.vmem [shape: bf16[1152,128], index: 1, kind: input, shape index: {}]   ;;  %s4500_s2 = inlined_call_operand.vmem [shape: bf16[2,256,128], index: 2, kind: output, shape index: {0}]   ;;  %s4501_s3 = inlined_call_operand.vmem [shape: f32[2,1,128], index: 3, kind: output, shape index: {1}]   ;;  %s4502_s4 = inlined_call_operand.vmem [shape: f32[2,1,128], index: 4, kind: output, shape index: {2}]  }
   0x1 LB: > { %s2494_s16 = sadd.s32 4294967295, %s3436_s15   ;;  %p2498_p0 = scmp.ge.s32.totalorder %s3436_s15, 1  ;;  %s3436_s15 = sphi %s3463_s15, %s15_s15  }
   0x2   : > { %p167_p1 = scmp.lt.s32.totalorder %s3436_s15, 3 }
   0x4   : > { %p168_p2 = pnand %p2498_p0, %p167_p1 }
   0x5   : > { %v3317_v0 = vld [vmem:[%s4499_s1 + $0x40] sm:$0xff] (!%p168_p2)   ;;  %v3319_v2 = vld [vmem:[%s4499_s1 + $0x48] sm:$0xff] (!%p168_p2)   ;;  %p199_p3 = scmp.lt.s32.totalorder (!%p168_p2), %s2494_s16, 1  ;;  %v3321_v4 = vld [vmem:[%s4499_s1 + $0x50] sm:$0xff] (!%p168_p2)   ;;  %vm414_vm0 = vsmask.f32 (!%p168_p2), 7424 }
   0x6   : > { %171 = sbr.rel (%p168_p2) target bundleno = 557 (0x22d), region = 28  ;;  %v3318_v1 = vld [vmem:[%s4499_s1] sm:$0xff] (!%p168_p2)   ;;  %2772 = vmatprep.subr.bf16.mxu0 (!%p168_p2), %v3317_v0  ;;  %3292 = vmatprep.subr.bf16.mxu1 (!%p168_p2), %v3317_v0  ;;  %v3320_v3 = vld [vmem:[%s4499_s1 + $0x8] sm:$0xff] (!%p168_p2)   ;;  %v3322_v5 = vld [vmem:[%s4499_s1 + $0x10] sm:$0xff] (!%p168_p2)   ;;  %vm623_vm1 = vcmask (!%p168_p2), 1046528  }
   0x7   : > { %2773 = vmatpush3.bf16.msra.mxu0 (!%p168_p2), %v3318_v1  ;;  %3300 = vmatpush3.bf16.msra.mxu1 (!%p168_p2), %v3318_v1  ;;  %v3323_v6 = vld [vmem:[%s4499_s1 + $0x58] sm:$0xff] (!%p168_p2)   ;;  %v3325_v8 = vld [vmem:[%s4499_s1 + $0x60] sm:$0xff] (!%p168_p2)   ;;  %v3327_v10 = vld [vmem:[%s4499_s1 + $0x68] sm:$0xff] (!%p168_p2)  }
   0x8   : > { %2774 = vmatprep.subr.bf16.mxu0 (!%p168_p2), %v3319_v2  ;;  %3293 = vmatprep.subr.bf16.mxu1 (!%p168_p2), %v3319_v2  ;;  %v3324_v7 = vld [vmem:[%s4499_s1 + $0x18] sm:$0xff] (!%p168_p2)   ;;  %v3326_v9 = vld [vmem:[%s4499_s1 + $0x20] sm:$0xff] (!%p168_p2)   ;;  %v3328_v11 = vld [vmem:[%s4499_s1 + $0x28] sm:$0xff] (!%p168_p2)  }
   0x9   : > { %v3329_v18 = vld [vmem:[%s4499_s1 + $0x70] sm:$0xff] (!%p168_p2)   ;;  %v3331_v28 = vld [vmem:[%s4499_s1 + $0x78] sm:$0xff] (!%p168_p2)   ;;  %v3337_v33 = vld [vmem:[%s4499_s1 + $0xc0] sm:$0xff] (!%p168_p2)  }
   0xa   : > { %v3330_v25 = vld [vmem:[%s4499_s1 + $0x30] sm:$0xff] (!%p168_p2)   ;;  %v3332_v30 = vld [vmem:[%s4499_s1 + $0x38] sm:$0xff] (!%p168_p2)   ;;  %v3338_v34 = vld [vmem:[%s4499_s1 + $0x140] sm:$0xff] (!%p168_p2)  }
   0xb   : > { %2775 = vmatpush3.bf16.msra.mxu0 (!%p168_p2), %v3320_v3  ;;  %3301 = vmatpush3.bf16.msra.mxu1 (!%p168_p2), %v3320_v3  ;;  %v3339_v39 = vld [vmem:[%s4499_s1 + $0x80] sm:$0xff] (!%p168_p2)   ;;  %v3341_v48 = vld [vmem:[%s4499_s1 + $0xc8] sm:$0xff] (!%p168_p2)   ;;  %v3347_v59 = vld [vmem:[%s4499_s1 + $0xd0] sm:$0xff] (!%p168_p2)  }
   0xc   : > { %2776 = vmatprep.subr.bf16.mxu0 (!%p168_p2), %v3321_v4  ;;  %3294 = vmatprep.subr.bf16.mxu1 (!%p168_p2), %v3321_v4  ;;  %v3340_v46 = vld [vmem:[%s4499_s1 + $0x100] sm:$0xff] (!%p168_p2)   ;;  %v3342_v53 = vld [vmem:[%s4499_s1 + $0x88] sm:$0xff] (!%p168_p2)   ;;  %v3348_v60 = vld [vmem:[%s4499_s1 + $0x90] sm:$0xff] (!%p168_p2)  }
   0xd   : > { %s4504_s16 = smov (!%p199_p3, %s2494_s16), 1  ;;  %v3350_v57 = vld [vmem:[%s4499_s1 + $0x148] sm:$0xff]   ;;  %v3349_v62 = vld [vmem:[%s4499_s1 + $0xd8] sm:$0xff]  }
   0xe   : > { %s3308_s5 = smul.u32 216, %s4504_s16  ;;  %v3352_v61 = vld [vmem:[%s4499_s1 + $0x108] sm:$0xff]   ;;  %s214_s8 = scalar_lea.vmem %s4502_s4, %s4504_s16 }
   0xf   : > { %2777 = vmatpush3.bf16.msra.mxu0 %v3322_v5  ;;  %3302 = vmatpush3.bf16.msra.mxu1 %v3322_v5 }
  0x10   : > { %2778 = vmatprep.subr.bf16.mxu0 %v3323_v6  ;;  %3295 = vmatprep.subr.bf16.mxu1 %v3323_v6  ;;  %s3507_s14 = scalar_lea.vmem %s4498_s0, %s3308_s5  ;;  %s211_s5 = scalar_lea.vmem %s4501_s3, %s4504_s16 }
  0x11   : > { %v3516_v12 = vld [vmem:[%s3507_s14] sm:$0xff]   ;;  %v3519_v13 = vld [vmem:[%s3507_s14 + $0x8] ss:$0 sps:$4 sm:$0x11]   ;;  %v3335_v17 = vld [vmem:[%s3507_s14 + $0x90] sm:$0xff]  }
  0x12   : > { %v416_v14 = vshrl.u32 %v3516_v12, 16  ;;  %v418_v15 = vshll.u32 %v3516_v12, 16  ;;  %v423_v16 = vshll.u32 %v3519_v13, 16  ;;  %v3336_v19 = vld [vmem:[%s3507_s14 + $0x98] ss:$0 sps:$4 sm:$0x11]  }
  0x13   : > { %2779 = vmatpush3.bf16.msra.mxu0 %v3324_v7  ;;  %3303 = vmatpush3.bf16.msra.mxu1 %v3324_v7  ;;  %v560_v22 = vshrl.u32 %v3335_v17, 16  ;;  %v562_v23 = vshll.u32 %v3335_v17, 16  ;;  %v567_v24 = vshll.u32 %v3336_v19, 16  ;;  %v3549_v36 = vld [vmem:[%s3507_s14 + $0xc] sm:$0xff]   ;;  %v3555_v38 = vld [vmem:[%s3507_s14 + $0x9c] sm:$0xff]  }
  0x14   : > { %2780 = vmatprep.subr.bf16.mxu0 %v3325_v8  ;;  %3296 = vmatprep.subr.bf16.mxu1 %v3325_v8  ;;  %v420_v20 = vrot.slane %v418_v15, 1  ;;  %v425_v21 = vrot.slane %v423_v16, 1  ;;  %v3552_v37 = vld [vmem:[%s3507_s14 + $0x14] ss:$0 sps:$4 sm:$0x11]   ;;  %v428_v40 = vshrl.u32 %v3549_v36, 16 }
  0x15   : > { %v564_v27 = vrot.slane %v562_v23, 1  ;;  %v569_v29 = vrot.slane %v567_v24, 1  ;;  %v430_v41 = vshll.u32 %v3549_v36, 16  ;;  %v435_v42 = vshll.u32 %v3552_v37, 16  ;;  %v3604_v63 = vld [vmem:[%s3507_s14 + $0x18] sm:$0xff]   ;;  %v3613_v4 = vld [vmem:[%s3507_s14 + $0xa8] sm:$0xff]  }
  0x16   : > { %v421_v26 = vor.u32 %v420_v20, %v416_v14  ;;  %v3565_v43 = vld [vmem:[%s3507_s14 + $0xa4] ss:$0 sps:$4 sm:$0x11]   ;;  %v572_v44 = vshrl.u32 %v3555_v38, 16  ;;  %v574_v45 = vshll.u32 %v3555_v38, 16  ;;  %v440_v1 = vshrl.u32 %v3604_v63, 16 }
  0x17   : > { %2781 = vmatpush3.bf16.msra.mxu0 %v3326_v9  ;;  %3304 = vmatpush3.bf16.msra.mxu1 %v3326_v9  ;;  %v565_v32 = vor.u32 %v564_v27, %v560_v22  ;;  %v432_v47 = vrot.slane %v430_v41, 1  ;;  %v437_v49 = vrot.slane %v435_v42, 1  ;;  %v579_v51 = vshll.u32 %v3565_v43, 16  ;;  %v3607_v0 = vld [vmem:[%s3507_s14 + $0x20] ss:$0 sps:$4 sm:$0x11]  }
  0x18   : > { %2782 = vmatprep.subr.bf16.mxu0 %v3327_v10  ;;  %3297 = vmatprep.subr.bf16.mxu1 %v3327_v10  ;;  %v426_v31 = vsel %vm414_vm0, %v421_v26, %v425_v21  ;;  %v576_v50 = vrot.slane %v574_v45, 1  ;;  %v442_v2 = vshll.u32 %v3604_v63, 16  ;;  %v447_v3 = vshll.u32 %v3607_v0, 16  ;;  %v3616_v5 = vld [vmem:[%s3507_s14 + $0xb0] ss:$0 sps:$4 sm:$0x11]  }
  0x19   : > { %1348 = vmatprep.mubr.bf16.mxu0 %v426_v31  ;;  %v3546_v35 = vsel %vm414_vm0, %v565_v32, %v569_v29  ;;  %v433_v52 = vor.u32 %v432_v47, %v428_v40  ;;  %v581_v55 = vrot.slane %v579_v51, 1  ;;  %v584_v8 = vshrl.u32 %v3613_v4, 16  ;;  %v3351_v10 = vld [vmem:[%s4499_s1 + $0x98] sm:$0xff]   ;;  %v3357_v16 = vld [vmem:[%s4499_s1 + $0xe0] sm:$0xff]   ;;  %v3359_v21 = vld [vmem:[%s4499_s1 + $0xe8] sm:$0xff]  }
  0x1a   : > { %1444 = vmatprep.mubr.bf16.mxu1 %v3546_v35  ;;  %v577_v54 = vor.u32 %v576_v50, %v572_v44  ;;  %v444_v6 = vrot.slane %v442_v2, 1  ;;  %v449_v7 = vrot.slane %v447_v3, 1  ;;  %v586_v9 = vshll.u32 %v3613_v4, 16  ;;  %v3639_v22 = vld [vmem:[%s3507_s14 + $0x24] sm:$0xff]   ;;  %v3646_v24 = vld [vmem:[%s3507_s14 + $0xb4] sm:$0xff]  }
  0x1b   : > { %2783 = vmatpush3.bf16.msra.mxu0 %v3328_v11  ;;  %3305 = vmatpush3.bf16.msra.mxu1 %v3328_v11  ;;  %v3581_v56 = vsel %vm414_vm0, %v433_v52, %v437_v49  ;;  %v591_v11 = vshll.u32 %v3616_v5, 16  ;;  %v3643_v23 = vld [vmem:[%s3507_s14 + $0x2c] ss:$0 sps:$4 sm:$0x11]   ;;  %v452_v26 = vshrl.u32 %v3639_v22, 16  ;;  %v454_v27 = vshll.u32 %v3639_v22, 16 }
  0x1c   : > { %2784 = vmatprep.subr.bf16.mxu0 %v3329_v18  ;;  %3298 = vmatprep.subr.bf16.mxu1 %v3329_v18  ;;  %v3588_v58 = vsel %vm414_vm0, %v577_v54, %v581_v55  ;;  %v445_v14 = vor.u32 %v444_v6, %v440_v1  ;;  %v588_v15 = vrot.slane %v586_v9, 1  ;;  %v3358_v18 = vld [vmem:[%s4499_s1 + $0xa0] sm:$0xff]   ;;  %v459_v29 = vshll.u32 %v3643_v23, 16  ;;  %v3366_v42 = vld [vmem:[%s4499_s1 + $0x150] sm:$0xff]   ;;  %v3375_v6 = vld [vmem:[%s4499_s1 + $0x158] sm:$0xff]  }
  0x1d   : > { %v596_v31 = vshrl.u32 %v3646_v24, 16  ;;  %v598_v32 = vshll.u32 %v3646_v24, 16  ;;  %v625_v45 = vrot.slane %v3519_v13, 1  ;;  %v3368_v49 = vld [vmem:[%s4499_s1 + $0x110] sm:$0xff]   ;;  %v624_v50 = vrot.slane %v3516_v12, 1  ;;  %v3374_v3 = vld [vmem:[%s4499_s1 + $0x180] sm:$0xff]  }
  0x1e   : > { %v3633_v19 = vsel %vm414_vm0, %v445_v14, %v449_v7  ;;  %v589_v20 = vor.u32 %v588_v15, %v584_v8  ;;  %v3367_v13 = vld [vmem:[%s4499_s1 + $0xb0] sm:$0xff]   ;;  %v627_v52 = vrot.slane %v3549_v36, 1  ;;  %v3697_v55 = vld [vmem:[%s3507_s14 + $0x38] ss:$0 sps:$4 sm:$0x11]   ;;  %v3723_v9 = vld [vmem:[%s3507_s14 + $0x3c] sm:$0xff]  }
  0x1f   : > { %2785 = vmatpush3.bf16.msra.mxu0 %v3330_v25  ;;  %3306 = vmatpush3.bf16.msra.mxu1 %v3330_v25  ;;  %v600_v40 = vrot.slane %v598_v32, 1  ;;  %v3694_v54 = vld [vmem:[%s3507_s14 + $0x30] sm:$0xff]   ;;  %v626_v8 = vsel %vm623_vm1, %v624_v50, %v625_v45  ;;  %v476_v14 = vshrl.u32 %v3723_v9, 16  ;;  %v478_v15 = vshll.u32 %v3723_v9, 16 }
  0x20   : > { %2786 = vmatprep.subr.bf16.mxu0 %v3331_v28  ;;  %3299 = vmatprep.subr.bf16.mxu1 %v3331_v28  ;;  %v3360_v28 = vld [vmem:[%s4499_s1 + $0xa8] sm:$0xff]   ;;  %v631_v45 = vrot.slane %v3607_v0, 1 }
  0x23   : > { %2787 = vmatpush3.bf16.msra.mxu0 %v3332_v30  ;;  %3307 = vmatpush3.bf16.msra.mxu1 %v3332_v30  ;;  %v3659_v30 = vld [vmem:[%s3507_s14 + $0xbc] ss:$0 sps:$4 sm:$0x11]  }
  0x24   : > { %2884 = vmatprep.subr.bf16.mxu1 %v3337_v33  ;;  %2996 = vmatprep.subr.bf16.mxu0 %v3338_v34  ;;  %v456_v33 = vrot.slane %v454_v27, 1  ;;  %v3365_v34 = vld [vmem:[%s4499_s1 + $0xf0] sm:$0xff]   ;;  %v603_v41 = vshll.u32 %v3659_v30, 16 }
  0x26   : > { %1349 = vmatmul.mubr.bf16.vlgmr.msra.gmra.mrb[0].mxu0 %v3516_v12  ;;  %1445 = vmatmul.mubr.bf16.vlgmr.msra.gmra.mrb[0].mxu1 %v3335_v17  ;;  %v593_v17 = vrot.slane %v591_v11, 1  ;;  %v457_v44 = vor.u32 %v456_v33, %v452_v26  ;;  %v605_v47 = vrot.slane %v603_v41, 1  ;;  %v628_v12 = vrot.slane %v3552_v37, 1 }
  0x27   : > { %2885 = vmatpush3.bf16.msra.mxu1 %v3339_v39  ;;  %2997 = vmatpush3.bf16.msra.mxu0 %v3340_v46  ;;  %v461_v39 = vrot.slane %v459_v29, 1  ;;  %v601_v46 = vor.u32 %v600_v40, %v596_v31  ;;  %v466_v37 = vshll.u32 %v3694_v54, 16  ;;  %v3382_v31 = vld [vmem:[%s4499_s1 + $0x1c8] sm:$0xff]  }
  0x28   : > { %2886 = vmatprep.subr.bf16.mxu1 %v3341_v48  ;;  %1356 = vmatprep.mubr.bf16.mxu0 %v3581_v56  ;;  %v3649_v25 = vsel %vm414_vm0, %v589_v20, %v593_v17  ;;  %v3735_v17 = vld [vmem:[%s3507_s14 + $0x48] sm:$0xff]   ;;  %v3381_v20 = vld [vmem:[%s4499_s1 + $0x160] sm:$0xff]  }
  0x29   : > { %1452 = vmatprep.mubr.bf16.mxu1 %v3588_v58  ;;  %2998 = vmatprep.subr.bf16.mxu0 %v3350_v57  ;;  %v3674_v48 = vsel %vm414_vm0, %v457_v44, %v461_v39  ;;  %v3682_v51 = vsel %vm414_vm0, %v601_v46, %v605_v47  ;;  %v3370_v57 = vld [vmem:[%s4499_s1 + $0xb8] sm:$0xff]   ;;  %v468_v1 = vrot.slane %v466_v37, 1  ;;  %v488_v27 = vshrl.u32 %v3735_v17, 16  ;;  %v3384_v40 = vld [vmem:[%s4499_s1 + $0x188] sm:$0xff]   ;;  %v3391_v37 = vld [vmem:[%s4499_s1 + $0x1d0] sm:$0xff]  }
  0x2a   : > { %v3766_v46 = vld [vmem:[%s3507_s14 + $0x54] sm:$0xff]   ;;  %v3770_v47 = vld [vmem:[%s3507_s14 + $0x5c] ss:$0 sps:$4 sm:$0x11]  }
  0x2b   : > { %2887 = vmatpush3.bf16.msra.mxu1 %v3342_v53  ;;  %2999 = vmatpush3.bf16.msra.mxu0 %v3352_v61  ;;  %v3369_v53 = vld [vmem:[%s4499_s1 + $0xf8] sm:$0xff]   ;;  %v471_v61 = vshll.u32 %v3697_v55, 16  ;;  %v502_v0 = vshll.u32 %v3766_v46, 16 }
  0x2c   : > { %2888 = vmatprep.subr.bf16.mxu1 %v3347_v59  ;;  %3000 = vmatprep.subr.bf16.mxu0 %v3366_v42  ;;  %v630_v59 = vrot.slane %v3604_v63, 1  ;;  %v3762_v42 = vsel %vm623_vm1, %v627_v52, %v628_v12  ;;  %v507_v52 = vshll.u32 %v3770_v47, 16 }
  0x2d   : > { %v473_v2 = vrot.slane %v471_v61, 1  ;;  %v504_v12 = vrot.slane %v502_v0, 1  ;;  %v3859_v0 = vld [vmem:[%s3507_s14 + $0x80] ss:$0 sps:$4 sm:$0x11]  }
  0x2e   : > { %1357 = vmatmul.mubr.bf16.gmra.mrb[4].mxu0 %v3549_v36  ;;  %1453 = vmatmul.mubr.bf16.gmra.mrb[4].mxu1 %v3555_v38 }
  0x2f   : > { %2889 = vmatpush3.bf16.msra.mxu1 %v3348_v60  ;;  %1364 = vmatprep.mubr.bf16.mxu0 %v3633_v19  ;;  %v464_v60 = vshrl.u32 %v3694_v54, 16 }
  0x30   : > { %2890 = vmatprep.subr.bf16.mxu1 %v3349_v62  ;;  %1460 = vmatprep.mubr.bf16.mxu1 %v3649_v25  ;;  %v3373_v62 = vld [vmem:[%s4499_s1 + $0x1c0] sm:$0xff]  }
  0x31   : > { %3001 = vmatpush3.bf16.msra.mxu0 %v3368_v49  ;;  %v469_v7 = vor.u32 %v468_v1, %v464_v60  ;;  %v3387_v49 = vld [vmem:[%s4499_s1 + $0x168] sm:$0xff]  }
  0x32   : > { %3002 = vmatprep.subr.bf16.mxu0 %v3375_v6  ;;  %v3792_v60 = vld [vmem:[%s3507_s14 + $0x68] ss:$0 sps:$4 sm:$0x11]  }
  0x33   : > { %2891 = vmatpush3.bf16.msra.mxu1 %v3351_v10  ;;  %v3726_v10 = vld [vmem:[%s3507_s14 + $0x44] ss:$0 sps:$4 sm:$0x11]   ;;  %v3729_v11 = vsel %vm414_vm0, %v469_v7, %v473_v2  ;;  %v3392_v2 = vld [vmem:[%s4499_s1 + $0x190] sm:$0xff]  }
  0x34   : > { %2892 = vmatprep.subr.bf16.mxu1 %v3357_v16  ;;  %v483_v16 = vshll.u32 %v3726_v10, 16 }
  0x36   : > { %1365 = vmatmul.mubr.bf16.gmra.mrb[8].mxu0 %v3604_v63  ;;  %1461 = vmatmul.mubr.bf16.gmra.mrb[8].mxu1 %v3613_v4  ;;  %v485_v26 = vrot.slane %v483_v16, 1  ;;  %v3820_v16 = vld [vmem:[%s3507_s14 + $0x74] ss:$0 sps:$4 sm:$0x11]  }
  0x37   : > { %2893 = vmatpush3.bf16.msra.mxu1 %v3358_v18  ;;  %1372 = vmatprep.mubr.bf16.mxu0 %v3674_v48  ;;  %v3739_v18 = vld [vmem:[%s3507_s14 + $0x50] ss:$0 sps:$4 sm:$0x11]  }
  0x38   : > { %2894 = vmatprep.subr.bf16.mxu1 %v3359_v21  ;;  %1468 = vmatprep.mubr.bf16.mxu1 %v3682_v51  ;;  %v480_v21 = vrot.slane %v478_v15, 1  ;;  %v495_v29 = vshll.u32 %v3739_v18, 16  ;;  %v3395_v15 = vld [vmem:[%s4499_s1 + $0x170] sm:$0xff]  }
  0x3a   : > { %v481_v32 = vor.u32 %v480_v21, %v476_v14  ;;  %v497_v39 = vrot.slane %v495_v29, 1  ;;  %v3812_v14 = vld [vmem:[%s3507_s14 + $0x6c] sm:$0xff]   ;;  %v3399_v29 = vld [vmem:[%s4499_s1 + $0x1d8] sm:$0xff]  }
  0x3b   : > { %2895 = vmatpush3.bf16.msra.mxu1 %v3360_v28  ;;  %v490_v28 = vshll.u32 %v3735_v17, 16  ;;  %v3396_v21 = vld [vmem:[%s4499_s1 + $0x130] sm:$0xff]  }
  0x3c   : > { %2896 = vmatprep.subr.bf16.mxu1 %v3365_v34  ;;  %v3383_v34 = vld [vmem:[%s4499_s1 + $0x120] sm:$0xff]   ;;  %v3759_v41 = vsel %vm414_vm0, %v481_v32, %v485_v26  ;;  %v3838_v32 = vld [vmem:[%s3507_s14 + $0x78] sm:$0xff]  }
  0x3d   : > { %v492_v33 = vrot.slane %v490_v28, 1  ;;  %v526_v28 = vshll.u32 %v3812_v14, 16 }
  0x3e   : > { %1373 = vmatmul.mubr.bf16.gmra.mrb[12].mxu0 %v3639_v22  ;;  %1469 = vmatmul.mubr.bf16.gmra.mrb[12].mxu1 %v3646_v24 }
  0x3f   : > { %2897 = vmatpush3.bf16.msra.mxu1 %v3367_v13  ;;  %1509 = vmatprep.mubr.bf16.mxu1 %v3549_v36  ;;  %v3376_v36 = vld [vmem:[%s4499_s1 + $0x118] sm:$0xff]   ;;  %v493_v44 = vor.u32 %v492_v33, %v488_v27  ;;  %v500_v13 = vshrl.u32 %v3766_v46, 16 }
  0x40   : > { %2898 = vmatprep.subr.bf16.mxu1 %v3369_v53  ;;  %3003 = vmatpush3.bf16.msra.mxu0 %v3376_v36  ;;  %v3388_v53 = vld [vmem:[%s4499_s1 + $0x128] sm:$0xff]   ;;  %v3400_v33 = vld [vmem:[%s4499_s1 + $0x198] sm:$0xff]  }
  0x41   : > { %1380 = vmatprep.mubr.bf16.mxu0 %v3729_v11  ;;  %3004 = vmatprep.subr.bf16.mxu0 %v3381_v20  ;;  %v3776_v50 = vsel %vm414_vm0, %v493_v44, %v497_v39  ;;  %v505_v61 = vor.u32 %v504_v12, %v500_v13  ;;  %v634_v20 = vrot.slane %v3643_v23, 1  ;;  %v524_v23 = vshrl.u32 %v3812_v14, 16  ;;  %v3401_v39 = vld [vmem:[%s4499_s1 + $0x178] sm:$0xff]  }
  0x42   : > { %v528_v44 = vrot.slane %v526_v28, 1  ;;  %v637_v13 = vrot.slane %v3697_v55, 1  ;;  %v538_v12 = vshll.u32 %v3838_v32, 16 }
  0x43   : > { %2899 = vmatpush3.bf16.msra.mxu1 %v3370_v57  ;;  %v3788_v57 = vld [vmem:[%s3507_s14 + $0x60] sm:$0xff]  }
  0x44   : > { %3108 = vmatprep.subr.bf16.mxu1 %v3373_v62  ;;  %3005 = vmatpush3.bf16.msra.mxu0 %v3383_v34  ;;  %v509_v62 = vrot.slane %v507_v52, 1  ;;  %v514_v1 = vshll.u32 %v3788_v57, 16  ;;  %v512_v6 = vshrl.u32 %v3788_v57, 16  ;;  %v531_v34 = vshll.u32 %v3820_v16, 16 }
  0x45   : > { %3006 = vmatprep.subr.bf16.mxu0 %v3387_v49  ;;  %v636_v49 = vrot.slane %v3694_v54, 1  ;;  %v529_v52 = vor.u32 %v528_v44, %v524_v23 }
  0x46   : > { %1510 = vmatmul.mubr.bf16.vlgmr.msra.gmra.mrb[16].mxu1 %v626_v8  ;;  %1381 = vmatmul.mubr.bf16.gmra.mrb[16].mxu0 %v3694_v54  ;;  %v3808_v36 = vsel %vm414_vm0, %v505_v61, %v509_v62  ;;  %v516_v7 = vrot.slane %v514_v1, 1  ;;  %v519_v8 = vshll.u32 %v3792_v60, 16  ;;  %v3869_v61 = vld [vmem:[%s4499_s1 + $0x200] sm:$0xff]   ;;  %v536_v62 = vshrl.u32 %v3838_v32, 16 }
  0x47   : > { %3109 = vmatpush3.bf16.msra.mxu1 %v3374_v3  ;;  %1517 = vmatprep.mubr.bf16.mxu1 %v3604_v63  ;;  %v3804_v3 = vsel %vm623_vm1, %v630_v59, %v631_v45  ;;  %v633_v59 = vrot.slane %v3639_v22, 1  ;;  %v3402_v45 = vld [vmem:[%s4499_s1 + $0x138] sm:$0xff]   ;;  %v3872_v55 = vsel %vm623_vm1, %v636_v49, %v637_v13  ;;  %v3407_v1 = vld [vmem:[%s4499_s1 + $0x1a0] sm:$0xff]  }
  0x48   : > { %3110 = vmatprep.subr.bf16.mxu1 %v3382_v31  ;;  %1388 = vmatprep.mubr.bf16.mxu0 %v3759_v41  ;;  %v517_v26 = vor.u32 %v516_v7, %v512_v6  ;;  %v521_v27 = vrot.slane %v519_v8, 1  ;;  %v3880_v6 = vld [vmem:[%s3507_s14 + $0x84] sm:$0xff]   ;;  %v540_v8 = vrot.slane %v538_v12, 1  ;;  %v3416_v13 = vld [vmem:[%s4499_s1 + $0x1b8] sm:$0xff]  }
  0x49   : > { %3007 = vmatpush3.bf16.msra.mxu0 %v3388_v53  ;;  %v3834_v31 = vsel %vm623_vm1, %v633_v59, %v634_v20  ;;  %v533_v53 = vrot.slane %v531_v34, 1  ;;  %v639_v59 = vrot.slane %v3723_v9, 1  ;;  %v3892_v20 = vld [vmem:[%s3507_s14 + $0x8c] ss:$0 sps:$4 sm:$0x11]   ;;  %v550_v23 = vshll.u32 %v3880_v6, 16 }
  0x4a   : > { %3008 = vmatprep.subr.bf16.mxu0 %v3395_v15  ;;  %v3408_v15 = vld [vmem:[%s4499_s1 + $0x1e8] sm:$0xff]   ;;  %v541_v28 = vor.u32 %v540_v8, %v536_v62  ;;  %v3414_v34 = vld [vmem:[%s4499_s1 + $0x1f8] sm:$0xff]   ;;  %v555_v44 = vshll.u32 %v3892_v20, 16 }
  0x4b   : > { %3111 = vmatpush3.bf16.msra.mxu1 %v3384_v40  ;;  %v3848_v40 = vsel %vm414_vm0, %v517_v26, %v521_v27  ;;  %v3884_v7 = vsel %vm414_vm0, %v529_v52, %v533_v53  ;;  %v3410_v26 = vld [vmem:[%s4499_s1 + $0x1a8] sm:$0xff]   ;;  %v3411_v27 = vld [vmem:[%s4499_s1 + $0x1f0] sm:$0xff]   ;;  %v552_v49 = vrot.slane %v550_v23, 1  ;;  %v642_v52 = vrot.slane %v3735_v17, 1 }
  0x4c   : > { %3112 = vmatprep.subr.bf16.mxu1 %v3391_v37  ;;  %v3405_v37 = vld [vmem:[%s4499_s1 + $0x1e0] sm:$0xff]   ;;  %v643_v53 = vrot.slane %v3739_v18, 1  ;;  %v646_v18 = vrot.slane %v3770_v47, 1  ;;  %v3409_v47 = vld [vmem:[%s4499_s1 + $0x208] sm:$0xff]  }
  0x4d   : > { %3009 = vmatpush3.bf16.msra.mxu0 %v3396_v21  ;;  %v640_v21 = vrot.slane %v3726_v10, 1  ;;  %v3413_v10 = vld [vmem:[%s4499_s1 + $0x1b0] sm:$0xff]   ;;  %v3419_v23 = vld [vmem:[%s4499_s1 + $0x228] sm:$0xff]  }
  0x4e   : > { %1518 = vmatmul.mubr.bf16.gmra.mrb[20].mxu1 %v3762_v42  ;;  %1389 = vmatmul.mubr.bf16.gmra.mrb[20].mxu0 %v3723_v9  ;;  %v3929_v62 = vsel %vm623_vm1, %v642_v52, %v643_v53 }
  0x4f   : > { %1525 = vmatprep.mubr.bf16.mxu1 %v3639_v22  ;;  %1396 = vmatprep.mubr.bf16.mxu0 %v3776_v50 }
  0x50   : > { %3113 = vmatpush3.bf16.msra.mxu1 %v3392_v2  ;;  %3010 = vmatprep.subr.bf16.mxu0 %v3401_v39  ;;  %v543_v2 = vshll.u32 %v3859_v0, 16  ;;  %v548_v39 = vshrl.u32 %v3880_v6, 16 }
  0x51   : > { %3114 = vmatprep.subr.bf16.mxu1 %v3399_v29  ;;  %3011 = vmatpush3.bf16.msra.mxu0 %v3402_v45 }
  0x52   : > { %3244 = vmatprep.subr.bf16.mxu0 %v3869_v61  ;;  %v545_v29 = vrot.slane %v543_v2, 1  ;;  %v553_v12 = vor.u32 %v552_v49, %v548_v39  ;;  %v645_v2 = vrot.slane %v3766_v46, 1  ;;  %v3420_v39 = vld [vmem:[%s4499_s1 + $0x230] sm:$0xff]   ;;  %v3421_v49 = vld [vmem:[%s4499_s1 + $0x238] sm:$0xff]  }
  0x54   : > { %3115 = vmatpush3.bf16.msra.mxu1 %v3400_v33  ;;  %v3909_v33 = vsel %vm623_vm1, %v639_v59, %v640_v21  ;;  %v3917_v45 = vsel %vm414_vm0, %v541_v28, %v545_v29  ;;  %v3941_v8 = vsel %vm623_vm1, %v645_v2, %v646_v18  ;;  %v649_v59 = vrot.slane %v3792_v60, 1  ;;  %v3418_v28 = vld [vmem:[%s4499_s1 + $0x220] sm:$0xff]  }
  0x55   : > { %3116 = vmatprep.subr.bf16.mxu1 %v3405_v37  ;;  %v557_v37 = vrot.slane %v555_v44, 1  ;;  %v666_v18 = vrot.slane %v3613_v4, 1 }
  0x56   : > { %1526 = vmatmul.mubr.bf16.gmra.mrb[24].mxu1 %v3804_v3  ;;  %1397 = vmatmul.mubr.bf16.gmra.mrb[24].mxu0 %v3735_v17 }
  0x57   : > { %1533 = vmatprep.mubr.bf16.mxu1 %v3694_v54  ;;  %1404 = vmatprep.mubr.bf16.mxu0 %v3808_v36 }
  0x58   : > { %3117 = vmatpush3.bf16.msra.mxu1 %v3407_v1  ;;  %v3932_v1 = vsel %vm414_vm0, %v553_v12, %v557_v37  ;;  %v663_v12 = vrot.slane %v3555_v38, 1  ;;  %v664_v37 = vrot.slane %v3565_v43, 1  ;;  %v4032_v43 = vld [vmem:[%s3507_s14 + $0xc0] sm:$0xff]  }
  0x59   : > { %3118 = vmatprep.subr.bf16.mxu1 %v3408_v15  ;;  %v648_v15 = vrot.slane %v3788_v57, 1 }
  0x5a   : > { %v4020_v2 = vsel %vm623_vm1, %v663_v12, %v664_v37 }
  0x5b   : > { %v3950_v21 = vsel %vm623_vm1, %v648_v15, %v649_v59  ;;  %v667_v15 = vrot.slane %v3616_v5, 1  ;;  %v669_v59 = vrot.slane %v3646_v24, 1  ;;  %v700_v5 = vshll.u32 %v4032_v43, 16 }
  0x5c   : > { %3119 = vmatpush3.bf16.msra.mxu1 %v3410_v26  ;;  %v651_v26 = vrot.slane %v3812_v14, 1 }
  0x5d   : > { %3120 = vmatprep.subr.bf16.mxu1 %v3411_v27  ;;  %v652_v27 = vrot.slane %v3820_v16, 1  ;;  %v654_v16 = vrot.slane %v3838_v32, 1 }
  0x5e   : > { %1534 = vmatmul.mubr.bf16.gmra.mrb[28].mxu1 %v3834_v31  ;;  %1405 = vmatmul.mubr.bf16.gmra.mrb[28].mxu0 %v3766_v46 }
  0x5f   : > { %1541 = vmatprep.mubr.bf16.mxu1 %v3723_v9  ;;  %1412 = vmatprep.mubr.bf16.mxu0 %v3848_v40  ;;  %v3966_v60 = vsel %vm623_vm1, %v651_v26, %v652_v27 }
  0x60   : > { %3121 = vmatpush3.bf16.msra.mxu1 %v3413_v10  ;;  %v657_v10 = vrot.slane %v3880_v6, 1 }
  0x61   : > { %3122 = vmatprep.subr.bf16.mxu1 %v3414_v34  ;;  %v658_v34 = vrot.slane %v3892_v20, 1 }
  0x63   : > { %v3999_v44 = vsel %vm623_vm1, %v657_v10, %v658_v34 }
  0x64   : > { %3123 = vmatpush3.bf16.msra.mxu1 %v3416_v13  ;;  %v3426_v13 = vld [vmem:[%s3507_s14 + $0x98] ss:$0 sps:$4 sm:$0x11]  }
  0x65   : > { %v661_v52 = vrot.slane %v3426_v13, 1 }
  0x66   : > { %1542 = vmatmul.mubr.bf16.gmra.mrb[32].mxu1 %v3872_v55  ;;  %1413 = vmatmul.mubr.bf16.gmra.mrb[32].mxu0 %v3788_v57 }
  0x67   : > { %1549 = vmatprep.mubr.bf16.mxu1 %v3735_v17  ;;  %1420 = vmatprep.mubr.bf16.mxu0 %v3884_v7 }
  0x6e   : > { %1550 = vmatmul.mubr.bf16.gmra.mrb[36].mxu1 %v3909_v33  ;;  %1421 = vmatmul.mubr.bf16.gmra.mrb[36].mxu0 %v3812_v14 }
  0x6f   : > { %1557 = vmatprep.mubr.bf16.mxu1 %v3766_v46  ;;  %1428 = vmatprep.mubr.bf16.mxu0 %v3917_v45 }
  0x76   : > { %1558 = vmatmul.mubr.bf16.gmra.mrb[40].mxu1 %v3929_v62  ;;  %1429 = vmatmul.mubr.bf16.gmra.mrb[40].mxu0 %v3838_v32 }
  0x77   : > { %1565 = vmatprep.mubr.bf16.mxu1 %v3788_v57  ;;  %1436 = vmatprep.mubr.bf16.mxu0 %v3932_v1 }
  0x7e   : > { %1566 = vmatmul.mubr.bf16.gmra.mrb[44].mxu1 %v3941_v8  ;;  %1437 = vmatmul.mubr.bf16.gmra.mrb[44].mxu0 %v3880_v6 }
  0x7f   : > { %1573 = vmatprep.mubr.bf16.mxu1 %v3812_v14  ;;  %1670 = vmatprep.mubr.bf16.mxu0 %v3762_v42  ;;  %v3412_v42 = vld [vmem:[%s4499_s1 + $0x210] sm:$0xff]  }
  0x86   : > { %1574 = vmatmul.mubr.bf16.gmra.mrb[48].mxu1 %v3950_v21  ;;  %1671 = vmatmul.mubr.bf16.vlgmr.msra.gmra.mrb[48].mxu0 %v3581_v56  ;;  %v3415_v56 = vld [vmem:[%s4499_s1 + $0x218] sm:$0xff]  }
  0x87   : > { %1581 = vmatprep.mubr.bf16.mxu1 %v3838_v32  ;;  %3245 = vmatpush3.bf16.msra.mxu0 %v3869_v61  ;;  %v655_v61 = vrot.slane %v3859_v0, 1  ;;  %v3989_v0 = vld [vmem:[%s3507_s14 + $0x90] sm:$0xff]  }
  0x88   : > { %1678 = vmatprep.mubr.bf16.mxu0 %v3804_v3  ;;  %3246 = vmatprep.subr.bf16.mxu0 %v3409_v47  ;;  %v660_v20 = vrot.slane %v3989_v0, 1 }
  0x89   : > { %v3981_v29 = vsel %vm623_vm1, %v654_v16, %v655_v61 }
  0x8a   : > { %v4011_v53 = vsel %vm623_vm1, %v660_v20, %v661_v52 }
  0x8b   : > { %3247 = vmatpush3.bf16.msra.mxu0 %v3409_v47  ;;  %v670_v47 = vrot.slane %v3659_v30, 1  ;;  %v702_v30 = vrot.slane %v700_v5, 1 }
  0x8c   : > { %3248 = vmatprep.subr.bf16.mxu0 %v3412_v42 }
  0x8e   : > { %1582 = vmatmul.mubr.bf16.gmra.mrb[52].mxu1 %v3966_v60  ;;  %1679 = vmatmul.mubr.bf16.gmra.mrb[52].mxu0 %v3633_v19 }
  0x8f   : > { %1589 = vmatprep.mubr.bf16.mxu1 %v3880_v6  ;;  %1686 = vmatprep.mubr.bf16.mxu0 %v3834_v31 }
  0x90   : > { %3249 = vmatpush3.bf16.msra.mxu0 %v3412_v42 }
  0x91   : > { %3250 = vmatprep.subr.bf16.mxu0 %v3415_v56 }
  0x94   : > { %3251 = vmatpush3.bf16.msra.mxu0 %v3415_v56 }
  0x95   : > { %3252 = vmatprep.subr.bf16.mxu0 %v3418_v28 }
  0x96   : > { %1590 = vmatmul.mubr.bf16.gmra.mrb[56].mxu1 %v3981_v29  ;;  %1687 = vmatmul.mubr.bf16.gmra.mrb[56].mxu0 %v3674_v48 }
  0x97   : > { %1597 = vmatprep.mubr.bf16.mxu1 %v3989_v0  ;;  %1694 = vmatprep.mubr.bf16.mxu0 %v3872_v55 }
  0x98   : > { %3253 = vmatpush3.bf16.msra.mxu0 %v3418_v28 }
  0x99   : > { %3254 = vmatprep.subr.bf16.mxu0 %v3419_v23 }
  0x9c   : > { %3255 = vmatpush3.bf16.msra.mxu0 %v3419_v23 }
  0x9d   : > { %3256 = vmatprep.subr.bf16.mxu0 %v3420_v39 }
  0x9e   : > { %1598 = vmatmul.mubr.bf16.gmra.mrb[60].mxu1 %v3999_v44  ;;  %1695 = vmatmul.mubr.bf16.gmra.mrb[60].mxu0 %v3729_v11 }
  0x9f   : > { %1605 = vmatprep.mubr.bf16.mxu1 %v3555_v38  ;;  %1702 = vmatprep.mubr.bf16.mxu0 %v3909_v33  ;;  %v4029_v38 = vsel %vm623_vm1, %v666_v18, %v667_v15 }
  0xa0   : > { %3257 = vmatpush3.bf16.msra.mxu0 %v3420_v39 }
  0xa1   : > { %3258 = vmatprep.subr.bf16.mxu0 %v3421_v49 }
  0xa4   : > { %3259 = vmatpush3.bf16.msra.mxu0 %v3421_v49 }
  0xa6   : > { %1606 = vmatmul.mubr.bf16.gmra.mrb[64].mxu1 %v4011_v53  ;;  %1703 = vmatmul.mubr.bf16.gmra.mrb[64].mxu0 %v3759_v41 }
  0xa7   : > { %1613 = vmatprep.mubr.bf16.mxu1 %v3613_v4  ;;  %1710 = vmatprep.mubr.bf16.mxu0 %v3929_v62  ;;  %v4041_v4 = vsel %vm623_vm1, %v669_v59, %v670_v47 }
  0xae   : > { %1614 = vmatmul.mubr.bf16.gmra.mrb[68].mxu1 %v4020_v2  ;;  %1711 = vmatmul.mubr.bf16.gmra.mrb[68].mxu0 %v3776_v50 }
  0xaf   : > { %1621 = vmatprep.mubr.bf16.mxu1 %v3646_v24  ;;  %1718 = vmatprep.mubr.bf16.mxu0 %v3941_v8  ;;  %v698_v24 = vshrl.u32 %v4032_v43, 16 }
  0xb6   : > { %1622 = vmatmul.mubr.bf16.gmra.mrb[72].mxu1 %v4029_v38  ;;  %1719 = vmatmul.mubr.bf16.gmra.mrb[72].mxu0 %v3808_v36 }
  0xb7   : > { %1629 = vmatprep.mubr.bf16.mxu1 %v4032_v43  ;;  %1726 = vmatprep.mubr.bf16.mxu0 %v3950_v21 }
  0xbe   : > { %1630 = vmatmul.mubr.bf16.gmra.mrb[76].mxu1 %v4041_v4  ;;  %1727 = vmatmul.mubr.bf16.gmra.mrb[76].mxu0 %v3848_v40 }
  0xbf   : > { %1831 = vmatprep.mubr.bf16.mxu1 %v3633_v19  ;;  %1734 = vmatprep.mubr.bf16.mxu0 %v3966_v60  ;;  %v710_v19 = vrot.slane %v4032_v43, 1 }
  0xc6   : > { %1832 = vmatmul.mubr.bf16.vlgmr.msra.gmra.mrb[80].mxu1 %v3604_v63  ;;  %1735 = vmatmul.mubr.bf16.gmra.mrb[80].mxu0 %v3884_v7  ;;  %v3422_v63 = vld [vmem:[%s3507_s14 + $0xc8] ss:$0 sps:$4 sm:$0x11]  }
  0xc7   : > { %1839 = vmatprep.mubr.bf16.mxu1 %v3674_v48  ;;  %1742 = vmatprep.mubr.bf16.mxu0 %v3981_v29  ;;  %v705_v48 = vshll.u32 %v3422_v63, 16 }
  0xce   : > { %1840 = vmatmul.mubr.bf16.gmra.mrb[84].mxu1 %v3639_v22  ;;  %1743 = vmatmul.mubr.bf16.gmra.mrb[84].mxu0 %v3917_v45  ;;  %v711_v22 = vrot.slane %v3422_v63, 1 }
  0xcf   : > { %1847 = vmatprep.mubr.bf16.mxu1 %v3729_v11  ;;  %1750 = vmatprep.mubr.bf16.mxu0 %v3999_v44  ;;  %v707_v11 = vrot.slane %v705_v48, 1 }
  0xd6   : > { %1848 = vmatmul.mubr.bf16.gmra.mrb[88].mxu1 %v3694_v54  ;;  %1751 = vmatmul.mubr.bf16.gmra.mrb[88].mxu0 %v3932_v1  ;;  %v4076_v54 = vsel %vm623_vm1, %v710_v19, %v711_v22 }
  0xd7   : > { %1855 = vmatprep.mubr.bf16.mxu1 %v3759_v41  ;;  %1758 = vmatprep.mubr.bf16.mxu0 %v4011_v53 }
  0xde   : > { %1856 = vmatmul.mubr.bf16.gmra.mrb[92].mxu1 %v3723_v9  ;;  %1759 = vmatmul.mubr.bf16.gmra.mrb[92].mxu0 %v3546_v35  ;;  %v703_v9 = vor.u32 %v702_v30, %v698_v24 }
  0xdf   : > { %1863 = vmatprep.mubr.bf16.mxu1 %v3776_v50  ;;  %1766 = vmatprep.mubr.bf16.mxu0 %v4020_v2 }
  0xe0   : > { %v4087_v56 = vsel %vm414_vm0, %v703_v9, %v707_v11 }
  0xe6   : > { %1864 = vmatmul.mubr.bf16.gmra.mrb[96].mxu1 %v3735_v17  ;;  %1767 = vmatmul.mubr.bf16.gmra.mrb[96].mxu0 %v3588_v58 }
  0xe7   : > { %1871 = vmatprep.mubr.bf16.mxu1 %v3808_v36  ;;  %1774 = vmatprep.mubr.bf16.mxu0 %v4029_v38 }
  0xee   : > { %1872 = vmatmul.mubr.bf16.gmra.mrb[100].mxu1 %v3766_v46  ;;  %1775 = vmatmul.mubr.bf16.gmra.mrb[100].mxu0 %v3649_v25 }
  0xef   : > { %1879 = vmatprep.mubr.bf16.mxu1 %v3848_v40  ;;  %1782 = vmatprep.mubr.bf16.mxu0 %v4041_v4 }
  0xf6   : > { %1880 = vmatmul.mubr.bf16.gmra.mrb[104].mxu1 %v3788_v57  ;;  %1783 = vmatmul.mubr.bf16.gmra.mrb[104].mxu0 %v3682_v51 }
  0xf7   : > { %1887 = vmatprep.mubr.bf16.mxu1 %v3884_v7  ;;  %1790 = vmatprep.mubr.bf16.mxu0 %v4076_v54 }
  0xf9   : > { %v2788_v17 = vpop.f32.mrb[0].mxu0  ;;  %v2860_v41 = vpop.f32.mrb[0].mxu1 }
  0xfa   : > { %v2789_v46 = vpop.f32.mrb[1].mxu0  ;;  %v2861_v50 = vpop.f32.mrb[1].mxu1 }
  0xfb   : > { %v4082_v36 = vadd.f32 %v2789_v46, %v2788_v17  ;;  %v4084_v40 = vadd.f32 %v2861_v50, %v2860_v41  ;;  %v2791_v26 = vpop.f32.mrb[2].mxu0  ;;  %v2863_v27 = vpop.f32.mrb[2].mxu1 }
  0xfc   : > { %v2792_v42 = vpop.f32.mrb[3].mxu0  ;;  %v2864_v57 = vpop.f32.mrb[3].mxu1 }
  0xfd   : > { %v4089_v7 = vadd.f32 %v2792_v42, %v2791_v26  ;;  %v4091_v16 = vadd.f32 %v2864_v57, %v2863_v27 }
  0xfe   : > { %1888 = vmatmul.mubr.bf16.gmra.mrb[108].mxu1 %v3812_v14  ;;  %1791 = vmatmul.mubr.bf16.gmra.mrb[108].mxu0 %v4087_v56 }
  0xff   : > { %1895 = vmatprep.mubr.bf16.mxu1 %v3917_v45  ;;  %3260 = vmatprep.mubr.bf16.mxu0 %v3804_v3 }
 0x101   : > { %v2794_v61 = vpop.f32.mrb[4].mxu0  ;;  %v2866_v28 = vpop.f32.mrb[4].mxu1 }
 0x102   : > { %v2795_v23 = vpop.f32.mrb[5].mxu0  ;;  %v2867_v10 = vpop.f32.mrb[5].mxu1 }
 0x103   : > { %v4097_v34 = vadd.f32 %v2795_v23, %v2794_v61  ;;  %v4099_v39 = vadd.f32 %v2867_v10, %v2866_v28  ;;  %v2797_v49 = vpop.f32.mrb[6].mxu0  ;;  %v2869_v20 = vpop.f32.mrb[6].mxu1 }
 0x104   : > { %v2798_v13 = vpop.f32.mrb[7].mxu0  ;;  %v2870_v52 = vpop.f32.mrb[7].mxu1 }
 0x105   : > { %v4101_v12 = vadd.f32 %v2798_v13, %v2797_v49  ;;  %v4103_v14 = vadd.f32 %v2870_v52, %v2869_v20 }
 0x106   : > { %1896 = vmatmul.mubr.bf16.gmra.mrb[112].mxu1 %v3838_v32  ;;  %3261 = vmatmul.mubr.bf16.vlgmr.msra.gmra.mrb[112].mxu0 %v3834_v31 }
 0x107   : > { %1903 = vmatprep.mubr.bf16.mxu1 %v3932_v1  ;;  %3264 = vmatprep.mubr.bf16.mxu0 %v3872_v55 }
 0x109   : > { %v2800_v3 = vpop.f32.mrb[8].mxu0  ;;  %v2872_v45 = vpop.f32.mrb[8].mxu1 }
 0x10a   : > { %v2801_v37 = vpop.f32.mrb[9].mxu0  ;;  %v2873_v18 = vpop.f32.mrb[9].mxu1 }
 0x10b   : > { %v4109_v15 = vadd.f32 %v2801_v37, %v2800_v3  ;;  %v4111_v59 = vadd.f32 %v2873_v18, %v2872_v45  ;;  %v2803_v47 = vpop.f32.mrb[10].mxu0  ;;  %v2875_v63 = vpop.f32.mrb[10].mxu1 }
 0x10c   : > { %v2804_v5 = vpop.f32.mrb[11].mxu0  ;;  %v2876_v19 = vpop.f32.mrb[11].mxu1 }
 0x10d   : > { %v4113_v22 = vadd.f32 %v2804_v5, %v2803_v47  ;;  %v4115_v32 = vadd.f32 %v2876_v19, %v2875_v63  ;;  %v3424_v5 = vld [vmem:[%s3507_s14 + $0xd4] ss:$0 sps:$4 sm:$0x11]  }
 0x10e   : > { %1904 = vmatmul.mubr.bf16.gmra.mrb[116].mxu1 %v3880_v6  ;;  %3265 = vmatmul.mubr.bf16.gmra.mrb[116].mxu0 %v3909_v33 }
 0x10f   : > { %1911 = vmatprep.mubr.bf16.mxu1 %v3546_v35  ;;  %3268 = vmatprep.mubr.bf16.mxu0 %v3929_v62 }
 0x111   : > { %v2806_v31 = vpop.f32.mrb[12].mxu0  ;;  %v2878_v55 = vpop.f32.mrb[12].mxu1 }
 0x112   : > { %v2807_v1 = vpop.f32.mrb[13].mxu0  ;;  %v2879_v24 = vpop.f32.mrb[13].mxu1 }
 0x113   : > { %v4121_v30 = vadd.f32 %v2807_v1, %v2806_v31  ;;  %v4123_v48 = vadd.f32 %v2879_v24, %v2878_v55  ;;  %v2809_v9 = vpop.f32.mrb[14].mxu0  ;;  %v2881_v11 = vpop.f32.mrb[14].mxu1 }
 0x114   : > { %v2810_v17 = vpop.f32.mrb[15].mxu0  ;;  %v2882_v41 = vpop.f32.mrb[15].mxu1 }
 0x115   : > { %v4125_v46 = vadd.f32 %v2810_v17, %v2809_v9  ;;  %v4127_v6 = vadd.f32 %v2882_v41, %v2881_v11 }
 0x116   : > { %1912 = vmatmul.mubr.bf16.gmra.mrb[120].mxu1 %v3989_v0  ;;  %3269 = vmatmul.mubr.bf16.gmra.mrb[120].mxu0 %v3941_v8 }
 0x117   : > { %1919 = vmatprep.mubr.bf16.mxu1 %v3588_v58  ;;  %3272 = vmatprep.mubr.bf16.mxu0 %v3950_v21  ;;  %v3427_v58 = vld [vmem:[%s3507_s14 + $0x9c] sm:$0xff]  }
 0x119   : > { %v2900_v35 = vpop.f32.mrb[16].mxu1  ;;  %v2812_v33 = vpop.f32.mrb[16].mxu0 }
 0x11a   : > { %v2901_v62 = vpop.f32.mrb[17].mxu1  ;;  %v2813_v50 = vpop.f32.mrb[17].mxu0 }
 0x11b   : > { %v2902_v26 = vadd.f32 %v2901_v62, %v2900_v35  ;;  %v2903_v27 = vpop.f32.mrb[18].mxu1  ;;  %v4133_v42 = vadd.f32 %v2813_v50, %v2812_v33  ;;  %v2815_v57 = vpop.f32.mrb[18].mxu0  ;;  %v3429_v50 = vld [vmem:[%s3507_s14 + $0xb4] sm:$0xff]  }
 0x11c   : > { %v2904_v61 = vpop.f32.mrb[19].mxu1  ;;  %v2816_v0 = vpop.f32.mrb[19].mxu0 }
 0x11d   : > { %v4136_v28 = vadd.f32 %v2902_v26, %v4082_v36  ;;  %v2905_v8 = vadd.f32 %v2904_v61, %v2903_v27  ;;  %v4138_v23 = vadd.f32 %v2816_v0, %v2815_v57 }
 0x11e   : > { %1920 = vmatmul.mubr.bf16.gmra.mrb[124].mxu1 %v3427_v58  ;;  %3273 = vmatmul.mubr.bf16.gmra.mrb[124].mxu0 %v3966_v60 }
 0x11f   : > { %v4142_v21 = vadd.f32 %v2905_v8, %v4089_v7  ;;  %1927 = vmatprep.mubr.bf16.mxu1 %v3649_v25  ;;  %3276 = vmatprep.mubr.bf16.mxu0 %v3981_v29  ;;  %v4150_v7 = vld [vmem:[%s3507_s14 + $0xcc] sm:$0xff]  }
 0x120   : > { %v3428_v29 = vld [vmem:[%s3507_s14 + $0xa8] sm:$0xff]   ;;  %v726_v19 = vshll.u32 %v4150_v7, 16  ;;  %s2644_s14 = sshll.u32 %s4504_s16, 7 }
 0x121   : > { %v2906_v10 = vpop.f32.mrb[20].mxu1  ;;  %v2818_v36 = vpop.f32.mrb[20].mxu0  ;;  %s4425_s28 = scalar_lea.vmem %s4500_s2, %s2644_s14 }
 0x122   : > { %v2907_v49 = vpop.f32.mrb[21].mxu1  ;;  %v2819_v20 = vpop.f32.mrb[21].mxu0  ;;  %v728_v41 = vrot.slane %v726_v19, 1 }
 0x123   : > { %v2908_v13 = vadd.f32 %v2907_v49, %v2906_v10  ;;  %v2909_v52 = vpop.f32.mrb[22].mxu1  ;;  %v4147_v3 = vadd.f32 %v2819_v20, %v2818_v36  ;;  %v2821_v45 = vpop.f32.mrb[22].mxu0 }
 0x124   : > { %v2910_v37 = vpop.f32.mrb[23].mxu1  ;;  %v2822_v25 = vpop.f32.mrb[23].mxu0 }
 0x125   : > { %v4153_v60 = vadd.f32 %v2908_v13, %v4097_v34  ;;  %v2911_v18 = vadd.f32 %v2910_v37, %v2909_v52  ;;  %v4155_v47 = vadd.f32 %v2822_v25, %v2821_v45  ;;  %v736_v45 = vrot.slane %v4150_v7, 1 }
 0x126   : > { %1928 = vmatmul.mubr.bf16.gmra.mrb[128].mxu1 %v3428_v29  ;;  %3277 = vmatmul.mubr.bf16.gmra.mrb[128].mxu0 %v3999_v44  ;;  %v724_v44 = vshrl.u32 %v4150_v7, 16  ;;  %v737_v37 = vrot.slane %v3424_v5, 1 }
 0x127   : > { %v4159_v63 = vadd.f32 %v2911_v18, %v4101_v12  ;;  %1935 = vmatprep.mubr.bf16.mxu1 %v3682_v51  ;;  %3280 = vmatprep.mubr.bf16.mxu0 %v4011_v53  ;;  %v731_v51 = vshll.u32 %v3424_v5, 16 }
 0x128   : > { %v729_v27 = vor.u32 %v728_v41, %v724_v44 }
 0x129   : > { %v2912_v34 = vpop.f32.mrb[24].mxu1  ;;  %v2824_v31 = vpop.f32.mrb[24].mxu0  ;;  %v733_v57 = vrot.slane %v731_v51, 1 }
 0x12a   : > { %v2913_v55 = vpop.f32.mrb[25].mxu1  ;;  %v2825_v1 = vpop.f32.mrb[25].mxu0 }
 0x12b   : > { %v2914_v24 = vadd.f32 %v2913_v55, %v2912_v34  ;;  %v2915_v9 = vpop.f32.mrb[26].mxu1  ;;  %v4166_v11 = vadd.f32 %v2825_v1, %v2824_v31  ;;  %v2827_v12 = vpop.f32.mrb[26].mxu0 }
 0x12c   : > { %v2916_v17 = vpop.f32.mrb[27].mxu1  ;;  %v2828_v35 = vpop.f32.mrb[27].mxu0 }
 0x12d   : > { %v4170_v53 = vadd.f32 %v2914_v24, %v4109_v15  ;;  %v2917_v33 = vadd.f32 %v2916_v17, %v2915_v9  ;;  %v4172_v62 = vadd.f32 %v2828_v35, %v2827_v12 }
 0x12e   : > { %1936 = vmatmul.mubr.bf16.gmra.mrb[132].mxu1 %v3429_v50  ;;  %3281 = vmatmul.mubr.bf16.gmra.mrb[132].mxu0 %v4020_v2 }
 0x12f   : > { %v4176_v26 = vadd.f32 %v2917_v33, %v4113_v22  ;;  %1943 = vmatprep.mubr.bf16.mxu1 %v4087_v56  ;;  %3284 = vmatprep.mubr.bf16.mxu0 %v4029_v38  ;;  %v734_v22 = vsel %vm414_vm0, %v729_v27, %v733_v57 }
 0x131   : > { %v2918_v61 = vpop.f32.mrb[28].mxu1  ;;  %v2830_v15 = vpop.f32.mrb[28].mxu0 }
 0x132   : > { %v2919_v0 = vpop.f32.mrb[29].mxu1  ;;  %v2831_v8 = vpop.f32.mrb[29].mxu0 }
 0x133   : > { %v2920_v58 = vadd.f32 %v2919_v0, %v2918_v61  ;;  %v2921_v10 = vpop.f32.mrb[30].mxu1  ;;  %v4181_v36 = vadd.f32 %v2831_v8, %v2830_v15  ;;  %v2833_v49 = vpop.f32.mrb[30].mxu0 }
 0x134   : > { %v2922_v20 = vpop.f32.mrb[31].mxu1  ;;  %v2834_v56 = vpop.f32.mrb[31].mxu0 }
 0x135   : > { %v4185_v2 = vadd.f32 %v2920_v58, %v4121_v30  ;;  %v2923_v13 = vadd.f32 %v2922_v20, %v2921_v10  ;;  %v4187_v38 = vadd.f32 %v2834_v56, %v2833_v49 }
 0x136   : > { %1944 = vmatmul.mubr.bf16.gmra.mrb[136].mxu1 %v4032_v43  ;;  %3285 = vmatmul.mubr.bf16.gmra.mrb[136].mxu0 %v4041_v4 }
 0x137   : > { %v4191_v52 = vadd.f32 %v2923_v13, %v4125_v46  ;;  %1951 = vmatprep.mubr.bf16.mxu1 %v734_v22  ;;  %3288 = vmatprep.mubr.bf16.mxu0 %v4076_v54  ;;  %v738_v46 = vsel %vm623_vm1, %v736_v45, %v737_v37 }
 0x139   : > { %v2924_v25 = vpop.f32.mrb[32].mxu1  ;;  %v2836_v30 = vpop.f32.mrb[32].mxu0 }
 0x13a   : > { %v2925_v18 = vpop.f32.mrb[33].mxu1  ;;  %v2837_v29 = vpop.f32.mrb[33].mxu0 }
 0x13b   : > { %v2926_v19 = vadd.f32 %v2925_v18, %v2924_v25  ;;  %v2927_v34 = vpop.f32.mrb[34].mxu1  ;;  %v2838_v31 = vadd.f32 %v2837_v29, %v2836_v30  ;;  %v2839_v55 = vpop.f32.mrb[34].mxu0 }
 0x13c   : > { %v2928_v43 = vpop.f32.mrb[35].mxu1  ;;  %v2840_v4 = vpop.f32.mrb[35].mxu0 }
 0x13d   : > { %v4198_v1 = vadd.f32 %v2926_v19, %v4133_v42  ;;  %v2929_v24 = vadd.f32 %v2928_v43, %v2927_v34  ;;  %v2841_v54 = vadd.f32 %v2840_v4, %v2839_v55 }
 0x13e   : > { %1952 = vmatmul.mubr.bf16.gmra.mrb[140].mxu1 %v4150_v7  ;;  %3289 = vmatmul.mubr.bf16.gmra.mrb[140].mxu0 %v738_v46 }
 0x13f   : > { %v4202_v5 = vadd.f32 %v2929_v24, %v4138_v23 }
 0x141   : > { %v2930_v9 = vpop.f32.mrb[36].mxu1  ;;  %v2842_v12 = vpop.f32.mrb[36].mxu0 }
 0x142   : > { %v2931_v17 = vpop.f32.mrb[37].mxu1  ;;  %v2843_v44 = vpop.f32.mrb[37].mxu0 }
 0x143   : > { %v2932_v41 = vadd.f32 %v2931_v17, %v2930_v9  ;;  %v2933_v51 = vpop.f32.mrb[38].mxu1  ;;  %v2844_v35 = vadd.f32 %v2843_v44, %v2842_v12  ;;  %v2845_v33 = vpop.f32.mrb[38].mxu0 }
 0x144   : > { %v2934_v50 = vpop.f32.mrb[39].mxu1  ;;  %v2846_v27 = vpop.f32.mrb[39].mxu0 }
 0x145   : > { %v4205_v42 = vadd.f32 %v2932_v41, %v4147_v3  ;;  %v2935_v57 = vadd.f32 %v2934_v50, %v2933_v51  ;;  %v2847_v61 = vadd.f32 %v2846_v27, %v2845_v33 }
 0x147   : > { %v4208_v7 = vadd.f32 %v2935_v57, %v4155_v47 }
 0x149   : > { %v2936_v23 = vpop.f32.mrb[40].mxu1  ;;  %v2848_v15 = vpop.f32.mrb[40].mxu0 }
 0x14a   : > { %v2937_v0 = vpop.f32.mrb[41].mxu1  ;;  %v2849_v8 = vpop.f32.mrb[41].mxu0 }
 0x14b   : > { %v2938_v58 = vadd.f32 %v2937_v0, %v2936_v23  ;;  %v2939_v10 = vpop.f32.mrb[42].mxu1  ;;  %v4210_v49 = vadd.f32 %v2849_v8, %v2848_v15  ;;  %v2851_v20 = vpop.f32.mrb[42].mxu0 }
 0x14c   : > { %v2940_v22 = vpop.f32.mrb[43].mxu1  ;;  %v2852_v3 = vpop.f32.mrb[43].mxu0 }
 0x14d   : > { %v4213_v56 = vadd.f32 %v2938_v58, %v4166_v11  ;;  %v2941_v13 = vadd.f32 %v2940_v22, %v2939_v10  ;;  %v2853_v45 = vadd.f32 %v2852_v3, %v2851_v20 }
 0x14f   : > { %v4216_v37 = vadd.f32 %v2941_v13, %v4172_v62 }
 0x151   : > { %v2942_v47 = vpop.f32.mrb[44].mxu1  ;;  %v2854_v25 = vpop.f32.mrb[44].mxu0 }
 0x152   : > { %v2943_v30 = vpop.f32.mrb[45].mxu1  ;;  %v2855_v18 = vpop.f32.mrb[45].mxu0 }
 0x153   : > { %v2944_v29 = vadd.f32 %v2943_v30, %v2942_v47  ;;  %v2945_v19 = vpop.f32.mrb[46].mxu1  ;;  %v4218_v34 = vadd.f32 %v2855_v18, %v2854_v25  ;;  %v2857_v55 = vpop.f32.mrb[46].mxu0 }
 0x154   : > { %v2946_v43 = vpop.f32.mrb[47].mxu1  ;;  %v2858_v11 = vpop.f32.mrb[47].mxu0 }
 0x155   : > { %v4221_v46 = vadd.f32 %v2944_v29, %v4181_v36  ;;  %v2947_v4 = vadd.f32 %v2946_v43, %v2945_v19  ;;  %v4223_v24 = vadd.f32 %v2858_v11, %v2857_v55 }
 0x157   : > { %v4226_v62 = vadd.f32 %v2947_v4, %v4187_v38 }
 0x159   : > { %v2948_v9 = vpop.f32.mrb[48].mxu1  ;;  %v3012_v12 = vpop.f32.mrb[48].mxu0 }
 0x15a   : > { %v2949_v17 = vpop.f32.mrb[49].mxu1  ;;  %v3013_v41 = vpop.f32.mrb[49].mxu0 }
 0x15b   : > { %v2950_v44 = vadd.f32 %v2949_v17, %v2948_v9  ;;  %v2951_v51 = vpop.f32.mrb[50].mxu1  ;;  %v3014_v33 = vadd.f32 %v3013_v41, %v3012_v12  ;;  %v3015_v50 = vpop.f32.mrb[50].mxu0 }
 0x15c   : > { %v2952_v27 = vpop.f32.mrb[51].mxu1  ;;  %v3016_v23 = vpop.f32.mrb[51].mxu0 }
 0x15d   : > { %v4228_v57 = vadd.f32 %v2950_v44, %v2838_v31  ;;  %v2953_v36 = vadd.f32 %v2952_v27, %v2951_v51  ;;  %v4231_v15 = vadd.f32 %v3014_v33, %v4136_v28  ;;  %v3017_v0 = vadd.f32 %v3016_v23, %v3015_v50 }
 0x15f   : > { %v4233_v8 = vadd.f32 %v2953_v36, %v2841_v54  ;;  %v4236_v38 = vadd.f32 %v3017_v0, %v4142_v21 }
 0x161   : > { %v2954_v58 = vpop.f32.mrb[52].mxu1  ;;  %v3018_v10 = vpop.f32.mrb[52].mxu0 }
 0x162   : > { %v2955_v20 = vpop.f32.mrb[53].mxu1  ;;  %v3019_v3 = vpop.f32.mrb[53].mxu0 }
 0x163   : > { %v2956_v22 = vadd.f32 %v2955_v20, %v2954_v58  ;;  %v2957_v13 = vpop.f32.mrb[54].mxu1  ;;  %v3020_v47 = vadd.f32 %v3019_v3, %v3018_v10  ;;  %v3021_v31 = vpop.f32.mrb[54].mxu0 }
 0x164   : > { %v2958_v25 = vpop.f32.mrb[55].mxu1  ;;  %v3022_v28 = vpop.f32.mrb[55].mxu0 }
 0x165   : > { %v4238_v30 = vadd.f32 %v2956_v22, %v2844_v35  ;;  %v2959_v18 = vadd.f32 %v2958_v25, %v2957_v13  ;;  %v4241_v29 = vadd.f32 %v3020_v47, %v4153_v60  ;;  %v3023_v54 = vadd.f32 %v3022_v28, %v3021_v31 }
 0x167   : > { %v4243_v19 = vadd.f32 %v2959_v18, %v2847_v61  ;;  %v4246_v21 = vadd.f32 %v3023_v54, %v4159_v63 }
 0x169   : > { %v2960_v55 = vpop.f32.mrb[56].mxu1  ;;  %v3024_v43 = vpop.f32.mrb[56].mxu0 }
 0x16a   : > { %v2961_v11 = vpop.f32.mrb[57].mxu1  ;;  %v3025_v9 = vpop.f32.mrb[57].mxu0 }
 0x16b   : > { %v2962_v4 = vadd.f32 %v2961_v11, %v2960_v55  ;;  %v2963_v12 = vpop.f32.mrb[58].mxu1  ;;  %v3026_v17 = vadd.f32 %v3025_v9, %v3024_v43  ;;  %v3027_v35 = vpop.f32.mrb[58].mxu0 }
 0x16c   : > { %v2964_v44 = vpop.f32.mrb[59].mxu1  ;;  %v3028_v51 = vpop.f32.mrb[59].mxu0 }
 0x16d   : > { %v4249_v41 = vadd.f32 %v2962_v4, %v4210_v49  ;;  %v2965_v60 = vadd.f32 %v2964_v44, %v2963_v12  ;;  %v4252_v61 = vadd.f32 %v3026_v17, %v4170_v53  ;;  %v3029_v33 = vadd.f32 %v3028_v51, %v3027_v35 }
 0x16f   : > { %v4254_v63 = vadd.f32 %v2965_v60, %v2853_v45  ;;  %v4257_v50 = vadd.f32 %v3029_v33, %v4176_v26 }
 0x171   : > { %v2966_v27 = vpop.f32.mrb[60].mxu1  ;;  %v3030_v36 = vpop.f32.mrb[60].mxu0 }
 0x172   : > { %v2967_v23 = vpop.f32.mrb[61].mxu1  ;;  %v3031_v58 = vpop.f32.mrb[61].mxu0 }
 0x173   : > { %v2968_v0 = vadd.f32 %v2967_v23, %v2966_v27  ;;  %v2969_v10 = vpop.f32.mrb[62].mxu1  ;;  %v3032_v20 = vadd.f32 %v3031_v58, %v3030_v36  ;;  %v3033_v49 = vpop.f32.mrb[62].mxu0 }
 0x174   : > { %v2970_v22 = vpop.f32.mrb[63].mxu1  ;;  %v3034_v13 = vpop.f32.mrb[63].mxu0 }
 0x175   : > { %v4260_v3 = vadd.f32 %v2968_v0, %v4218_v34  ;;  %v2971_v53 = vadd.f32 %v2970_v22, %v2969_v10  ;;  %v4263_v45 = vadd.f32 %v3032_v20, %v4185_v2  ;;  %v3035_v47 = vadd.f32 %v3034_v13, %v3033_v49 }
 0x177   : > { %v4266_v26 = vadd.f32 %v2971_v53, %v4223_v24  ;;  %v4269_v31 = vadd.f32 %v3035_v47, %v4191_v52 }
 0x179   : > { %v2972_v25 = vpop.f32.mrb[64].mxu1  ;;  %v3036_v18 = vpop.f32.mrb[64].mxu0 }
 0x17a   : > { %v2973_v28 = vpop.f32.mrb[65].mxu1  ;;  %v3037_v55 = vpop.f32.mrb[65].mxu0 }
 0x17b   : > { %v2974_v54 = vadd.f32 %v2973_v28, %v2972_v25  ;;  %v2975_v43 = vpop.f32.mrb[66].mxu1  ;;  %v3038_v34 = vadd.f32 %v3037_v55, %v3036_v18  ;;  %v3039_v11 = vpop.f32.mrb[66].mxu0 }
 0x17c   : > { %v2976_v4 = vpop.f32.mrb[67].mxu1  ;;  %v3040_v12 = vpop.f32.mrb[67].mxu0 }
 0x17d   : > { %v4272_v9 = vadd.f32 %v2974_v54, %v4084_v40  ;;  %v2977_v2 = vadd.f32 %v2976_v4, %v2975_v43  ;;  %v4275_v24 = vadd.f32 %v3038_v34, %v4198_v1  ;;  %v3041_v17 = vadd.f32 %v3040_v12, %v3039_v11 }
 0x17f   : > { %v4278_v52 = vadd.f32 %v2977_v2, %v4091_v16  ;;  %v4281_v35 = vadd.f32 %v3041_v17, %v4202_v5 }
 0x181   : > { %v2978_v44 = vpop.f32.mrb[68].mxu1  ;;  %v3042_v60 = vpop.f32.mrb[68].mxu0 }
 0x182   : > { %v2979_v51 = vpop.f32.mrb[69].mxu1  ;;  %v3043_v27 = vpop.f32.mrb[69].mxu0 }
 0x183   : > { %v2980_v33 = vadd.f32 %v2979_v51, %v2978_v44  ;;  %v2981_v36 = vpop.f32.mrb[70].mxu1  ;;  %v3044_v40 = vadd.f32 %v3043_v27, %v3042_v60  ;;  %v3045_v23 = vpop.f32.mrb[70].mxu0 }
 0x184   : > { %v2982_v0 = vpop.f32.mrb[71].mxu1  ;;  %v3046_v10 = vpop.f32.mrb[71].mxu0 }
 0x185   : > { %v4284_v58 = vadd.f32 %v2980_v33, %v4099_v39  ;;  %v2983_v1 = vadd.f32 %v2982_v0, %v2981_v36  ;;  %v4287_v16 = vadd.f32 %v3044_v40, %v4205_v42  ;;  %v3047_v20 = vadd.f32 %v3046_v10, %v3045_v23 }
 0x187   : > { %v4290_v5 = vadd.f32 %v2983_v1, %v4103_v14  ;;  %v4293_v49 = vadd.f32 %v3047_v20, %v4208_v7 }
 0x189   : > { %v2984_v22 = vpop.f32.mrb[72].mxu1  ;;  %v3048_v53 = vpop.f32.mrb[72].mxu0 }
 0x18a   : > { %v2985_v13 = vpop.f32.mrb[73].mxu1  ;;  %v3049_v25 = vpop.f32.mrb[73].mxu0 }
 0x18b   : > { %v2986_v47 = vadd.f32 %v2985_v13, %v2984_v22  ;;  %v2987_v18 = vpop.f32.mrb[74].mxu1  ;;  %v3050_v39 = vadd.f32 %v3049_v25, %v3048_v53  ;;  %v3051_v28 = vpop.f32.mrb[74].mxu0 }
 0x18c   : > { %v2988_v54 = vpop.f32.mrb[75].mxu1  ;;  %v3052_v43 = vpop.f32.mrb[75].mxu0 }
 0x18d   : > { %v4296_v55 = vadd.f32 %v2986_v47, %v4111_v59  ;;  %v2989_v42 = vadd.f32 %v2988_v54, %v2987_v18  ;;  %v4299_v14 = vadd.f32 %v3050_v39, %v4213_v56  ;;  %v3053_v34 = vadd.f32 %v3052_v43, %v3051_v28 }
 0x18f   : > { %v4302_v7 = vadd.f32 %v2989_v42, %v4115_v32  ;;  %v4305_v11 = vadd.f32 %v3053_v34, %v4216_v37 }
 0x191   : > { %v2990_v4 = vpop.f32.mrb[76].mxu1  ;;  %v3054_v2 = vpop.f32.mrb[76].mxu0 }
 0x192   : > { %v2991_v12 = vpop.f32.mrb[77].mxu1  ;;  %v3055_v44 = vpop.f32.mrb[77].mxu0 }
 0x193   : > { %v2992_v17 = vadd.f32 %v2991_v12, %v2990_v4  ;;  %v2993_v60 = vpop.f32.mrb[78].mxu1  ;;  %v3056_v59 = vadd.f32 %v3055_v44, %v3054_v2  ;;  %v3057_v51 = vpop.f32.mrb[78].mxu0 }
 0x194   : > { %v2994_v33 = vpop.f32.mrb[79].mxu1  ;;  %v3058_v36 = vpop.f32.mrb[79].mxu0 }
 0x195   : > { %v4308_v27 = vadd.f32 %v2992_v17, %v4123_v48  ;;  %v2995_v56 = vadd.f32 %v2994_v33, %v2993_v60  ;;  %v4311_v32 = vadd.f32 %v3056_v59, %v4221_v46  ;;  %v3059_v40 = vadd.f32 %v3058_v36, %v3057_v51 }
 0x197   : > { %v4314_v37 = vadd.f32 %v2995_v56, %v4127_v6  ;;  %v4317_v23 = vadd.f32 %v3059_v40, %v4226_v62 }
 0x199   : > { %v3124_v0 = vpop.f32.mrb[80].mxu1  ;;  %v3060_v1 = vpop.f32.mrb[80].mxu0 }
 0x19a   : > { %v3125_v10 = vpop.f32.mrb[81].mxu1  ;;  %v3061_v20 = vpop.f32.mrb[81].mxu0 }
 0x19b   : > { %v3126_v22 = vadd.f32 %v3125_v10, %v3124_v0  ;;  %v3127_v53 = vpop.f32.mrb[82].mxu1  ;;  %v3062_v48 = vadd.f32 %v3061_v20, %v3060_v1  ;;  %v3063_v13 = vpop.f32.mrb[82].mxu0 }
 0x19c   : > { %v3128_v47 = vpop.f32.mrb[83].mxu1  ;;  %v3064_v25 = vpop.f32.mrb[83].mxu0 }
 0x19d   : > { %v3129_v18 = vadd.f32 %v3128_v47, %v3127_v53  ;;  %v4320_v46 = vadd.f32 %v3126_v22, %v4231_v15  ;;  %v4323_v6 = vadd.f32 %v3062_v48, %v4228_v57  ;;  %v3065_v39 = vadd.f32 %v3064_v25, %v3063_v13 }
 0x19f   : > { %v4326_v62 = vadd.f32 %v3129_v18, %v4236_v38  ;;  %v4329_v28 = vadd.f32 %v3065_v39, %v4233_v8 }
 0x1a1   : > { %v3130_v54 = vpop.f32.mrb[84].mxu1  ;;  %v3066_v42 = vpop.f32.mrb[84].mxu0 }
 0x1a2   : > { %v3131_v43 = vpop.f32.mrb[85].mxu1  ;;  %v3067_v34 = vpop.f32.mrb[85].mxu0 }
 0x1a3   : > { %v3132_v4 = vadd.f32 %v3131_v43, %v3130_v54  ;;  %v3133_v2 = vpop.f32.mrb[86].mxu1  ;;  %v3068_v12 = vadd.f32 %v3067_v34, %v3066_v42  ;;  %v3069_v17 = vpop.f32.mrb[86].mxu0 }
 0x1a4   : > { %v3134_v15 = vpop.f32.mrb[87].mxu1  ;;  %v3070_v44 = vpop.f32.mrb[87].mxu0 }
 0x1a5   : > { %v3135_v60 = vadd.f32 %v3134_v15, %v3133_v2  ;;  %v4332_v57 = vadd.f32 %v3132_v4, %v4241_v29  ;;  %v4335_v38 = vadd.f32 %v3068_v12, %v4238_v30  ;;  %v3071_v59 = vadd.f32 %v3070_v44, %v3069_v17 }
 0x1a7   : > { %v4338_v8 = vadd.f32 %v3135_v60, %v4246_v21  ;;  %v4341_v51 = vadd.f32 %v3071_v59, %v4243_v19 }
 0x1a9   : > { %v3136_v33 = vpop.f32.mrb[88].mxu1  ;;  %v3072_v56 = vpop.f32.mrb[88].mxu0 }
 0x1aa   : > { %v3137_v36 = vpop.f32.mrb[89].mxu1  ;;  %v3073_v40 = vpop.f32.mrb[89].mxu0 }
 0x1ab   : > { %v3138_v0 = vadd.f32 %v3137_v36, %v3136_v33  ;;  %v3139_v1 = vpop.f32.mrb[90].mxu1  ;;  %v3074_v10 = vadd.f32 %v3073_v40, %v3072_v56  ;;  %v3075_v20 = vpop.f32.mrb[90].mxu0 }
 0x1ac   : > { %v3140_v29 = vpop.f32.mrb[91].mxu1  ;;  %v3076_v22 = vpop.f32.mrb[91].mxu0 }
 0x1ad   : > { %v3141_v53 = vadd.f32 %v3140_v29, %v3139_v1  ;;  %v4344_v30 = vadd.f32 %v3138_v0, %v4252_v61  ;;  %v4347_v21 = vadd.f32 %v3074_v10, %v4249_v41  ;;  %v3077_v48 = vadd.f32 %v3076_v22, %v3075_v20 }
 0x1af   : > { %v4350_v19 = vadd.f32 %v3141_v53, %v4257_v50  ;;  %v4353_v13 = vadd.f32 %v3077_v48, %v4254_v63 }
 0x1b1   : > { %v3142_v47 = vpop.f32.mrb[92].mxu1  ;;  %v3078_v25 = vpop.f32.mrb[92].mxu0 }
 0x1b2   : > { %v3143_v18 = vpop.f32.mrb[93].mxu1  ;;  %v3079_v39 = vpop.f32.mrb[93].mxu0 }
 0x1b3   : > { %v3144_v54 = vadd.f32 %v3143_v18, %v3142_v47  ;;  %v3145_v42 = vpop.f32.mrb[94].mxu1  ;;  %v3080_v43 = vadd.f32 %v3079_v39, %v3078_v25  ;;  %v3081_v34 = vpop.f32.mrb[94].mxu0 }
 0x1b4   : > { %v3146_v61 = vpop.f32.mrb[95].mxu1  ;;  %v3082_v4 = vpop.f32.mrb[95].mxu0 }
 0x1b5   : > { %v3147_v2 = vadd.f32 %v3146_v61, %v3145_v42  ;;  %v4356_v41 = vadd.f32 %v3144_v54, %v4263_v45  ;;  %v4359_v50 = vadd.f32 %v3080_v43, %v4260_v3  ;;  %v3083_v12 = vadd.f32 %v3082_v4, %v3081_v34 }
 0x1b7   : > { %v4362_v63 = vadd.f32 %v3147_v2, %v4269_v31  ;;  %v4365_v17 = vadd.f32 %v3083_v12, %v4266_v26 }
 0x1b9   : > { %v3148_v15 = vpop.f32.mrb[96].mxu1  ;;  %v3084_v44 = vpop.f32.mrb[96].mxu0 }
 0x1ba   : > { %v3149_v60 = vpop.f32.mrb[97].mxu1  ;;  %v3085_v59 = vpop.f32.mrb[97].mxu0 }
 0x1bb   : > { %v3150_v33 = vadd.f32 %v3149_v60, %v3148_v15  ;;  %v3151_v56 = vpop.f32.mrb[98].mxu1  ;;  %v3086_v36 = vadd.f32 %v3085_v59, %v3084_v44  ;;  %v3087_v40 = vpop.f32.mrb[98].mxu0 }
 0x1bc   : > { %v3152_v45 = vpop.f32.mrb[99].mxu1  ;;  %v3088_v0 = vpop.f32.mrb[99].mxu0 }
 0x1bd   : > { %v3153_v1 = vadd.f32 %v3152_v45, %v3151_v56  ;;  %v4368_v3 = vadd.f32 %v3150_v33, %v4275_v24  ;;  %v4371_v31 = vadd.f32 %v3086_v36, %v4272_v9  ;;  %v3089_v10 = vadd.f32 %v3088_v0, %v3087_v40 }
 0x1bf   : > { %v4374_v26 = vadd.f32 %v3153_v1, %v4281_v35  ;;  %v4377_v20 = vadd.f32 %v3089_v10, %v4278_v52 }
 0x1c1   : > { %v3154_v29 = vpop.f32.mrb[100].mxu1  ;;  %v3090_v22 = vpop.f32.mrb[100].mxu0 }
 0x1c2   : > { %v3155_v53 = vpop.f32.mrb[101].mxu1  ;;  %v3091_v48 = vpop.f32.mrb[101].mxu0 }
 0x1c3   : > { %v3156_v47 = vadd.f32 %v3155_v53, %v3154_v29  ;;  %v3157_v25 = vpop.f32.mrb[102].mxu1  ;;  %v3092_v18 = vadd.f32 %v3091_v48, %v3090_v22  ;;  %v3093_v39 = vpop.f32.mrb[102].mxu0 }
 0x1c4   : > { %v3158_v24 = vpop.f32.mrb[103].mxu1  ;;  %v3094_v54 = vpop.f32.mrb[103].mxu0 }
 0x1c5   : > { %v3159_v42 = vadd.f32 %v3158_v24, %v3157_v25  ;;  %v4380_v9 = vadd.f32 %v3156_v47, %v4287_v16  ;;  %v4383_v35 = vadd.f32 %v3092_v18, %v4284_v58  ;;  %v3095_v43 = vadd.f32 %v3094_v54, %v3093_v39 }
 0x1c7   : > { %v4386_v52 = vadd.f32 %v3159_v42, %v4293_v49  ;;  %v4389_v34 = vadd.f32 %v3095_v43, %v4290_v5 }
 0x1c9   : > { %v3160_v61 = vpop.f32.mrb[104].mxu1  ;;  %v3096_v4 = vpop.f32.mrb[104].mxu0 }
 0x1ca   : > { %v3161_v2 = vpop.f32.mrb[105].mxu1  ;;  %v3097_v12 = vpop.f32.mrb[105].mxu0 }
 0x1cb   : > { %v3162_v15 = vadd.f32 %v3161_v2, %v3160_v61  ;;  %v3163_v44 = vpop.f32.mrb[106].mxu1  ;;  %v3098_v60 = vadd.f32 %v3097_v12, %v3096_v4  ;;  %v3099_v59 = vpop.f32.mrb[106].mxu0 }
 0x1cc   : > { %v3164_v16 = vpop.f32.mrb[107].mxu1  ;;  %v3100_v33 = vpop.f32.mrb[107].mxu0 }
 0x1cd   : > { %v3165_v56 = vadd.f32 %v3164_v16, %v3163_v44  ;;  %v4392_v58 = vadd.f32 %v3162_v15, %v4299_v14  ;;  %v4395_v49 = vadd.f32 %v3098_v60, %v4296_v55  ;;  %v3101_v36 = vadd.f32 %v3100_v33, %v3099_v59 }
 0x1cf   : > { %v4398_v5 = vadd.f32 %v3165_v56, %v4305_v11  ;;  %v4401_v40 = vadd.f32 %v3101_v36, %v4302_v7 }
 0x1d1   : > { %v3166_v45 = vpop.f32.mrb[108].mxu1  ;;  %v3102_v0 = vpop.f32.mrb[108].mxu0 }
 0x1d2   : > { %v3167_v1 = vpop.f32.mrb[109].mxu1  ;;  %v3103_v10 = vpop.f32.mrb[109].mxu0 }
 0x1d3   : > { %v3168_v29 = vadd.f32 %v3167_v1, %v3166_v45  ;;  %v3169_v22 = vpop.f32.mrb[110].mxu1  ;;  %v3104_v53 = vadd.f32 %v3103_v10, %v3102_v0  ;;  %v3105_v48 = vpop.f32.mrb[110].mxu0 }
 0x1d4   : > { %v3170_v14 = vpop.f32.mrb[111].mxu1  ;;  %v3106_v47 = vpop.f32.mrb[111].mxu0 }
 0x1d5   : > { %v3171_v55 = vadd.f32 %v3170_v14, %v3169_v22  ;;  %v4404_v25 = vadd.f32 %v3168_v29, %v4311_v32  ;;  %v4407_v11 = vadd.f32 %v3104_v53, %v4308_v27  ;;  %v3107_v7 = vadd.f32 %v3106_v47, %v3105_v48 }
 0x1d7   : > { %v4410_v18 = vadd.f32 %v3171_v55, %v4317_v23  ;;  %v4413_v39 = vadd.f32 %v3107_v7, %v4314_v37 }
 0x1d9   : > { %v3172_v24 = vpop.f32.mrb[112].mxu1  ;;  %v3262_v54 = vpop.f32.mrb[112].mxu0 }
 0x1da   : > { %v3173_v42 = vpop.f32.mrb[113].mxu1  ;;  %v2003_v43 = vadd.f32 %v3262_v54, %v4332_v57  ;;  %v1994_v4 = vpop.f32.mrb[113].mxu0 }
 0x1db   : > { %v3174_v61 = vadd.f32 %v3173_v42, %v3172_v24  ;;  %v3175_v2 = vpop.f32.mrb[114].mxu1  ;;  %v1995_v32 = vadd.f32 %v1994_v4, %v4320_v46  ;;  %v3263_v27 = vpop.f32.mrb[114].mxu0 }
 0x1dc   : > { %v3176_v12 = vpop.f32.mrb[115].mxu1  ;;  %v2006_v15 = vadd.f32 %v3263_v27, %v4338_v8  ;;  %v1997_v44 = vpop.f32.mrb[115].mxu0  ;;  %v2321_v56 = vmul.f32 %v2003_v43, %v2003_v43 }
 0x1dd   : > { %v3177_v23 = vadd.f32 %v3176_v12, %v3175_v2  ;;  %v4420_v37 = vadd.f32 %v3174_v61, %v4323_v6  ;;  %v1998_v57 = vadd.f32 %v1997_v44, %v4326_v62  ;;  %v2319_v59 = vmul.f32 %v1995_v32, %v1995_v32 }
 0x1de   : > { %v2685_v60 = vpack.c.bf16 %v2006_v15, %v2003_v43  ;;  %v2322_v53 = vmul.f32 %v2006_v15, %v2006_v15 }
 0x1df   : > { %v4429_v46 = vadd.f32 %v3177_v23, %v4329_v28  ;;  %v2680_v8 = vpack.c.bf16 %v1998_v57, %v1995_v32  ;;  %v2281_v16 = vadd.f32 %v1998_v57, %v1995_v32  ;;  %v2320_v33 = vmul.f32 %v1998_v57, %v1998_v57 }
 0x1e0   : > { %2757 = vst [vmem:[%s4425_s28 + $0x8] sm:$0xff] %v2685_v60  }
 0x1e1   : > { %v3178_v6 = vpop.f32.mrb[116].mxu1  ;;  %2681 = vst [vmem:[%s4425_s28] sm:$0xff] %v2680_v8   ;;  %v2282_v36 = vadd.f32 %v2281_v16, %v2003_v43  ;;  %v2351_v45 = vadd.f32 %v2320_v33, %v2319_v59  ;;  %v3266_v0 = vpop.f32.mrb[116].mxu0 }
 0x1e2   : > { %v3179_v1 = vpop.f32.mrb[117].mxu1  ;;  %v2019_v10 = vadd.f32 %v3266_v0, %v4356_v41  ;;  %v2010_v62 = vpop.f32.mrb[117].mxu0 }
 0x1e3   : > { %v3180_v29 = vadd.f32 %v3179_v1, %v3178_v6  ;;  %v3181_v22 = vpop.f32.mrb[118].mxu1  ;;  %v2352_v28 = vadd.f32 %v2351_v45, %v2321_v56  ;;  %v2011_v48 = vadd.f32 %v2010_v62, %v4344_v30  ;;  %v2283_v14 = vadd.f32 %v2282_v36, %v2006_v15  ;;  %v3267_v47 = vpop.f32.mrb[118].mxu0 }
 0x1e4   : > { %v3182_v55 = vpop.f32.mrb[119].mxu1  ;;  %v2022_v7 = vadd.f32 %v3267_v47, %v4362_v63  ;;  %v2013_v54 = vpop.f32.mrb[119].mxu0  ;;  %v2325_v23 = vmul.f32 %v2019_v10, %v2019_v10 }
 0x1e5   : > { %v3183_v24 = vadd.f32 %v3182_v55, %v3181_v22  ;;  %v4437_v42 = vadd.f32 %v3180_v29, %v4335_v38  ;;  %v2284_v41 = vadd.f32 %v2283_v14, %v2011_v48  ;;  %v2323_v43 = vmul.f32 %v2011_v48, %v2011_v48 }
 0x1e6   : > { %v2353_v61 = vadd.f32 %v2352_v28, %v2322_v53  ;;  %v2014_v4 = vadd.f32 %v2013_v54, %v4350_v19  ;;  %v2695_v2 = vpack.c.bf16 %v2022_v7, %v2019_v10  ;;  %v2326_v33 = vmul.f32 %v2022_v7, %v2022_v7 }
 0x1e7   : > { %v4441_v30 = vadd.f32 %v3183_v24, %v4341_v51 }
 0x1e8   : > { %v2354_v32 = vadd.f32 %v2353_v61, %v2323_v43  ;;  %v2690_v27 = vpack.c.bf16 %v2014_v4, %v2011_v48  ;;  %v2285_v12 = vadd.f32 %v2284_v41, %v2014_v4  ;;  %v2324_v15 = vmul.f32 %v2014_v4, %v2014_v4  ;;  %2759 = vst [vmem:[%s4425_s28 + $0x18] sm:$0xff] %v2695_v2  }
 0x1e9   : > { %v3184_v63 = vpop.f32.mrb[120].mxu1  ;;  %v3270_v57 = vpop.f32.mrb[120].mxu0 }
 0x1ea   : > { %2758 = vst [vmem:[%s4425_s28 + $0x10] sm:$0xff] %v2690_v27   ;;  %v2286_v44 = vadd.f32 %v2285_v12, %v2019_v10  ;;  %v2355_v38 = vadd.f32 %v2354_v32, %v2324_v15  ;;  %v3185_v60 = vpop.f32.mrb[121].mxu1  ;;  %v2035_v59 = vadd.f32 %v3270_v57, %v4380_v9  ;;  %v2026_v19 = vpop.f32.mrb[121].mxu0 }
 0x1eb   : > { %v3186_v8 = vadd.f32 %v3185_v60, %v3184_v63  ;;  %v3187_v16 = vpop.f32.mrb[122].mxu1  ;;  %v2027_v6 = vadd.f32 %v2026_v19, %v4368_v3  ;;  %v3271_v36 = vpop.f32.mrb[122].mxu0 }
 0x1ec   : > { %v2356_v51 = vadd.f32 %v2355_v38, %v2325_v23  ;;  %v2287_v56 = vadd.f32 %v2286_v44, %v2022_v7  ;;  %v3188_v45 = vpop.f32.mrb[123].mxu1  ;;  %v2038_v0 = vadd.f32 %v3271_v36, %v4386_v52  ;;  %v2029_v10 = vpop.f32.mrb[123].mxu0  ;;  %v2329_v7 = vmul.f32 %v2035_v59, %v2035_v59 }
 0x1ed   : > { %v3189_v1 = vadd.f32 %v3188_v45, %v3187_v16  ;;  %v4449_v29 = vadd.f32 %v3186_v8, %v4347_v21  ;;  %v2327_v62 = vmul.f32 %v2027_v6, %v2027_v6  ;;  %v2030_v53 = vadd.f32 %v2029_v10, %v4374_v26 }
 0x1ee   : > { %v2288_v9 = vadd.f32 %v2287_v56, %v2027_v6  ;;  %v2357_v22 = vadd.f32 %v2356_v51, %v2326_v33  ;;  %v2705_v28 = vpack.c.bf16 %v2038_v0, %v2035_v59  ;;  %v2330_v2 = vmul.f32 %v2038_v0, %v2038_v0 }
 0x1ef   : > { %v4453_v3 = vadd.f32 %v3189_v1, %v4353_v13  ;;  %v2700_v14 = vpack.c.bf16 %v2030_v53, %v2027_v6  ;;  %v2328_v55 = vmul.f32 %v2030_v53, %v2030_v53 }
 0x1f0   : > { %v2358_v48 = vadd.f32 %v2357_v22, %v2327_v62  ;;  %v2289_v47 = vadd.f32 %v2288_v9, %v2030_v53  ;;  %2761 = vst [vmem:[%s4425_s28 + $0x28] sm:$0xff] %v2705_v28  }
 0x1f1   : > { %v3190_v52 = vpop.f32.mrb[124].mxu1  ;;  %2760 = vst [vmem:[%s4425_s28 + $0x20] sm:$0xff] %v2700_v14   ;;  %v3274_v54 = vpop.f32.mrb[124].mxu0 }
 0x1f2   : > { %v2290_v24 = vadd.f32 %v2289_v47, %v2035_v59  ;;  %v2359_v21 = vadd.f32 %v2358_v48, %v2328_v55  ;;  %v3191_v41 = vpop.f32.mrb[125].mxu1  ;;  %v2051_v43 = vadd.f32 %v3274_v54, %v4404_v25  ;;  %v2042_v26 = vpop.f32.mrb[125].mxu0 }
 0x1f3   : > { %v3192_v61 = vadd.f32 %v3191_v41, %v3190_v52  ;;  %v3193_v4 = vpop.f32.mrb[126].mxu1  ;;  %v2043_v32 = vadd.f32 %v2042_v26, %v4392_v58  ;;  %v3275_v12 = vpop.f32.mrb[126].mxu0 }
 0x1f4   : > { %v2360_v13 = vadd.f32 %v2359_v21, %v2329_v7  ;;  %v2291_v27 = vadd.f32 %v2290_v24, %v2038_v0  ;;  %v3194_v15 = vpop.f32.mrb[127].mxu1  ;;  %v2054_v63 = vadd.f32 %v3275_v12, %v4410_v18  ;;  %v2045_v44 = vpop.f32.mrb[127].mxu0  ;;  %v2333_v18 = vmul.f32 %v2051_v43, %v2051_v43 }
 0x1f5   : > { %v3195_v23 = vadd.f32 %v3194_v15, %v3193_v4  ;;  %v1922_v38 = vadd.f32 %v3192_v61, %v4359_v50  ;;  %v2331_v25 = vmul.f32 %v2043_v32, %v2043_v32  ;;  %v2046_v59 = vadd.f32 %v2045_v44, %v4398_v5 }
 0x1f6   : > { %v2292_v57 = vadd.f32 %v2291_v27, %v2043_v32  ;;  %v2361_v60 = vadd.f32 %v2360_v13, %v2330_v2  ;;  %v2715_v8 = vpack.c.bf16 %v2054_v63, %v2051_v43  ;;  %v2334_v9 = vmul.f32 %v2054_v63, %v2054_v63 }
 0x1f7   : > { %v1925_v19 = vadd.f32 %v3195_v23, %v4365_v17  ;;  %v2710_v16 = vpack.c.bf16 %v2046_v59, %v2043_v32  ;;  %v2332_v51 = vmul.f32 %v2046_v59, %v2046_v59 }
 0x1f8   : > { %v2362_v58 = vadd.f32 %v2361_v60, %v2331_v25  ;;  %v2293_v33 = vadd.f32 %v2292_v57, %v2046_v59  ;;  %2763 = vst [vmem:[%s4425_s28 + $0x38] sm:$0xff] %v2715_v8  }
 0x1f9   : > { %v3196_v6 = vpop.f32.mrb[128].mxu1  ;;  %2762 = vst [vmem:[%s4425_s28 + $0x30] sm:$0xff] %v2710_v16   ;;  %v3278_v45 = vpop.f32.mrb[128].mxu0 }
 0x1fa   : > { %v2294_v56 = vadd.f32 %v2293_v33, %v2051_v43  ;;  %v2363_v36 = vadd.f32 %v2362_v58, %v2332_v51  ;;  %v3197_v50 = vpop.f32.mrb[129].mxu1  ;;  %v2067_v0 = vadd.f32 %v3278_v45, %v4437_v42  ;;  %v2058_v10 = vpop.f32.mrb[129].mxu0 }
 0x1fb   : > { %v3198_v1 = vadd.f32 %v3197_v50, %v3196_v6  ;;  %v3199_v5 = vpop.f32.mrb[130].mxu1  ;;  %v2059_v17 = vadd.f32 %v2058_v10, %v4420_v37  ;;  %v3279_v53 = vpop.f32.mrb[130].mxu0 }
 0x1fc   : > { %v2364_v62 = vadd.f32 %v2363_v36, %v2333_v18  ;;  %v2295_v22 = vadd.f32 %v2294_v56, %v2054_v63  ;;  %v3200_v28 = vpop.f32.mrb[131].mxu1  ;;  %v2070_v48 = vadd.f32 %v3279_v53, %v4441_v30  ;;  %v2061_v47 = vpop.f32.mrb[131].mxu0  ;;  %v2337_v30 = vmul.f32 %v2067_v0, %v2067_v0 }
 0x1fd   : > { %v3201_v14 = vadd.f32 %v3200_v28, %v3199_v5  ;;  %v1930_v55 = vadd.f32 %v3198_v1, %v4371_v31  ;;  %v2335_v42 = vmul.f32 %v2059_v17, %v2059_v17  ;;  %v2062_v24 = vadd.f32 %v2061_v47, %v4429_v46 }
 0x1fe   : > { %v2296_v52 = vadd.f32 %v2295_v22, %v2059_v17  ;;  %v2365_v7 = vadd.f32 %v2364_v62, %v2334_v9  ;;  %v2725_v21 = vpack.c.bf16 %v2070_v48, %v2067_v0  ;;  %v2338_v46 = vmul.f32 %v2070_v48, %v2070_v48 }
 0x1ff   : > { %v1933_v54 = vadd.f32 %v3201_v14, %v4377_v20  ;;  %v2720_v41 = vpack.c.bf16 %v2062_v24, %v2059_v17  ;;  %v2336_v61 = vmul.f32 %v2062_v24, %v2062_v24 }
 0x200   : > { %v2366_v37 = vadd.f32 %v2365_v7, %v2335_v42  ;;  %v2297_v43 = vadd.f32 %v2296_v52, %v2062_v24  ;;  %2765 = vst [vmem:[%s4425_s28 + $0x48] sm:$0xff] %v2725_v21  }
 0x201   : > { %v3202_v26 = vpop.f32.mrb[132].mxu1  ;;  %2764 = vst [vmem:[%s4425_s28 + $0x40] sm:$0xff] %v2720_v41   ;;  %v3282_v13 = vpop.f32.mrb[132].mxu0 }
 0x202   : > { %v2298_v4 = vadd.f32 %v2297_v43, %v2067_v0  ;;  %v2367_v2 = vadd.f32 %v2366_v37, %v2336_v61  ;;  %v3203_v31 = vpop.f32.mrb[133].mxu1  ;;  %v2083_v32 = vadd.f32 %v3282_v13, %v1922_v38  ;;  %v2074_v12 = vpop.f32.mrb[133].mxu0 }
 0x203   : > { %v3204_v27 = vadd.f32 %v3203_v31, %v3202_v26  ;;  %v3205_v15 = vpop.f32.mrb[134].mxu1  ;;  %v2075_v20 = vadd.f32 %v2074_v12, %v4449_v29  ;;  %v3283_v44 = vpop.f32.mrb[134].mxu0 }
 0x204   : > { %v2368_v63 = vadd.f32 %v2367_v2, %v2337_v30  ;;  %v2299_v23 = vadd.f32 %v2298_v4, %v2070_v48  ;;  %v3206_v57 = vpop.f32.mrb[135].mxu1  ;;  %v2086_v25 = vadd.f32 %v3283_v44, %v1925_v19  ;;  %v2077_v59 = vpop.f32.mrb[135].mxu0  ;;  %v2341_v19 = vmul.f32 %v2083_v32, %v2083_v32 }
 0x205   : > { %v3207_v60 = vadd.f32 %v3206_v57, %v3205_v15  ;;  %v1938_v8 = vadd.f32 %v3204_v27, %v4383_v35  ;;  %v2339_v16 = vmul.f32 %v2075_v20, %v2075_v20  ;;  %v2078_v33 = vadd.f32 %v2077_v59, %v4453_v3 }
 0x206   : > { %v2300_v58 = vadd.f32 %v2299_v23, %v2075_v20  ;;  %v2369_v38 = vadd.f32 %v2368_v63, %v2338_v46  ;;  %v2735_v51 = vpack.c.bf16 %v2086_v25, %v2083_v32  ;;  %v2342_v3 = vmul.f32 %v2086_v25, %v2086_v25 }
 0x207   : > { %v1941_v6 = vadd.f32 %v3207_v60, %v4389_v34  ;;  %v2730_v29 = vpack.c.bf16 %v2078_v33, %v2075_v20  ;;  %v2340_v36 = vmul.f32 %v2078_v33, %v2078_v33 }
 0x208   : > { %v2370_v18 = vadd.f32 %v2369_v38, %v2339_v16  ;;  %v2301_v56 = vadd.f32 %v2300_v58, %v2078_v33  ;;  %2767 = vst [vmem:[%s4425_s28 + $0x58] sm:$0xff] %v2735_v51  }
 0x209   : > { %v3208_v45 = vpop.f32.mrb[136].mxu1  ;;  %2766 = vst [vmem:[%s4425_s28 + $0x50] sm:$0xff] %v2730_v29   ;;  %v3286_v1 = vpop.f32.mrb[136].mxu0 }
 0x20a   : > { %v2302_v50 = vadd.f32 %v2301_v56, %v2083_v32  ;;  %v2371_v0 = vadd.f32 %v2370_v18, %v2340_v36  ;;  %v3209_v35 = vpop.f32.mrb[137].mxu1  ;;  %v2099_v10 = vadd.f32 %v3286_v1, %v1938_v8  ;;  %v2090_v9 = vpop.f32.mrb[137].mxu0 }
 0x20b   : > { %v3210_v5 = vadd.f32 %v3209_v35, %v3208_v45  ;;  %v3211_v62 = vpop.f32.mrb[138].mxu1  ;;  %v2091_v22 = vadd.f32 %v2090_v9, %v1930_v55  ;;  %v3287_v53 = vpop.f32.mrb[138].mxu0 }
 0x20c   : > { %v2372_v17 = vadd.f32 %v2371_v0, %v2341_v19  ;;  %v2303_v34 = vadd.f32 %v2302_v50, %v2086_v25  ;;  %v3212_v28 = vpop.f32.mrb[139].mxu1  ;;  %v2102_v48 = vadd.f32 %v3287_v53, %v1941_v6  ;;  %v2093_v47 = vpop.f32.mrb[139].mxu0  ;;  %v2345_v4 = vmul.f32 %v2099_v10, %v2099_v10 }
 0x20d   : > { %v3213_v14 = vadd.f32 %v3212_v28, %v3211_v62  ;;  %v1946_v52 = vadd.f32 %v3210_v5, %v4395_v49  ;;  %v2343_v7 = vmul.f32 %v2091_v22, %v2091_v22  ;;  %v2094_v21 = vadd.f32 %v2093_v47, %v1933_v54 }
 0x20e   : > { %v2304_v42 = vadd.f32 %v2303_v34, %v2091_v22  ;;  %v2373_v24 = vadd.f32 %v2372_v17, %v2342_v3  ;;  %v2745_v37 = vpack.c.bf16 %v2102_v48, %v2099_v10  ;;  %v2346_v15 = vmul.f32 %v2102_v48, %v2102_v48 }
 0x20f   : > { %v1949_v41 = vadd.f32 %v3213_v14, %v4401_v40  ;;  %v2740_v61 = vpack.c.bf16 %v2094_v21, %v2091_v22  ;;  %v2344_v26 = vmul.f32 %v2094_v21, %v2094_v21 }
 0x210   : > { %v2374_v43 = vadd.f32 %v2373_v24, %v2343_v7  ;;  %v2305_v55 = vadd.f32 %v2304_v42, %v2094_v21  ;;  %2769 = vst [vmem:[%s4425_s28 + $0x68] sm:$0xff] %v2745_v37  }
 0x211   : > { %v3214_v30 = vpop.f32.mrb[140].mxu1  ;;  %2768 = vst [vmem:[%s4425_s28 + $0x60] sm:$0xff] %v2740_v61   ;;  %v3290_v31 = vpop.f32.mrb[140].mxu0 }
 0x212   : > { %v2306_v2 = vadd.f32 %v2305_v55, %v2099_v10  ;;  %v2375_v13 = vadd.f32 %v2374_v43, %v2344_v26  ;;  %v3215_v32 = vpop.f32.mrb[141].mxu1  ;;  %v2106_v27 = vpop.f32.mrb[141].mxu0 }
 0x213   : > { %v3216_v49 = vadd.f32 %v3215_v32, %v3214_v30  ;;  %v3217_v12 = vpop.f32.mrb[142].mxu1  ;;  %v2107_v46 = vadd.f32 %v2106_v27, %v1946_v52  ;;  %v3291_v40 = vpop.f32.mrb[142].mxu0 }
 0x214   : > { %v2376_v54 = vadd.f32 %v2375_v13, %v2345_v4  ;;  %v2307_v63 = vadd.f32 %v2306_v2, %v2102_v48  ;;  %v3218_v20 = vpop.f32.mrb[143].mxu1  ;;  %v2109_v57 = vpop.f32.mrb[143].mxu0 }
 0x215   : > { %v1954_v23 = vadd.f32 %v3216_v49, %v4407_v11  ;;  %v3219_v44 = vadd.f32 %v3218_v20, %v3217_v12  ;;  %v2347_v60 = vmul.f32 %v2107_v46, %v2107_v46  ;;  %v2110_v8 = vadd.f32 %v2109_v57, %v1949_v41 }
 0x216   : > { %v2308_v25 = vadd.f32 %v2307_v63, %v2107_v46  ;;  %v2377_v59 = vadd.f32 %v2376_v54, %v2346_v15 }
 0x217   : > { %v2115_v58 = vadd.f32 %v3290_v31, %v1954_v23  ;;  %v1957_v16 = vadd.f32 %v3219_v44, %v4413_v39  ;;  %v2750_v33 = vpack.c.bf16 %v2110_v8, %v2107_v46  ;;  %v2348_v6 = vmul.f32 %v2110_v8, %v2110_v8 }
 0x218   : > { %v2378_v38 = vadd.f32 %v2377_v59, %v2347_v60  ;;  %v2309_v51 = vadd.f32 %v2308_v25, %v2110_v8 }
 0x219   : > { %v2349_v18 = vmul.f32 %v2115_v58, %v2115_v58  ;;  %v2118_v29 = vadd.f32 %v3291_v40, %v1957_v16  ;;  %2770 = vst [vmem:[%s4425_s28 + $0x70] sm:$0xff] %v2750_v33  }
 0x21a   : > { %v2310_v56 = vadd.f32 %v2309_v51, %v2115_v58  ;;  %v2379_v36 = vadd.f32 %v2378_v38, %v2348_v6 }
 0x21b   : > { %v2755_v11 = vpack.c.bf16 %v2118_v29, %v2115_v58  ;;  %v2350_v45 = vmul.f32 %v2118_v29, %v2118_v29 }
 0x21c   : > { %v2311_v19 = vadd.f32 %v2310_v56, %v2118_v29  ;;  %v2380_v50 = vadd.f32 %v2379_v36, %v2349_v18 }
 0x21d   : > { %2771 = vst [vmem:[%s4425_s28 + $0x78] sm:$0xff] %v2755_v11  }
 0x21e   : > { %v2312_v0 = vrot.slane %v2311_v19, 4  ;;  %v2381_v1 = vadd.f32 %v2380_v50, %v2350_v45 }
 0x220   : > { %v2313_v35 = vadd.f32 %v2312_v0, %v2311_v19  ;;  %v2382_v39 = vrot.slane %v2381_v1, 4 }
 0x222   : > { %v2314_v10 = vrot.slane %v2313_v35, 2  ;;  %v2383_v5 = vadd.f32 %v2382_v39, %v2381_v1 }
 0x224   : > { %v2315_v9 = vadd.f32 %v2314_v10, %v2313_v35  ;;  %v2384_v62 = vrot.slane %v2383_v5, 2 }
 0x226   : > { %v2316_v3 = vrot.slane %v2315_v9, 1  ;;  %v2385_v17 = vadd.f32 %v2384_v62, %v2383_v5 }
 0x228   : > { %v2317_v22 = vadd.f32 %v2316_v3, %v2315_v9  ;;  %v2386_v34 = vrot.slane %v2385_v17, 1 }
 0x22a   : > { %2318 = vst [vmem:[%s211_s5] sm:$0x1] %v2317_v22  ;;  %v2387_v53 = vadd.f32 %v2386_v34, %v2385_v17 }
 0x22c   : > { %2388 = vst [vmem:[%s214_s8] sm:$0x1] %v2387_v53 }
 0x22d PF: > { %s15_s15 = sadd.s32 1, %s3436_s15  }
 0x22e   : > { %p12_p4 = scmp.ge.s32.totalorder %s15_s15, 4  }
 0x230   :  { %14 = sbr.rel (!%p12_p4) target bundleno = 1 (0x1), region = 82 }

// kernel: image_encoder.8
= control target key start
LH: loop header
LB: loop body
LE: loop exit
PB: predicated region body
PF: predicated region fallthrough
CT: control target
= control target key end

     0   :  { %s2026_s15 = smov 0   ;;  %s2443_s0 = inlined_call_operand.vmem [shape: bf16[2,10,10,128], index: 0, kind: input, shape index: {}]   ;;  %s2444_s1 = inlined_call_operand.vmem [shape: bf16[1152,128], index: 1, kind: input, shape index: {}]   ;;  %s2445_s2 = inlined_call_operand.vmem [shape: bf16[2,64,128], index: 2, kind: output, shape index: {0}]   ;;  %s2446_s3 = inlined_call_operand.vmem [shape: f32[2,1,128], index: 3, kind: output, shape index: {1}]   ;;  %s2447_s4 = inlined_call_operand.vmem [shape: f32[2,1,128], index: 4, kind: output, shape index: {2}]  }
   0x1 LB: > { %s1522_s16 = sadd.s32 4294967295, %s1999_s15   ;;  %p1526_p0 = scmp.ge.s32.totalorder %s1999_s15, 1  ;;  %s1999_s15 = sphi %s2026_s15, %s15_s15  }
   0x2   : > { %p167_p1 = scmp.lt.s32.totalorder %s1999_s15, 3 }
   0x4   : > { %p168_p2 = pnand %p1526_p0, %p167_p1 }
   0x5   : > { %v1902_v0 = vld [vmem:[%s2444_s1 + $0x40] sm:$0xff] (!%p168_p2)   ;;  %v1906_v4 = vld [vmem:[%s2444_s1 + $0x48] sm:$0xff] (!%p168_p2)   ;;  %v1910_v8 = vld [vmem:[%s2444_s1 + $0x50] sm:$0xff] (!%p168_p2)   ;;  %p199_p3 = scmp.lt.s32.totalorder (!%p168_p2), %s1522_s16, 1 }
   0x6   : > { %171 = sbr.rel (%p168_p2) target bundleno = 349 (0x15d), region = 28  ;;  %v1903_v1 = vld [vmem:[%s2444_s1 + $0xc0] sm:$0xff] (!%p168_p2)   ;;  %1681 = vmatprep.subr.bf16.mxu0 (!%p168_p2), %v1902_v0  ;;  %v1907_v5 = vld [vmem:[%s2444_s1 + $0xc8] sm:$0xff] (!%p168_p2)   ;;  %v1911_v9 = vld [vmem:[%s2444_s1 + $0xd0] sm:$0xff] (!%p168_p2)  }
   0x7   : > { %v1904_v2 = vld [vmem:[%s2444_s1] sm:$0xff] (!%p168_p2)   ;;  %1721 = vmatprep.subr.bf16.mxu1 (!%p168_p2), %v1903_v1  ;;  %v1908_v6 = vld [vmem:[%s2444_s1 + $0x8] sm:$0xff] (!%p168_p2)   ;;  %v1912_v10 = vld [vmem:[%s2444_s1 + $0x10] sm:$0xff] (!%p168_p2)  }
   0x8   : > { %v1905_v3 = vld [vmem:[%s2444_s1 + $0x80] sm:$0xff] (!%p168_p2)   ;;  %1682 = vmatpush3.bf16.msra.mxu0 (!%p168_p2), %v1904_v2  ;;  %v1909_v7 = vld [vmem:[%s2444_s1 + $0x88] sm:$0xff] (!%p168_p2)   ;;  %v1913_v11 = vld [vmem:[%s2444_s1 + $0x90] sm:$0xff] (!%p168_p2)  }
   0x9   : > { %1722 = vmatpush3.bf16.msra.mxu1 (!%p168_p2), %v1905_v3  ;;  %1683 = vmatprep.subr.bf16.mxu0 (!%p168_p2), %v1906_v4  ;;  %v1914_v12 = vld [vmem:[%s2444_s1 + $0x58] sm:$0xff] (!%p168_p2)   ;;  %v1918_v16 = vld [vmem:[%s2444_s1 + $0x60] sm:$0xff] (!%p168_p2)   ;;  %v1922_v20 = vld [vmem:[%s2444_s1 + $0x68] sm:$0xff] (!%p168_p2)  }
   0xa   : > { %1723 = vmatprep.subr.bf16.mxu1 (!%p168_p2), %v1907_v5  ;;  %v1915_v13 = vld [vmem:[%s2444_s1 + $0xd8] sm:$0xff] (!%p168_p2)   ;;  %v1919_v17 = vld [vmem:[%s2444_s1 + $0xe0] sm:$0xff] (!%p168_p2)   ;;  %v1923_v21 = vld [vmem:[%s2444_s1 + $0xe8] sm:$0xff] (!%p168_p2)  }
   0xb   : > { %v1916_v14 = vld [vmem:[%s2444_s1 + $0x18] sm:$0xff] (!%p168_p2)   ;;  %v1920_v18 = vld [vmem:[%s2444_s1 + $0x20] sm:$0xff] (!%p168_p2)   ;;  %v1924_v22 = vld [vmem:[%s2444_s1 + $0x28] sm:$0xff] (!%p168_p2)  }
   0xc   : > { %1684 = vmatpush3.bf16.msra.mxu0 (!%p168_p2), %v1908_v6  ;;  %v1917_v15 = vld [vmem:[%s2444_s1 + $0x98] sm:$0xff] (!%p168_p2)   ;;  %v1921_v19 = vld [vmem:[%s2444_s1 + $0xa0] sm:$0xff] (!%p168_p2)   ;;  %v1925_v23 = vld [vmem:[%s2444_s1 + $0xa8] sm:$0xff] (!%p168_p2)  }
   0xd   : > { %1724 = vmatpush3.bf16.msra.mxu1 %v1909_v7  ;;  %1685 = vmatprep.subr.bf16.mxu0 %v1910_v8  ;;  %s2449_s16 = smov (!%p199_p3, %s1522_s16), 1  ;;  %v1926_v24 = vld [vmem:[%s2444_s1 + $0x70] sm:$0xff]   ;;  %v1930_v28 = vld [vmem:[%s2444_s1 + $0x78] sm:$0xff]   ;;  %v1939_v41 = vld [vmem:[%s2444_s1 + $0x140] sm:$0xff]  }
   0xe   : > { %1725 = vmatprep.subr.bf16.mxu1 %v1911_v9  ;;  %v1927_v25 = vld [vmem:[%s2444_s1 + $0xf0] sm:$0xff]   ;;  %s1893_s21 = smul.u32 80, %s2449_s16  ;;  %v1931_v29 = vld [vmem:[%s2444_s1 + $0xf8] sm:$0xff]   ;;  %v1940_v45 = vld [vmem:[%s2444_s1 + $0x1c0] sm:$0xff]   ;;  %s1649_s23 = sshll.u32 %s2449_s16, 5 }
   0xf   : > { %v1928_v26 = vld [vmem:[%s2444_s1 + $0x30] sm:$0xff]   ;;  %v1932_v30 = vld [vmem:[%s2444_s1 + $0x38] sm:$0xff]   ;;  %v1942_v51 = vld [vmem:[%s2444_s1 + $0x180] sm:$0xff]   ;;  %s208_s26 = scalar_lea.vmem %s2445_s2, %s1649_s23  ;;  %s211_s29 = scalar_lea.vmem %s2446_s3, %s2449_s16 }
  0x10   : > { %1686 = vmatpush3.bf16.msra.mxu0 %v1912_v10  ;;  %v1929_v27 = vld [vmem:[%s2444_s1 + $0xb0] sm:$0xff]   ;;  %s2134_s6 = scalar_lea.vmem %s2443_s0, %s1893_s21  ;;  %v1933_v31 = vld [vmem:[%s2444_s1 + $0xb8] sm:$0xff]   ;;  %v1941_v56 = vld [vmem:[%s2444_s1 + $0x100] sm:$0xff]   ;;  %s214_s7 = scalar_lea.vmem %s2447_s4, %s2449_s16 }
  0x11   : > { %1726 = vmatpush3.bf16.msra.mxu1 %v1913_v11  ;;  %1687 = vmatprep.subr.bf16.mxu0 %v1914_v12  ;;  %v216_v32 = vld [vmem:[%s2134_s6] sm:$0xf]  ;;  %v217_v33 = vld [vmem:[%s2134_s6 + $0x4] sm:$0x1]  ;;  %v218_v34 = vld [vmem:[%s2134_s6 + $0x8] sm:$0xf] }
  0x12   : > { %1727 = vmatprep.subr.bf16.mxu1 %v1915_v13  ;;  %v219_v35 = vld [vmem:[%s2134_s6 + $0xc] sm:$0x1]  ;;  %v1530_v36 = vcombine.low %v216_v32, %v217_v33  ;;  %v2147_v37 = vld [vmem:[%s2134_s6 + $0x10] sm:$0xf]  ;;  %v221_v38 = vld [vmem:[%s2134_s6 + $0x14] sm:$0x1]  ;;  %v1540_v58 = vcombine.low %v216_v32, %v218_v34 }
  0x13   : > { %v2150_v39 = vcombine.low %v218_v34, %v219_v35  ;;  %v1543_v40 = vcombine.low %v218_v34, %v2147_v37  ;;  %v2163_v50 = vcombine.low %v2147_v37, %v221_v38  ;;  %v1944_v57 = vld [vmem:[%s2444_s1 + $0x1c8] sm:$0xff]   ;;  %v222_v63 = vld [vmem:[%s2134_s6 + $0x18] sm:$0xf]  ;;  %v223_v1 = vld [vmem:[%s2134_s6 + $0x1c] sm:$0x1] }
  0x14   : > { %1688 = vmatpush3.bf16.msra.mxu0 %v1916_v14  ;;  %v277_v42 = vshrl.u32 %v1530_v36, 16  ;;  %v279_v43 = vshll.u32 %v1530_v36, 16  ;;  %v332_v44 = vrot.slane %v1530_v36, 1  ;;  %v1943_v59 = vld [vmem:[%s2444_s1 + $0x148] sm:$0xff]   ;;  %v2190_v3 = vld [vmem:[%s2134_s6 + $0x20] sm:$0xf]  ;;  %v2196_v6 = vcombine.low %v222_v63, %v223_v1 }
  0x15   : > { %1728 = vmatpush3.bf16.msra.mxu1 %v1917_v15  ;;  %1689 = vmatprep.subr.bf16.mxu0 %v1918_v16  ;;  %v284_v46 = vshrl.u32 %v2150_v39, 16  ;;  %v286_v47 = vshll.u32 %v2150_v39, 16  ;;  %v333_v48 = vrot.slane %v2150_v39, 1  ;;  %v293_v60 = vshll.u32 %v2163_v50, 16  ;;  %v1946_v62 = vld [vmem:[%s2444_s1 + $0x188] sm:$0xff]   ;;  %v1952_v9 = vld [vmem:[%s2444_s1 + $0x1d0] sm:$0xff]  }
  0x16   : > { %1729 = vmatprep.subr.bf16.mxu1 %v1919_v17  ;;  %1113 = vmatprep.mubr.bf16.mxu1 %v1543_v40  ;;  %v281_v49 = vrot.slane %v279_v43, 1  ;;  %v291_v0 = vshrl.u32 %v2163_v50, 16  ;;  %v334_v4 = vrot.slane %v2163_v50, 1  ;;  %v1945_v5 = vld [vmem:[%s2444_s1 + $0x108] sm:$0xff]   ;;  %v225_v7 = vld [vmem:[%s2134_s6 + $0x24] sm:$0x1]  ;;  %v1549_v8 = vcombine.low %v222_v63, %v2190_v3 }
  0x17   : > { %v288_v52 = vrot.slane %v286_v47, 1  ;;  %v1542_v53 = vcombine.low %v332_v44, %v333_v48  ;;  %v295_v2 = vrot.slane %v293_v60, 1  ;;  %v298_v10 = vshrl.u32 %v2196_v6, 16  ;;  %v1951_v14 = vld [vmem:[%s2444_s1 + $0x150] sm:$0xff]   ;;  %v1964_v43 = vld [vmem:[%s2444_s1 + $0x1e0] sm:$0xff]   ;;  %v1984_v39 = vld [vmem:[%s2444_s1 + $0x208] sm:$0xff]  }
  0x18   : > { %1690 = vmatpush3.bf16.msra.mxu0 %v1920_v18  ;;  %v282_v54 = vor.u32 %v281_v49, %v277_v42  ;;  %v300_v11 = vshll.u32 %v2196_v6, 16  ;;  %v2206_v12 = vcombine.low %v2190_v3, %v225_v7  ;;  %v335_v13 = vrot.slane %v2196_v6, 1  ;;  %v1953_v18 = vld [vmem:[%s2444_s1 + $0x110] sm:$0xff]   ;;  %v1965_v44 = vld [vmem:[%s2444_s1 + $0x120] sm:$0xff]  }
  0x19   : > { %1730 = vmatpush3.bf16.msra.mxu1 %v1921_v19  ;;  %1691 = vmatprep.subr.bf16.mxu0 %v1922_v20  ;;  %v2170_v55 = vor.u32 %v288_v52, %v284_v46  ;;  %v2212_v15 = vor.u32 %v295_v2, %v291_v0  ;;  %v1954_v19 = vld [vmem:[%s2444_s1 + $0x190] sm:$0xff]   ;;  %v1955_v20 = vld [vmem:[%s2444_s1 + $0x158] sm:$0xff]   ;;  %v1966_v49 = vld [vmem:[%s2444_s1 + $0x1a0] sm:$0xff]  }
  0x1a   : > { %1731 = vmatprep.subr.bf16.mxu1 %v1923_v21  ;;  %v302_v16 = vrot.slane %v300_v11, 1  ;;  %v2218_v17 = vcombine.low %v334_v4, %v335_v13  ;;  %v2256_v34 = vld [vmem:[%s2134_s6 + $0x30] sm:$0xf]  ;;  %v229_v35 = vld [vmem:[%s2134_s6 + $0x34] sm:$0x1] }
  0x1b   : > { %v1541_v61 = vcombine.low %v282_v54, %v2170_v55  ;;  %v1977_v11 = vld [vmem:[%s2444_s1 + $0x130] sm:$0xff]  }
  0x1c   : > { %1692 = vmatpush3.bf16.msra.mxu0 %v1924_v22  ;;  %v2229_v21 = vor.u32 %v302_v16, %v298_v10  ;;  %v1956_v22 = vld [vmem:[%s2444_s1 + $0x1d8] sm:$0xff]   ;;  %v1976_v10 = vld [vmem:[%s2444_s1 + $0x1f0] sm:$0xff]  }
  0x1d   : > { %1732 = vmatpush3.bf16.msra.mxu1 %v1925_v23  ;;  %1693 = vmatprep.subr.bf16.mxu0 %v1926_v24  ;;  %v307_v23 = vshll.u32 %v2206_v12, 16  ;;  %v2237_v24 = vcombine.low %v2147_v37, %v222_v63  ;;  %v1963_v37 = vld [vmem:[%s2444_s1 + $0x160] sm:$0xff]  }
  0x1e   : > { %1733 = vmatprep.subr.bf16.mxu1 %v1927_v25  ;;  %1048 = vmatprep.mubr.bf16.mxu0 %v1541_v61  ;;  %v305_v25 = vshrl.u32 %v2206_v12, 16  ;;  %v230_v61 = vld [vmem:[%s2134_s6 + $0x38] sm:$0xf]  ;;  %v2313_v63 = vld [vmem:[%s2134_s6 + $0x40] sm:$0xf] }
  0x1f   : > { %v309_v32 = vrot.slane %v307_v23, 1  ;;  %v1561_v2 = vcombine.low %v230_v61, %v2313_v63 }
  0x20   : > { %1694 = vmatpush3.bf16.msra.mxu0 %v1928_v26  ;;  %v336_v26 = vrot.slane %v2206_v12, 1  ;;  %v1986_v12 = vld [vmem:[%s2444_s1 + $0x218] sm:$0xff]  }
  0x21   : > { %1734 = vmatpush3.bf16.msra.mxu1 %v1929_v27  ;;  %1695 = vmatprep.subr.bf16.mxu0 %v1930_v28  ;;  %v2243_v27 = vcombine.low %v2212_v15, %v2229_v21  ;;  %v1957_v28 = vld [vmem:[%s2444_s1 + $0x118] sm:$0xff]  }
  0x22   : > { %1735 = vmatprep.subr.bf16.mxu1 %v1931_v29  ;;  %v1958_v29 = vld [vmem:[%s2444_s1 + $0x198] sm:$0xff]  }
  0x24   : > { %1696 = vmatpush3.bf16.msra.mxu0 %v1932_v30  ;;  %v226_v30 = vld [vmem:[%s2134_s6 + $0x28] sm:$0xf] }
  0x25   : > { %1736 = vmatpush3.bf16.msra.mxu1 %v1933_v31  ;;  %1761 = vmatprep.subr.bf16.mxu0 %v1939_v41  ;;  %v227_v31 = vld [vmem:[%s2134_s6 + $0x2c] sm:$0x1]  ;;  %v1555_v36 = vcombine.low %v226_v30, %v2256_v34  ;;  %v2268_v41 = vcombine.low %v2256_v34, %v229_v35 }
  0x26   : > { %1801 = vmatprep.subr.bf16.mxu1 %v1940_v45  ;;  %v2253_v33 = vcombine.low %v226_v30, %v227_v31  ;;  %v2277_v45 = vor.u32 %v309_v32, %v305_v25  ;;  %v1980_v25 = vld [vmem:[%s2444_s1 + $0x1f8] sm:$0xff]   ;;  %v1545_v32 = vcombine.low %v333_v48, %v334_v4  ;;  %v234_v48 = vld [vmem:[%s2134_s6 + $0x48] sm:$0xf]  ;;  %v1544_v4 = vcombine.low %v2170_v55, %v2212_v15 }
  0x27   : > { %1049 = vmatmul.mubr.bf16.vlgmr.msra.gmra.mrb[0].mxu0 %v1540_v58  ;;  %v321_v54 = vshll.u32 %v2268_v41, 16  ;;  %v319_v60 = vshrl.u32 %v2268_v41, 16  ;;  %v1982_v31 = vld [vmem:[%s2444_s1 + $0x1b8] sm:$0xff]  }
  0x28   : > { %1114 = vmatmul.mubr.bf16.vlgmr.msra.gmra.mrb[0].mxu1 %v1542_v53  ;;  %1762 = vmatpush3.bf16.msra.mxu0 %v1941_v56  ;;  %v312_v38 = vshrl.u32 %v2253_v33, 16  ;;  %v314_v40 = vshll.u32 %v2253_v33, 16  ;;  %v337_v42 = vrot.slane %v2253_v33, 1  ;;  %v1968_v53 = vld [vmem:[%s2444_s1 + $0x1e8] sm:$0xff]   ;;  %v2299_v56 = vcombine.low %v2190_v3, %v226_v30 }
  0x29   : > { %1802 = vmatpush3.bf16.msra.mxu1 %v1942_v51  ;;  %1121 = vmatprep.mubr.bf16.mxu1 %v1549_v8  ;;  %v1967_v51 = vld [vmem:[%s2444_s1 + $0x168] sm:$0xff]   ;;  %v323_v1 = vrot.slane %v321_v54, 1  ;;  %v338_v3 = vrot.slane %v2268_v41, 1 }
  0x2a   : > { %1803 = vmatprep.subr.bf16.mxu1 %v1944_v57  ;;  %1763 = vmatprep.subr.bf16.mxu0 %v1943_v59  ;;  %v316_v46 = vrot.slane %v314_v40, 1  ;;  %v2283_v47 = vcombine.low %v336_v26, %v337_v42  ;;  %v1969_v57 = vld [vmem:[%s2444_s1 + $0x128] sm:$0xff]  }
  0x2b   : > { %1056 = vmatprep.mubr.bf16.mxu0 %v2243_v27  ;;  %v1970_v59 = vld [vmem:[%s2444_s1 + $0x1a8] sm:$0xff]  }
  0x2c   : > { %1764 = vmatpush3.bf16.msra.mxu0 %v1945_v5  ;;  %v2291_v52 = vor.u32 %v316_v46, %v312_v38  ;;  %v1975_v5 = vld [vmem:[%s2444_s1 + $0x170] sm:$0xff]   ;;  %v1987_v46 = vld [vmem:[%s2444_s1 + $0x220] sm:$0xff]  }
  0x2d   : > { %1804 = vmatpush3.bf16.msra.mxu1 %v1946_v62  ;;  %1765 = vmatprep.subr.bf16.mxu0 %v1951_v14  ;;  %v231_v62 = vld [vmem:[%s2134_s6 + $0x3c] sm:$0x1]  ;;  %v2332_v14 = vor.u32 %v323_v1, %v319_v60 }
  0x2e   : > { %1805 = vmatprep.subr.bf16.mxu1 %v1952_v9  ;;  %v1553_v58 = vcombine.low %v2277_v45, %v2291_v52  ;;  %v2315_v0 = vcombine.low %v230_v61, %v231_v62 }
  0x2f   : > { %1057 = vmatmul.mubr.bf16.gmra.mrb[4].mxu0 %v2237_v24  ;;  %v1556_v33 = vcombine.low %v2291_v52, %v2332_v14  ;;  %v1992_v52 = vld [vmem:[%s2444_s1 + $0x238] sm:$0xff]  }
  0x30   : > { %1122 = vmatmul.mubr.bf16.gmra.mrb[4].mxu1 %v2218_v17  ;;  %1766 = vmatpush3.bf16.msra.mxu0 %v1953_v18  ;;  %v326_v7 = vshrl.u32 %v2315_v0, 16  ;;  %v328_v8 = vshll.u32 %v2315_v0, 16  ;;  %v339_v9 = vrot.slane %v2315_v0, 1 }
  0x31   : > { %1806 = vmatpush3.bf16.msra.mxu1 %v1954_v19  ;;  %1767 = vmatprep.subr.bf16.mxu0 %v1955_v20  ;;  %v1978_v19 = vld [vmem:[%s2444_s1 + $0x1b0] sm:$0xff]   ;;  %v233_v20 = vld [vmem:[%s2134_s6 + $0x44] sm:$0x1] }
  0x32   : > { %1807 = vmatprep.subr.bf16.mxu1 %v1956_v22  ;;  %1129 = vmatprep.mubr.bf16.mxu1 %v1555_v36  ;;  %v330_v16 = vrot.slane %v328_v8, 1  ;;  %v2338_v18 = vcombine.low %v338_v3, %v339_v9  ;;  %v1979_v22 = vld [vmem:[%s2444_s1 + $0x178] sm:$0xff]   ;;  %v2371_v35 = vcombine.low %v2313_v63, %v233_v20  ;;  %v1551_v36 = vcombine.low %v335_v13, %v336_v26 }
  0x33   : > { %1064 = vmatprep.mubr.bf16.mxu0 %v1553_v58  ;;  %v1550_v13 = vcombine.low %v2229_v21, %v2277_v45  ;;  %v1988_v21 = vld [vmem:[%s2444_s1 + $0x228] sm:$0xff]  }
  0x34   : > { %1768 = vmatpush3.bf16.msra.mxu0 %v1957_v28  ;;  %v2347_v23 = vor.u32 %v330_v16, %v326_v7  ;;  %v1558_v28 = vcombine.low %v2256_v34, %v230_v61  ;;  %v1983_v34 = vld [vmem:[%s2444_s1 + $0x200] sm:$0xff]   ;;  %v348_v50 = vshll.u32 %v2371_v35, 16  ;;  %v346_v40 = vshrl.u32 %v2371_v35, 16 }
  0x35   : > { %1808 = vmatpush3.bf16.msra.mxu1 %v1958_v29  ;;  %1769 = vmatprep.subr.bf16.mxu0 %v1963_v37  ;;  %v1981_v29 = vld [vmem:[%s2444_s1 + $0x138] sm:$0xff]   ;;  %v352_v45 = vrot.slane %v2371_v35, 1 }
  0x36   : > { %1809 = vmatprep.subr.bf16.mxu1 %v1964_v43  ;;  %v1559_v30 = vcombine.low %v2332_v14, %v2347_v23  ;;  %v350_v55 = vrot.slane %v348_v50, 1 }
  0x37   : > { %1065 = vmatmul.mubr.bf16.gmra.mrb[8].mxu0 %v2299_v56  ;;  %v1563_v41 = vcombine.low %v339_v9, %v352_v45 }
  0x38   : > { %1130 = vmatmul.mubr.bf16.gmra.mrb[8].mxu1 %v2283_v47  ;;  %1770 = vmatpush3.bf16.msra.mxu0 %v1965_v44  ;;  %v351_v26 = vor.u32 %v350_v55, %v346_v40  ;;  %v1557_v44 = vcombine.low %v337_v42, %v338_v3  ;;  %v1991_v42 = vld [vmem:[%s2444_s1 + $0x230] sm:$0xff]  }
  0x39   : > { %1810 = vmatpush3.bf16.msra.mxu1 %v1966_v49  ;;  %1771 = vmatprep.subr.bf16.mxu0 %v1967_v51  ;;  %v1564_v51 = vcombine.low %v2313_v63, %v234_v48 }
  0x3a   : > { %1811 = vmatprep.subr.bf16.mxu1 %v1968_v53  ;;  %1137 = vmatprep.mubr.bf16.mxu1 %v1561_v2  ;;  %v1562_v54 = vcombine.low %v2347_v23, %v351_v26 }
  0x3b   : > { %1072 = vmatprep.mubr.bf16.mxu0 %v1559_v30 }
  0x3c   : > { %1772 = vmatpush3.bf16.msra.mxu0 %v1969_v57 }
  0x3d   : > { %1812 = vmatpush3.bf16.msra.mxu1 %v1970_v59  ;;  %1773 = vmatprep.subr.bf16.mxu0 %v1975_v5 }
  0x3e   : > { %1813 = vmatprep.subr.bf16.mxu1 %v1976_v10 }
  0x3f   : > { %1073 = vmatmul.mubr.bf16.gmra.mrb[12].mxu0 %v1558_v28 }
  0x40   : > { %1138 = vmatmul.mubr.bf16.gmra.mrb[12].mxu1 %v2338_v18  ;;  %1774 = vmatpush3.bf16.msra.mxu0 %v1977_v11 }
  0x41   : > { %1814 = vmatpush3.bf16.msra.mxu1 %v1978_v19  ;;  %1775 = vmatprep.subr.bf16.mxu0 %v1979_v22 }
  0x42   : > { %1815 = vmatprep.subr.bf16.mxu1 %v1980_v25  ;;  %1243 = vmatprep.mubr.bf16.mxu1 %v2243_v27  ;;  %v235_v27 = vld [vmem:[%s2134_s6 + $0x4c] sm:$0x1] }
  0x43   : > { %1178 = vmatprep.mubr.bf16.mxu0 %v1545_v32  ;;  %v1539_v37 = vcombine.low %v234_v48, %v235_v27 }
  0x44   : > { %1776 = vmatpush3.bf16.msra.mxu0 %v1981_v29 }
  0x45   : > { %1816 = vmatpush3.bf16.msra.mxu1 %v1982_v31  ;;  %1853 = vmatprep.subr.bf16.mxu0 %v1983_v34  ;;  %v361_v38 = vshll.u32 %v1539_v37, 16  ;;  %v359_v15 = vshrl.u32 %v1539_v37, 16  ;;  %v365_v53 = vrot.slane %v1539_v37, 1 }
  0x46   : > { %1877 = vmatprep.subr.bf16.mxu1 %v1983_v34 }
  0x47   : > { %1179 = vmatmul.mubr.bf16.vlgmr.msra.gmra.mrb[16].mxu0 %v1544_v4  ;;  %v363_v6 = vrot.slane %v361_v38, 1 }
  0x48   : > { %1244 = vmatmul.mubr.bf16.vlgmr.msra.gmra.mrb[16].mxu1 %v2237_v24  ;;  %v1985_v24 = vld [vmem:[%s2444_s1 + $0x210] sm:$0xff]   ;;  %1854 = vmatpush3.bf16.msra.mxu0 %v1983_v34 }
  0x49   : > { %1885 = vmatpush3.bf16.msra.mxu1 %v1983_v34  ;;  %1251 = vmatprep.mubr.bf16.mxu1 %v1553_v58  ;;  %v364_v43 = vor.u32 %v363_v6, %v359_v15 }
  0x4a   : > { %1878 = vmatprep.subr.bf16.mxu1 %v1984_v39  ;;  %1186 = vmatprep.mubr.bf16.mxu0 %v1551_v36 }
  0x4b   : > { %1855 = vmatprep.subr.bf16.mxu0 %v1984_v39  ;;  %v1565_v49 = vcombine.low %v351_v26, %v364_v43 }
  0x4c   : > { %1856 = vmatpush3.bf16.msra.mxu0 %v1984_v39 }
  0x4d   : > { %1886 = vmatpush3.bf16.msra.mxu1 %v1984_v39  ;;  %1857 = vmatprep.subr.bf16.mxu0 %v1985_v24 }
  0x4e   : > { %1879 = vmatprep.subr.bf16.mxu1 %v1985_v24 }
  0x4f   : > { %1187 = vmatmul.mubr.bf16.gmra.mrb[20].mxu0 %v1550_v13 }
  0x50   : > { %1252 = vmatmul.mubr.bf16.gmra.mrb[20].mxu1 %v2299_v56  ;;  %1858 = vmatpush3.bf16.msra.mxu0 %v1985_v24  ;;  %v1566_v56 = vcombine.low %v352_v45, %v365_v53 }
  0x51   : > { %1887 = vmatpush3.bf16.msra.mxu1 %v1985_v24  ;;  %1259 = vmatprep.mubr.bf16.mxu1 %v1559_v30 }
  0x52   : > { %1880 = vmatprep.subr.bf16.mxu1 %v1986_v12  ;;  %1194 = vmatprep.mubr.bf16.mxu0 %v1557_v44 }
  0x53   : > { %1859 = vmatprep.subr.bf16.mxu0 %v1986_v12 }
  0x54   : > { %1860 = vmatpush3.bf16.msra.mxu0 %v1986_v12 }
  0x55   : > { %1888 = vmatpush3.bf16.msra.mxu1 %v1986_v12  ;;  %1861 = vmatprep.subr.bf16.mxu0 %v1987_v46 }
  0x56   : > { %1881 = vmatprep.subr.bf16.mxu1 %v1987_v46 }
  0x57   : > { %1195 = vmatmul.mubr.bf16.gmra.mrb[24].mxu0 %v1556_v33 }
  0x58   : > { %1260 = vmatmul.mubr.bf16.gmra.mrb[24].mxu1 %v1558_v28  ;;  %1862 = vmatpush3.bf16.msra.mxu0 %v1987_v46 }
  0x59   : > { %1889 = vmatpush3.bf16.msra.mxu1 %v1987_v46  ;;  %1267 = vmatprep.mubr.bf16.mxu1 %v1565_v49 }
  0x5a   : > { %1882 = vmatprep.subr.bf16.mxu1 %v1988_v21  ;;  %1202 = vmatprep.mubr.bf16.mxu0 %v1563_v41 }
  0x5b   : > { %1863 = vmatprep.subr.bf16.mxu0 %v1988_v21 }
  0x5c   : > { %1864 = vmatpush3.bf16.msra.mxu0 %v1988_v21 }
  0x5d   : > { %1890 = vmatpush3.bf16.msra.mxu1 %v1988_v21  ;;  %1865 = vmatprep.subr.bf16.mxu0 %v1991_v42 }
  0x5e   : > { %1883 = vmatprep.subr.bf16.mxu1 %v1991_v42 }
  0x5f   : > { %1203 = vmatmul.mubr.bf16.gmra.mrb[28].mxu0 %v1562_v54 }
  0x60   : > { %1268 = vmatmul.mubr.bf16.gmra.mrb[28].mxu1 %v1564_v51  ;;  %1866 = vmatpush3.bf16.msra.mxu0 %v1991_v42 }
  0x61   : > { %1891 = vmatpush3.bf16.msra.mxu1 %v1991_v42  ;;  %1873 = vmatprep.mubr.bf16.mxu1 %v2338_v18 }
  0x62   : > { %1884 = vmatprep.subr.bf16.mxu1 %v1992_v52  ;;  %1869 = vmatprep.mubr.bf16.mxu0 %v2218_v17 }
  0x63   : > { %1867 = vmatprep.subr.bf16.mxu0 %v1992_v52 }
  0x64   : > { %1868 = vmatpush3.bf16.msra.mxu0 %v1992_v52 }
  0x65   : > { %1892 = vmatpush3.bf16.msra.mxu1 %v1992_v52 }
  0x67   : > { %1870 = vmatmul.mubr.bf16.vlgmr.msra.gmra.mrb[32].mxu0 %v2283_v47 }
  0x68   : > { %1874 = vmatmul.mubr.bf16.vlgmr.msra.gmra.mrb[32].mxu1 %v1566_v56 }
  0xfa   : > { %v1697_v63 = vpop.f32.mrb[0].mxu0 }
  0xfb   : > { %v1737_v57 = vpop.f32.mrb[0].mxu1  ;;  %v1698_v0 = vpop.f32.mrb[1].mxu0 }
  0xfc   : > { %v1738_v58 = vpop.f32.mrb[1].mxu1  ;;  %v1699_v1 = vadd.f32 %v1698_v0, %v1697_v63  ;;  %v1700_v2 = vpop.f32.mrb[2].mxu0 }
  0xfd   : > { %v1739_v59 = vadd.f32 %v1738_v58, %v1737_v57  ;;  %v1740_v60 = vpop.f32.mrb[2].mxu1  ;;  %v1701_v3 = vpop.f32.mrb[3].mxu0 }
  0xfe   : > { %v1741_v61 = vpop.f32.mrb[3].mxu1  ;;  %v1702_v7 = vadd.f32 %v1701_v3, %v1700_v2 }
  0xff   : > { %v1742_v62 = vadd.f32 %v1741_v61, %v1740_v60  ;;  %v1116_v5 = vadd.f32 %v1739_v59, %v1699_v1 }
 0x101   : > { %v1119_v17 = vadd.f32 %v1742_v62, %v1702_v7 }
 0x102   : > { %v1703_v16 = vpop.f32.mrb[4].mxu0 }
 0x103   : > { %v1743_v8 = vpop.f32.mrb[4].mxu1  ;;  %v1704_v18 = vpop.f32.mrb[5].mxu0 }
 0x104   : > { %v1744_v9 = vpop.f32.mrb[5].mxu1  ;;  %v1705_v19 = vadd.f32 %v1704_v18, %v1703_v16  ;;  %v1706_v20 = vpop.f32.mrb[6].mxu0 }
 0x105   : > { %v1745_v10 = vadd.f32 %v1744_v9, %v1743_v8  ;;  %v1746_v11 = vpop.f32.mrb[6].mxu1  ;;  %v1707_v22 = vpop.f32.mrb[7].mxu0 }
 0x106   : > { %v1747_v14 = vpop.f32.mrb[7].mxu1  ;;  %v1708_v25 = vadd.f32 %v1707_v22, %v1706_v20 }
 0x107   : > { %v1748_v47 = vadd.f32 %v1747_v14, %v1746_v11  ;;  %v1124_v23 = vadd.f32 %v1745_v10, %v1705_v19 }
 0x109   : > { %v1127_v30 = vadd.f32 %v1748_v47, %v1708_v25 }
 0x10a   : > { %v1709_v39 = vpop.f32.mrb[8].mxu0 }
 0x10b   : > { %v1749_v28 = vpop.f32.mrb[8].mxu1  ;;  %v1710_v48 = vpop.f32.mrb[9].mxu0 }
 0x10c   : > { %v1750_v29 = vpop.f32.mrb[9].mxu1  ;;  %v1711_v50 = vadd.f32 %v1710_v48, %v1709_v39  ;;  %v1712_v4 = vpop.f32.mrb[10].mxu0 }
 0x10d   : > { %v1751_v31 = vadd.f32 %v1750_v29, %v1749_v28  ;;  %v1752_v32 = vpop.f32.mrb[10].mxu1  ;;  %v1713_v27 = vpop.f32.mrb[11].mxu0 }
 0x10e   : > { %v1753_v34 = vpop.f32.mrb[11].mxu1  ;;  %v1714_v37 = vadd.f32 %v1713_v27, %v1712_v4 }
 0x10f   : > { %v1754_v35 = vadd.f32 %v1753_v34, %v1752_v32  ;;  %v1132_v36 = vadd.f32 %v1751_v31, %v1711_v50 }
 0x111   : > { %v2422_v38 = vadd.f32 %v1754_v35, %v1714_v37 }
 0x112   : > { %v1715_v13 = vpop.f32.mrb[12].mxu0 }
 0x113   : > { %v1755_v24 = vpop.f32.mrb[12].mxu1  ;;  %v1716_v26 = vpop.f32.mrb[13].mxu0 }
 0x114   : > { %v1756_v40 = vpop.f32.mrb[13].mxu1  ;;  %v1717_v43 = vadd.f32 %v1716_v26, %v1715_v13  ;;  %v1718_v44 = vpop.f32.mrb[14].mxu0 }
 0x115   : > { %v1757_v55 = vadd.f32 %v1756_v40, %v1755_v24  ;;  %v1758_v15 = vpop.f32.mrb[14].mxu1  ;;  %v1719_v46 = vpop.f32.mrb[15].mxu0 }
 0x116   : > { %v1759_v12 = vpop.f32.mrb[15].mxu1  ;;  %v1720_v45 = vadd.f32 %v1719_v46, %v1718_v44 }
 0x117   : > { %v1760_v6 = vadd.f32 %v1759_v12, %v1758_v15  ;;  %v1140_v21 = vadd.f32 %v1757_v55, %v1717_v43 }
 0x119   : > { %v2424_v51 = vadd.f32 %v1760_v6, %v1720_v45 }
 0x11a   : > { %v1777_v54 = vpop.f32.mrb[16].mxu0 }
 0x11b   : > { %v1817_v49 = vpop.f32.mrb[16].mxu1  ;;  %v1778_v56 = vpop.f32.mrb[17].mxu0 }
 0x11c   : > { %v1818_v33 = vpop.f32.mrb[17].mxu1  ;;  %v1779_v57 = vadd.f32 %v1778_v56, %v1777_v54  ;;  %v1780_v58 = vpop.f32.mrb[18].mxu0 }
 0x11d   : > { %v1819_v41 = vadd.f32 %v1818_v33, %v1817_v49  ;;  %v1820_v42 = vpop.f32.mrb[18].mxu1  ;;  %v1781_v59 = vpop.f32.mrb[19].mxu0 }
 0x11e   : > { %v1821_v52 = vpop.f32.mrb[19].mxu1  ;;  %v1181_v61 = vadd.f32 %v1779_v57, %v1116_v5  ;;  %v1782_v62 = vadd.f32 %v1781_v59, %v1780_v58 }
 0x11f   : > { %v1822_v53 = vadd.f32 %v1821_v52, %v1820_v42 }
 0x120   : > { %v1184_v2 = vadd.f32 %v1782_v62, %v1119_v17  ;;  %v1246_v7 = vadd.f32 %v1819_v41, %v1181_v61 }
 0x122   : > { %v1783_v9 = vpop.f32.mrb[20].mxu0  ;;  %v1249_v10 = vadd.f32 %v1822_v53, %v1184_v2 }
 0x123   : > { %v1823_v60 = vpop.f32.mrb[20].mxu1  ;;  %v1784_v11 = vpop.f32.mrb[21].mxu0 }
 0x124   : > { %v1824_v63 = vpop.f32.mrb[21].mxu1  ;;  %v1785_v14 = vadd.f32 %v1784_v11, %v1783_v9  ;;  %v1786_v47 = vpop.f32.mrb[22].mxu0 }
 0x125   : > { %v1825_v0 = vadd.f32 %v1824_v63, %v1823_v60  ;;  %v1826_v1 = vpop.f32.mrb[22].mxu1  ;;  %v1787_v16 = vpop.f32.mrb[23].mxu0 }
 0x126   : > { %v1827_v3 = vpop.f32.mrb[23].mxu1  ;;  %v1189_v19 = vadd.f32 %v1785_v14, %v1124_v23  ;;  %v1788_v20 = vadd.f32 %v1787_v16, %v1786_v47 }
 0x127   : > { %v1828_v8 = vadd.f32 %v1827_v3, %v1826_v1 }
 0x128   : > { %v1192_v28 = vadd.f32 %v1788_v20, %v1127_v30  ;;  %v1254_v31 = vadd.f32 %v1825_v0, %v1189_v19 }
 0x12a   : > { %v1789_v17 = vpop.f32.mrb[24].mxu0  ;;  %v1257_v34 = vadd.f32 %v1828_v8, %v1192_v28 }
 0x12b   : > { %v1829_v18 = vpop.f32.mrb[24].mxu1  ;;  %v1790_v35 = vpop.f32.mrb[25].mxu0 }
 0x12c   : > { %v1830_v22 = vpop.f32.mrb[25].mxu1  ;;  %v1791_v39 = vadd.f32 %v1790_v35, %v1789_v17  ;;  %v1792_v48 = vpop.f32.mrb[26].mxu0 }
 0x12d   : > { %v1831_v25 = vadd.f32 %v1830_v22, %v1829_v18  ;;  %v1832_v5 = vpop.f32.mrb[26].mxu1  ;;  %v1793_v50 = vpop.f32.mrb[27].mxu0 }
 0x12e   : > { %v1833_v29 = vpop.f32.mrb[27].mxu1  ;;  %v1197_v27 = vadd.f32 %v1791_v39, %v1132_v36  ;;  %v1794_v37 = vadd.f32 %v1793_v50, %v1792_v48 }
 0x12f   : > { %v1834_v32 = vadd.f32 %v1833_v29, %v1832_v5 }
 0x130   : > { %v1200_v55 = vadd.f32 %v1794_v37, %v2422_v38  ;;  %v1262_v30 = vadd.f32 %v1831_v25, %v1197_v27 }
 0x132   : > { %v1795_v6 = vpop.f32.mrb[28].mxu0  ;;  %v1265_v13 = vadd.f32 %v1834_v32, %v1200_v55 }
 0x133   : > { %v1835_v4 = vpop.f32.mrb[28].mxu1  ;;  %v1796_v26 = vpop.f32.mrb[29].mxu0 }
 0x134   : > { %v1836_v24 = vpop.f32.mrb[29].mxu1  ;;  %v1797_v43 = vadd.f32 %v1796_v26, %v1795_v6  ;;  %v1798_v44 = vpop.f32.mrb[30].mxu0 }
 0x135   : > { %v1837_v40 = vadd.f32 %v1836_v24, %v1835_v4  ;;  %v1838_v23 = vpop.f32.mrb[30].mxu1  ;;  %v1799_v46 = vpop.f32.mrb[31].mxu0 }
 0x136   : > { %v1839_v15 = vpop.f32.mrb[31].mxu1  ;;  %v1205_v45 = vadd.f32 %v1797_v43, %v1140_v21  ;;  %v1800_v33 = vadd.f32 %v1799_v46, %v1798_v44 }
 0x137   : > { %v1840_v12 = vadd.f32 %v1839_v15, %v1838_v23 }
 0x138   : > { %v1208_v52 = vadd.f32 %v1800_v33, %v2424_v51  ;;  %v1270_v53 = vadd.f32 %v1837_v40, %v1205_v45 }
 0x13a   : > { %v1871_v56 = vpop.f32.mrb[32].mxu0  ;;  %v1273_v58 = vadd.f32 %v1840_v12, %v1208_v52 }
 0x13b   : > { %v1875_v49 = vpop.f32.mrb[32].mxu1  ;;  %v1319_v59 = vadd.f32 %v1871_v56, %v1254_v31  ;;  %v1310_v60 = vpop.f32.mrb[33].mxu0 }
 0x13c   : > { %v1326_v36 = vpop.f32.mrb[33].mxu1  ;;  %v1335_v57 = vadd.f32 %v1875_v49, %v1270_v53  ;;  %v1311_v61 = vadd.f32 %v1310_v60, %v1246_v7  ;;  %v1872_v62 = vpop.f32.mrb[34].mxu0 }
 0x13d   : > { %v1327_v41 = vadd.f32 %v1326_v36, %v1262_v30  ;;  %v1876_v42 = vpop.f32.mrb[34].mxu1  ;;  %v1322_v0 = vadd.f32 %v1872_v62, %v1257_v34  ;;  %v1313_v1 = vpop.f32.mrb[35].mxu0  ;;  %v1397_v47 = vmul.f32 %v1319_v59, %v1319_v59 }
 0x13e   : > { %v1329_v38 = vpop.f32.mrb[35].mxu1  ;;  %v1338_v63 = vadd.f32 %v1876_v42, %v1273_v58  ;;  %v1314_v2 = vadd.f32 %v1313_v1, %v1249_v10  ;;  %v1395_v8 = vmul.f32 %v1311_v61, %v1311_v61  ;;  %v1401_v31 = vmul.f32 %v1335_v57, %v1335_v57 }
 0x13f   : > { %v1330_v54 = vadd.f32 %v1329_v38, %v1265_v13  ;;  %v1666_v3 = vpack.c.bf16 %v1322_v0, %v1319_v59  ;;  %v1398_v19 = vmul.f32 %v1322_v0, %v1322_v0  ;;  %v1399_v22 = vmul.f32 %v1327_v41, %v1327_v41 }
 0x140   : > { %v1676_v51 = vpack.c.bf16 %v1338_v63, %v1335_v57  ;;  %v1661_v9 = vpack.c.bf16 %v1314_v2, %v1311_v61  ;;  %v1381_v11 = vadd.f32 %v1314_v2, %v1311_v61  ;;  %v1396_v14 = vmul.f32 %v1314_v2, %v1314_v2 }
 0x141   : > { %v1671_v21 = vpack.c.bf16 %v1330_v54, %v1327_v41  ;;  %1678 = vst [vmem:[%s208_s26 + $0x8] sm:$0xff] %v1666_v3   ;;  %v1400_v29 = vmul.f32 %v1330_v54, %v1330_v54  ;;  %v1402_v34 = vmul.f32 %v1338_v63, %v1338_v63 }
 0x142   : > { %1680 = vst [vmem:[%s208_s26 + $0x18] sm:$0xff] %v1676_v51   ;;  %1662 = vst [vmem:[%s208_s26] sm:$0xff] %v1661_v9   ;;  %v1382_v16 = vadd.f32 %v1381_v11, %v1319_v59  ;;  %v1403_v18 = vadd.f32 %v1396_v14, %v1395_v8 }
 0x143   : > { %1679 = vst [vmem:[%s208_s26 + $0x10] sm:$0xff] %v1671_v21  }
 0x144   : > { %v1404_v7 = vadd.f32 %v1403_v18, %v1397_v47  ;;  %v1383_v20 = vadd.f32 %v1382_v16, %v1322_v0 }
 0x146   : > { %v1384_v25 = vadd.f32 %v1383_v20, %v1327_v41  ;;  %v1405_v5 = vadd.f32 %v1404_v7, %v1398_v19 }
 0x148   : > { %v1385_v28 = vadd.f32 %v1384_v25, %v1330_v54  ;;  %v1406_v10 = vadd.f32 %v1405_v5, %v1399_v22 }
 0x14a   : > { %v1386_v32 = vadd.f32 %v1385_v28, %v1335_v57  ;;  %v1407_v17 = vadd.f32 %v1406_v10, %v1400_v29 }
 0x14c   : > { %v1387_v35 = vadd.f32 %v1386_v32, %v1338_v63  ;;  %v1408_v39 = vadd.f32 %v1407_v17, %v1401_v31 }
 0x14e   : > { %v1388_v48 = vrot.slane %v1387_v35, 4  ;;  %v1409_v50 = vadd.f32 %v1408_v39, %v1402_v34 }
 0x150   : > { %v1389_v4 = vadd.f32 %v1388_v48, %v1387_v35  ;;  %v1410_v27 = vrot.slane %v1409_v50, 4 }
 0x152   : > { %v1390_v37 = vrot.slane %v1389_v4, 2  ;;  %v1411_v24 = vadd.f32 %v1410_v27, %v1409_v50 }
 0x154   : > { %v1391_v40 = vadd.f32 %v1390_v37, %v1389_v4  ;;  %v1412_v23 = vrot.slane %v1411_v24, 2 }
 0x156   : > { %v1392_v55 = vrot.slane %v1391_v40, 1  ;;  %v1413_v15 = vadd.f32 %v1412_v23, %v1411_v24 }
 0x158   : > { %v1393_v30 = vadd.f32 %v1392_v55, %v1391_v40  ;;  %v1414_v12 = vrot.slane %v1413_v15, 1 }
 0x15a   : > { %1394 = vst [vmem:[%s211_s29] sm:$0x1] %v1393_v30  ;;  %v1415_v6 = vadd.f32 %v1414_v12, %v1413_v15 }
 0x15c   : > { %1416 = vst [vmem:[%s214_s7] sm:$0x1] %v1415_v6 }
 0x15d PF: > { %s15_s15 = sadd.s32 1, %s1999_s15  }
 0x15e   : > { %p12_p4 = scmp.ge.s32.totalorder %s15_s15, 4  }
 0x160   :  { %14 = sbr.rel (!%p12_p4) target bundleno = 1 (0x1), region = 82 }

// kernel: image_encoder.10
= control target key start
LH: loop header
LB: loop body
LE: loop exit
PB: predicated region body
PF: predicated region fallthrough
CT: control target
= control target key end

     0   :  { %s1797_s15 = smov 0   ;;  %s2122_s0 = inlined_call_operand.vmem [shape: bf16[2,6,6,128], index: 0, kind: input, shape index: {}]   ;;  %s2123_s1 = inlined_call_operand.vmem [shape: bf16[1152,128], index: 1, kind: input, shape index: {}]   ;;  %s2124_s2 = inlined_call_operand.vmem [shape: bf16[2,16,128], index: 2, kind: output, shape index: {0}]   ;;  %s2125_s3 = inlined_call_operand.vmem [shape: f32[2,1,128], index: 3, kind: output, shape index: {1}]   ;;  %s2126_s4 = inlined_call_operand.vmem [shape: f32[2,1,128], index: 4, kind: output, shape index: {2}]  }
   0x1 LB: > { %s1448_s16 = sadd.s32 4294967295, %s1767_s15   ;;  %p1452_p0 = scmp.ge.s32.totalorder %s1767_s15, 1  ;;  %s1767_s15 = sphi %s1797_s15, %s15_s15  }
   0x2   : > { %p167_p1 = scmp.lt.s32.totalorder %s1767_s15, 3 }
   0x4   : > { %p168_p2 = pnand %p1452_p0, %p167_p1 }
   0x5   : > { %v1683_v0 = vld [vmem:[%s2123_s1 + $0x40] sm:$0xff] (!%p168_p2)   ;;  %v1687_v4 = vld [vmem:[%s2123_s1 + $0x48] sm:$0xff] (!%p168_p2)   ;;  %v1691_v8 = vld [vmem:[%s2123_s1 + $0x50] sm:$0xff] (!%p168_p2)   ;;  %p199_p3 = scmp.lt.s32.totalorder (!%p168_p2), %s1448_s16, 1  ;;  %v293_v31 = vlaneseq (!%p168_p2)  ;;  %v1769_v42 = vmov (!%p168_p2), 1983009808  }
   0x6   : > { %171 = sbr.rel (%p168_p2) target bundleno = 339 (0x153), region = 28  ;;  %v1684_v1 = vld [vmem:[%s2123_s1 + $0xc0] sm:$0xff] (!%p168_p2)   ;;  %1554 = vmatprep.subr.bf16.mxu0 (!%p168_p2), %v1683_v0  ;;  %v1688_v5 = vld [vmem:[%s2123_s1 + $0xc8] sm:$0xff] (!%p168_p2)   ;;  %v1692_v9 = vld [vmem:[%s2123_s1 + $0xd0] sm:$0xff] (!%p168_p2)   ;;  %v291_v43 = vunpack.c.l.s4 (!%p168_p2), %v1769_v42  ;;  %vm1771_vm0 = vmmov (!%p168_p2), 0  }
   0x7   : > { %v1685_v2 = vld [vmem:[%s2123_s1] sm:$0xff] (!%p168_p2)   ;;  %1576 = vmatprep.subr.bf16.mxu1 (!%p168_p2), %v1684_v1  ;;  %v1689_v6 = vld [vmem:[%s2123_s1 + $0x8] sm:$0xff] (!%p168_p2)   ;;  %v1693_v10 = vld [vmem:[%s2123_s1 + $0x10] sm:$0xff] (!%p168_p2)   ;;  %v294_v44 = vshrl.u32 (!%p168_p2), %v293_v31, 7 }
   0x8   : > { %v1686_v3 = vld [vmem:[%s2123_s1 + $0x80] sm:$0xff] (!%p168_p2)   ;;  %1555 = vmatpush3.bf16.msra.mxu0 (!%p168_p2), %v1685_v2  ;;  %v1690_v7 = vld [vmem:[%s2123_s1 + $0x88] sm:$0xff] (!%p168_p2)   ;;  %v1694_v11 = vld [vmem:[%s2123_s1 + $0x90] sm:$0xff] (!%p168_p2)   ;;  %v292_v57 = vunpack.c.0.s8 (!%p168_p2), %v291_v43 }
   0x9   : > { %1577 = vmatpush3.bf16.msra.mxu1 (!%p168_p2), %v1686_v3  ;;  %1556 = vmatprep.subr.bf16.mxu0 (!%p168_p2), %v1687_v4  ;;  %v1695_v12 = vld [vmem:[%s2123_s1 + $0x58] sm:$0xff] (!%p168_p2)   ;;  %v1699_v16 = vld [vmem:[%s2123_s1 + $0x60] sm:$0xff] (!%p168_p2)   ;;  %v1703_v20 = vld [vmem:[%s2123_s1 + $0x68] sm:$0xff] (!%p168_p2)  }
   0xa   : > { %1578 = vmatprep.subr.bf16.mxu1 (!%p168_p2), %v1688_v5  ;;  %v1696_v13 = vld [vmem:[%s2123_s1 + $0xd8] sm:$0xff] (!%p168_p2)   ;;  %v1700_v17 = vld [vmem:[%s2123_s1 + $0xe0] sm:$0xff] (!%p168_p2)   ;;  %v1704_v21 = vld [vmem:[%s2123_s1 + $0xe8] sm:$0xff] (!%p168_p2)   ;;  %v1927_v1 = vsub.s32 (!%p168_p2), %v292_v57, %v294_v44 }
   0xb   : > { %v1697_v14 = vld [vmem:[%s2123_s1 + $0x18] sm:$0xff] (!%p168_p2)   ;;  %v1701_v18 = vld [vmem:[%s2123_s1 + $0x20] sm:$0xff] (!%p168_p2)   ;;  %v1705_v22 = vld [vmem:[%s2123_s1 + $0x28] sm:$0xff] (!%p168_p2)  }
   0xc   : > { %1557 = vmatpush3.bf16.msra.mxu0 (!%p168_p2), %v1689_v6  ;;  %v1698_v15 = vld [vmem:[%s2123_s1 + $0x98] sm:$0xff] (!%p168_p2)   ;;  %v1702_v19 = vld [vmem:[%s2123_s1 + $0xa0] sm:$0xff] (!%p168_p2)   ;;  %v1706_v23 = vld [vmem:[%s2123_s1 + $0xa8] sm:$0xff] (!%p168_p2)  }
   0xd   : > { %1579 = vmatpush3.bf16.msra.mxu1 %v1690_v7  ;;  %1558 = vmatprep.subr.bf16.mxu0 %v1691_v8  ;;  %s2128_s16 = smov (!%p199_p3, %s1448_s16), 1  ;;  %v1707_v24 = vld [vmem:[%s2123_s1 + $0x70] sm:$0xff]   ;;  %v1711_v28 = vld [vmem:[%s2123_s1 + $0x78] sm:$0xff]   ;;  %v1720_v46 = vld [vmem:[%s2123_s1 + $0x140] sm:$0xff]  }
   0xe   : > { %1580 = vmatprep.subr.bf16.mxu1 %v1692_v9  ;;  %v1708_v25 = vld [vmem:[%s2123_s1 + $0xf0] sm:$0xff]   ;;  %s1671_s21 = smul.u32 24, %s2128_s16  ;;  %v1712_v29 = vld [vmem:[%s2123_s1 + $0xf8] sm:$0xff]   ;;  %v1722_v3 = vld [vmem:[%s2123_s1 + $0x1c0] sm:$0xff]   ;;  %s1546_s22 = sshll.u32 %s2128_s16, 3 }
   0xf   : > { %v1709_v26 = vld [vmem:[%s2123_s1 + $0x30] sm:$0xff]   ;;  %v1713_v30 = vld [vmem:[%s2123_s1 + $0x38] sm:$0xff]   ;;  %v1723_v44 = vld [vmem:[%s2123_s1 + $0x180] sm:$0xff]   ;;  %s208_s25 = scalar_lea.vmem %s2124_s2, %s1546_s22  ;;  %s211_s28 = scalar_lea.vmem %s2125_s3, %s2128_s16 }
  0x10   : > { %1559 = vmatpush3.bf16.msra.mxu0 %v1693_v10  ;;  %v1710_v27 = vld [vmem:[%s2123_s1 + $0xb0] sm:$0xff]   ;;  %s1905_s6 = scalar_lea.vmem %s2122_s0, %s1671_s21  ;;  %v1714_v32 = vld [vmem:[%s2123_s1 + $0xb8] sm:$0xff]   ;;  %v1727_v57 = vld [vmem:[%s2123_s1 + $0x188] sm:$0xff]   ;;  %s214_s5 = scalar_lea.vmem %s2126_s4, %s2128_s16 }
  0x11   : > { %1581 = vmatpush3.bf16.msra.mxu1 %v1694_v11  ;;  %1560 = vmatprep.subr.bf16.mxu0 %v1695_v12  ;;  %v216_v33 = vld [vmem:[%s1905_s6] sm:$0x7]  ;;  %v217_v34 = vld [vmem:[%s1905_s6 + $0x4] sm:$0x7]  ;;  %v218_v35 = vld [vmem:[%s1905_s6 + $0x8] sm:$0x7] }
  0x12   : > { %1582 = vmatprep.subr.bf16.mxu1 %v1696_v13  ;;  %v219_v36 = vld [vmem:[%s1905_s6 + $0xc] sm:$0x7]  ;;  %v1456_v37 = vcombine.low %v216_v33, %v216_v33  ;;  %v1457_v38 = vcombine.low %v217_v34, %v217_v34  ;;  %v1458_v39 = vcombine.low %v218_v35, %v218_v35  ;;  %v1918_v40 = vld [vmem:[%s1905_s6 + $0x10] sm:$0x7] }
  0x13   : > { %v1459_v41 = vcombine.low %v219_v36, %v219_v36  ;;  %v1922_v45 = vcombine.low %v1918_v40, %v1918_v40 }
  0x14   : > { %1561 = vmatpush3.bf16.msra.mxu0 %v1697_v14  ;;  %v235_v47 = vshrl.u32 %v1456_v37, 16  ;;  %v237_v48 = vshll.u32 %v1456_v37, 16  ;;  %v242_v49 = vshrl.u32 %v1457_v38, 16  ;;  %v244_v50 = vshll.u32 %v1457_v38, 16 }
  0x15   : > { %1583 = vmatpush3.bf16.msra.mxu1 %v1698_v15  ;;  %1562 = vmatprep.subr.bf16.mxu0 %v1699_v16  ;;  %v249_v51 = vshrl.u32 %v1458_v39, 16  ;;  %v251_v52 = vshll.u32 %v1458_v39, 16  ;;  %v256_v53 = vshrl.u32 %v1459_v41, 16  ;;  %v258_v54 = vshll.u32 %v1459_v41, 16 }
  0x16   : > { %1584 = vmatprep.subr.bf16.mxu1 %v1700_v17  ;;  %v239_v55 = vrot.slane %v237_v48, 1  ;;  %v246_v56 = vrot.slane %v244_v50, 1  ;;  %v262_v58 = vrot.slane %v1456_v37, 1  ;;  %v263_v61 = vrot.slane %v1457_v38, 1  ;;  %v1721_v37 = vld [vmem:[%s2123_s1 + $0x100] sm:$0xff]   ;;  %v1726_v50 = vld [vmem:[%s2123_s1 + $0x1c8] sm:$0xff]  }
  0x17   : > { %v253_v59 = vrot.slane %v251_v52, 1  ;;  %v260_v60 = vrot.slane %v258_v54, 1  ;;  %v264_v62 = vrot.slane %v1458_v39, 1  ;;  %v265_v2 = vrot.slane %v1459_v41, 1 }
  0x18   : > { %1563 = vmatpush3.bf16.msra.mxu0 %v1701_v18  ;;  %v240_v63 = vor.u32 %v239_v55, %v235_v47  ;;  %v247_v0 = vor.u32 %v246_v56, %v242_v49  ;;  %v289_v6 = vcombine.low %v262_v58, %v217_v34  ;;  %v330_v7 = vcombine.low %v263_v61, %v218_v35  ;;  %v1725_v56 = vld [vmem:[%s2123_s1 + $0x108] sm:$0xff]  }
  0x19   : > { %1585 = vmatpush3.bf16.msra.mxu1 %v1702_v19  ;;  %1564 = vmatprep.subr.bf16.mxu0 %v1703_v20  ;;  %v254_v4 = vor.u32 %v253_v59, %v249_v51  ;;  %v261_v5 = vor.u32 %v260_v60, %v256_v53  ;;  %v370_v10 = vcombine.low %v264_v62, %v219_v36  ;;  %v1724_v51 = vld [vmem:[%s2123_s1 + $0x148] sm:$0xff]   ;;  %v1730_v60 = vld [vmem:[%s2123_s1 + $0x1d0] sm:$0xff]  }
  0x1a   : > { %1586 = vmatprep.subr.bf16.mxu1 %v1704_v21  ;;  %v288_v8 = vcombine.low %v216_v33, %v240_v63  ;;  %v329_v9 = vcombine.low %v217_v34, %v247_v0  ;;  %v403_v11 = vcombine.low %v265_v2, %v1918_v40  ;;  %v303_v14 = vrot.slane %v289_v6, %v1927_v1 }
  0x1b   : > { %v306_v12 = vcombine.low %v218_v35, %v254_v4  ;;  %v347_v13 = vcombine.low %v219_v36, %v261_v5  ;;  %v344_v15 = vrot.slane %v330_v7, %v1927_v1  ;;  %v377_v18 = vrot.slane %v370_v10, %v1927_v1  ;;  %v1733_v7 = vld [vmem:[%s2123_s1 + $0x118] sm:$0xff]   ;;  %v1736_v10 = vld [vmem:[%s2123_s1 + $0x160] sm:$0xff]  }
  0x1c   : > { %1565 = vmatpush3.bf16.msra.mxu0 %v1705_v22  ;;  %v296_v16 = vrot.slane %v288_v8, %v1927_v1  ;;  %v337_v17 = vrot.slane %v329_v9, %v1927_v1  ;;  %v410_v19 = vrot.slane %v403_v11, %v1927_v1  ;;  %v346_v31 = vcombine.low %v254_v4, %v264_v62  ;;  %v1734_v4 = vld [vmem:[%s2123_s1 + $0x1d8] sm:$0xff]   ;;  %v1738_v9 = vld [vmem:[%s2123_s1 + $0x1e0] sm:$0xff]  }
  0x1d   : > { %1587 = vmatpush3.bf16.msra.mxu1 %v1706_v23  ;;  %1566 = vmatprep.subr.bf16.mxu0 %v1707_v24  ;;  %v320_v20 = vrot.slane %v306_v12, %v1927_v1  ;;  %v361_v21 = vrot.slane %v347_v13, %v1927_v1  ;;  %v1463_v22 = vcombine.low %v303_v14, %v344_v15  ;;  %v270_v23 = vshrl.u32 %v1922_v45, 16  ;;  %v1735_v8 = vld [vmem:[%s2123_s1 + $0x198] sm:$0xff]   ;;  %v1737_v11 = vld [vmem:[%s2123_s1 + $0x120] sm:$0xff]   ;;  %v1742_v13 = vld [vmem:[%s2123_s1 + $0x1e8] sm:$0xff]  }
  0x1e   : > { %1588 = vmatprep.subr.bf16.mxu1 %v1708_v25  ;;  %v1462_v24 = vcombine.low %v296_v16, %v337_v17  ;;  %v1465_v25 = vcombine.low %v377_v18, %v410_v19  ;;  %v354_v38 = vrot.slane %v346_v31, %v1927_v1  ;;  %v379_v39 = vcombine.low %v261_v5, %v265_v2  ;;  %v1732_v5 = vld [vmem:[%s2123_s1 + $0x158] sm:$0xff]   ;;  %v1739_v12 = vld [vmem:[%s2123_s1 + $0x1a0] sm:$0xff]   ;;  %v1740_v14 = vld [vmem:[%s2123_s1 + $0x168] sm:$0xff]  }
  0x1f   : > { %v328_v41 = vrot.slane %v264_v62, %v1927_v1  ;;  %v369_v47 = vrot.slane %v265_v2, %v1927_v1  ;;  %v1731_v2 = vld [vmem:[%s2123_s1 + $0x190] sm:$0xff]   ;;  %v1741_v15 = vld [vmem:[%s2123_s1 + $0x128] sm:$0xff]   ;;  %v1748_v31 = vld [vmem:[%s2123_s1 + $0x178] sm:$0xff]  }
  0x20   : > { %1567 = vmatpush3.bf16.msra.mxu0 %v1709_v26  ;;  %v272_v26 = vshll.u32 %v1922_v45, 16  ;;  %v611_v33 = vrot.slane %v1465_v25, %v1927_v1  ;;  %v387_v52 = vrot.slane %v379_v39, %v1927_v1  ;;  %v221_v16 = vld [vmem:[%s1905_s6 + $0x14] sm:$0x7]  ;;  %v1743_v17 = vld [vmem:[%s2123_s1 + $0x1a8] sm:$0xff]  }
  0x21   : > { %1589 = vmatpush3.bf16.msra.mxu1 %v1710_v27  ;;  %1568 = vmatprep.subr.bf16.mxu0 %v1711_v28  ;;  %v305_v27 = vcombine.low %v247_v0, %v263_v61  ;;  %v1464_v28 = vcombine.low %v320_v20, %v361_v21  ;;  %v1974_v55 = vcombine.low %v328_v41, %v369_v47  ;;  %v1728_v61 = vld [vmem:[%s2123_s1 + $0x150] sm:$0xff]  }
  0x22   : > { %1590 = vmatprep.subr.bf16.mxu1 %v1712_v29  ;;  %v597_v29 = vrot.slane %v1463_v22, %v1927_v1  ;;  %v274_v34 = vrot.slane %v272_v26, 1  ;;  %v1729_v0 = vld [vmem:[%s2123_s1 + $0x110] sm:$0xff]   ;;  %v1461_v18 = vcombine.low %v221_v16, %v221_v16 }
  0x23   : > { %v313_v35 = vrot.slane %v305_v27, %v1927_v1  ;;  %v1949_v36 = vrot.slane %v1464_v28, %v1927_v1  ;;  %v660_v59 = vrot.slane %v1974_v55, %v1927_v1  ;;  %v1746_v19 = vld [vmem:[%s2123_s1 + $0x1f0] sm:$0xff]   ;;  %v1750_v27 = vld [vmem:[%s2123_s1 + $0x1f8] sm:$0xff]  }
  0x24   : > { %1569 = vmatpush3.bf16.msra.mxu0 %v1713_v30  ;;  %v276_v30 = vrot.slane %v1922_v45, 1  ;;  %v615_v42 = vcombine.high %v597_v29, %v611_v33  ;;  %v614_v43 = vcombine.low %v597_v29, %v611_v33  ;;  %v1744_v20 = vld [vmem:[%s2123_s1 + $0x170] sm:$0xff]   ;;  %v281_v21 = vshrl.u32 %v1461_v18, 16  ;;  %v1749_v45 = vld [vmem:[%s2123_s1 + $0x138] sm:$0xff]  }
  0x25   : > { %1591 = vmatpush3.bf16.msra.mxu1 %v1714_v32  ;;  %1598 = vmatprep.subr.bf16.mxu0 %v1720_v46  ;;  %v590_v32 = vrot.slane %v1462_v24, %v1927_v1  ;;  %v1959_v46 = vor.u32 %v274_v34, %v270_v23  ;;  %v1466_v54 = vcombine.low %v313_v35, %v354_v38  ;;  %v283_v22 = vshll.u32 %v1461_v18, 16  ;;  %v1745_v23 = vld [vmem:[%s2123_s1 + $0x130] sm:$0xff]  }
  0x26   : > { %1620 = vmatprep.subr.bf16.mxu1 %v1722_v3  ;;  %1183 = vmatprep.mubr.bf16.mxu1 %v615_v42  ;;  %v1747_v24 = vld [vmem:[%s2123_s1 + $0x1b0] sm:$0xff]   ;;  %v287_v28 = vrot.slane %v1461_v18, 1  ;;  %v402_v29 = vrot.slane %v276_v30, %v1927_v1  ;;  %v1753_v42 = vld [vmem:[%s2123_s1 + $0x200] sm:$0xff]  }
  0x27   : > { %v613_v48 = vcombine.high %v590_v32, %v1949_v36  ;;  %v612_v49 = vcombine.low %v590_v32, %v1949_v36  ;;  %v412_v53 = vcombine.low %v1959_v46, %v276_v30  ;;  %v1992_v63 = vrot.slane %v1466_v54, %v1927_v1 }
  0x28   : > { %1184 = vmatmul.mubr.bf16.vlgmr.msra.gmra.mrb[0].mxu1 %v614_v43  ;;  %v285_v25 = vrot.slane %v283_v22, 1  ;;  %v380_v26 = vcombine.low %v1918_v40, %v1959_v46  ;;  %v435_v33 = vrot.slane %v287_v28, %v1927_v1  ;;  %v1751_v40 = vld [vmem:[%s2123_s1 + $0x1b8] sm:$0xff]  }
  0x29   : > { %1142 = vmatprep.mubr.bf16.mxu0 %v613_v48  ;;  %1621 = vmatpush3.bf16.msra.mxu1 %v1723_v44  ;;  %v420_v58 = vrot.slane %v412_v53, %v1927_v1  ;;  %v1770_v44 = vmov 0.0   ;;  %v1760_v53 = vld [vmem:[%s2123_s1 + $0x238] sm:$0xff]  }
  0x2a   : > { %1143 = vmatmul.mubr.bf16.vlgmr.msra.gmra.mrb[0].mxu0 %v612_v49  ;;  %1622 = vmatprep.subr.bf16.mxu1 %v1726_v50  ;;  %v286_v32 = vor.u32 %v285_v25, %v281_v21  ;;  %v394_v34 = vrot.slane %v380_v26, %v1927_v1  ;;  %v653_v30 = vcombine.low %v402_v29, %v435_v33  ;;  %v1754_v49 = vld [vmem:[%s2123_s1 + $0x208] sm:$0xff]   ;;  %v1757_v50 = vld [vmem:[%s2123_s1 + $0x220] sm:$0xff]  }
  0x2b   : > { %1599 = vmatpush3.bf16.msra.mxu0 %v1721_v37  ;;  %v1468_v62 = vcombine.low %v387_v52, %v420_v58  ;;  %v1759_v52 = vld [vmem:[%s2123_s1 + $0x230] sm:$0xff]  }
  0x2c   : > { %1600 = vmatprep.subr.bf16.mxu0 %v1724_v51  ;;  %v413_v35 = vcombine.low %v221_v16, %v286_v32  ;;  %v667_v38 = vrot.slane %v653_v30, %v1927_v1  ;;  %v1758_v51 = vld [vmem:[%s2123_s1 + $0x228] sm:$0xff]  }
  0x2d   : > { %1623 = vmatpush3.bf16.msra.mxu1 %v1727_v57  ;;  %v2001_v3 = vrot.slane %v1468_v62, %v1927_v1 }
  0x2e   : > { %1624 = vmatprep.subr.bf16.mxu1 %v1730_v60  ;;  %v427_v37 = vrot.slane %v413_v35, %v1927_v1  ;;  %v668_v43 = vcombine.low %v660_v59, %v667_v38 }
  0x2f   : > { %1601 = vmatpush3.bf16.msra.mxu0 %v1725_v56  ;;  %v649_v6 = vcombine.high %v1992_v63, %v2001_v3  ;;  %v648_v39 = vcombine.low %v1992_v63, %v2001_v3 }
  0x30   : > { %1602 = vmatprep.subr.bf16.mxu0 %v1728_v61  ;;  %v1469_v41 = vcombine.low %v394_v34, %v427_v37 }
  0x31   : > { %1625 = vmatpush3.bf16.msra.mxu1 %v1731_v2  ;;  %1224 = vmatprep.mubr.bf16.mxu0 %v649_v6 }
  0x32   : > { %1626 = vmatprep.subr.bf16.mxu1 %v1734_v4  ;;  %v647_v46 = vrot.slane %v1469_v41, %v1927_v1  ;;  %v1755_v1 = vld [vmem:[%s2123_s1 + $0x210] sm:$0xff]  }
  0x33   : > { %1603 = vmatpush3.bf16.msra.mxu0 %v1729_v0 }
  0x34   : > { %1604 = vmatprep.subr.bf16.mxu0 %v1732_v5  ;;  %v651_v47 = vcombine.high %v1949_v36, %v647_v46  ;;  %v650_v48 = vcombine.low %v1949_v36, %v647_v46  ;;  %v1756_v36 = vld [vmem:[%s2123_s1 + $0x218] sm:$0xff]  }
  0x35   : > { %1627 = vmatpush3.bf16.msra.mxu1 %v1735_v8 }
  0x36   : > { %1628 = vmatprep.subr.bf16.mxu1 %v1738_v9  ;;  %1265 = vmatprep.mubr.bf16.mxu1 %v651_v47 }
  0x37   : > { %1605 = vmatpush3.bf16.msra.mxu0 %v1733_v7 }
  0x38   : > { %1606 = vmatprep.subr.bf16.mxu0 %v1736_v10 }
  0x39   : > { %1629 = vmatpush3.bf16.msra.mxu1 %v1739_v12 }
  0x3a   : > { %1630 = vmatprep.subr.bf16.mxu1 %v1742_v13 }
  0x3b   : > { %1607 = vmatpush3.bf16.msra.mxu0 %v1737_v11 }
  0x3c   : > { %1608 = vmatprep.subr.bf16.mxu0 %v1740_v14 }
  0x3d   : > { %1631 = vmatpush3.bf16.msra.mxu1 %v1743_v17 }
  0x3e   : > { %1632 = vmatprep.subr.bf16.mxu1 %v1746_v19 }
  0x3f   : > { %1609 = vmatpush3.bf16.msra.mxu0 %v1741_v15 }
  0x40   : > { %1610 = vmatprep.subr.bf16.mxu0 %v1744_v20 }
  0x41   : > { %1633 = vmatpush3.bf16.msra.mxu1 %v1747_v24 }
  0x42   : > { %1634 = vmatprep.subr.bf16.mxu1 %v1750_v27 }
  0x43   : > { %1611 = vmatpush3.bf16.msra.mxu0 %v1745_v23 }
  0x44   : > { %1612 = vmatprep.subr.bf16.mxu0 %v1748_v31 }
  0x45   : > { %1635 = vmatpush3.bf16.msra.mxu1 %v1751_v40 }
  0x47   : > { %1613 = vmatpush3.bf16.msra.mxu0 %v1749_v45 }
  0x48   : > { %1651 = vmatprep.subr.bf16.mxu0 %v1770_v44  ;;  %1266 = vmatmul.mubr.bf16.vlgmr.msra.gmra.mrb[4].mxu1 %v650_v48 }
  0x4a   : > { %1225 = vmatmul.mubr.bf16.vlgmr.msra.gmra.mrb[4].mxu0 %v648_v39 }
  0x4b   : > { %1652 = vmatpush3.bf16.msra.mxu0 %v1753_v42  ;;  %1667 = vmatprep.mubr.msk.bf16.mxu0 %vm1771_vm0, %v1770_v44 }
  0x4c   : > { %1653 = vmatprep.subr.bf16.mxu0 %v1770_v44 }
  0x4f   : > { %1654 = vmatpush3.bf16.msra.mxu0 %v1754_v49 }
  0x50   : > { %1655 = vmatprep.subr.bf16.mxu0 %v1770_v44 }
  0x53   : > { %1656 = vmatpush3.bf16.msra.mxu0 %v1755_v1 }
  0x54   : > { %1657 = vmatprep.subr.bf16.mxu0 %v1770_v44 }
  0x57   : > { %1658 = vmatpush3.bf16.msra.mxu0 %v1756_v36 }
  0x58   : > { %1659 = vmatprep.subr.bf16.mxu0 %v1770_v44 }
  0x5b   : > { %1660 = vmatpush3.bf16.msra.mxu0 %v1757_v50 }
  0x5c   : > { %1661 = vmatprep.subr.bf16.mxu0 %v1770_v44 }
  0x5f   : > { %1662 = vmatpush3.bf16.msra.mxu0 %v1758_v51 }
  0x60   : > { %1663 = vmatprep.subr.bf16.mxu0 %v1770_v44 }
  0x63   : > { %1664 = vmatpush3.bf16.msra.mxu0 %v1759_v52 }
  0x64   : > { %1665 = vmatprep.subr.bf16.mxu0 %v1770_v44 }
  0x67   : > { %1666 = vmatpush3.bf16.msra.mxu0 %v1760_v53 }
  0x6a   : > { %1668 = vmatmul.mubr.bf16.vlgmr.msra.gmra.mrb[8].mxu0 %v668_v43 }
  0xfb   : > { %v1592_v54 = vpop.f32.mrb[0].mxu1 }
  0xfc   : > { %v1593_v56 = vpop.f32.mrb[1].mxu1 }
  0xfd   : > { %v1570_v55 = vpop.f32.mrb[0].mxu0  ;;  %v1594_v58 = vadd.f32 %v1593_v56, %v1592_v54  ;;  %v1595_v59 = vpop.f32.mrb[2].mxu1 }
  0xfe   : > { %v1571_v57 = vpop.f32.mrb[1].mxu0  ;;  %v1596_v62 = vpop.f32.mrb[3].mxu1 }
  0xff   : > { %v1572_v60 = vadd.f32 %v1571_v57, %v1570_v55  ;;  %v1573_v61 = vpop.f32.mrb[2].mxu0  ;;  %v1597_v0 = vadd.f32 %v1596_v62, %v1595_v59 }
 0x100   : > { %v1574_v63 = vpop.f32.mrb[3].mxu0 }
 0x101   : > { %v1186_v2 = vadd.f32 %v1594_v58, %v1572_v60  ;;  %v1575_v3 = vadd.f32 %v1574_v63, %v1573_v61 }
 0x103   : > { %v1189_v4 = vadd.f32 %v1597_v0, %v1575_v3 }
 0x11b   : > { %v1636_v9 = vpop.f32.mrb[4].mxu1 }
 0x11c   : > { %v1637_v13 = vpop.f32.mrb[5].mxu1 }
 0x11d   : > { %v1614_v5 = vpop.f32.mrb[4].mxu0  ;;  %v1638_v14 = vadd.f32 %v1637_v13, %v1636_v9  ;;  %v1639_v15 = vpop.f32.mrb[6].mxu1 }
 0x11e   : > { %v1615_v6 = vpop.f32.mrb[5].mxu0  ;;  %v1640_v17 = vpop.f32.mrb[7].mxu1 }
 0x11f   : > { %v1616_v7 = vadd.f32 %v1615_v6, %v1614_v5  ;;  %v1617_v8 = vpop.f32.mrb[6].mxu0  ;;  %v1641_v18 = vadd.f32 %v1640_v17, %v1639_v15 }
 0x120   : > { %v1618_v10 = vpop.f32.mrb[7].mxu0 }
 0x121   : > { %v1227_v11 = vadd.f32 %v1616_v7, %v1186_v2  ;;  %v1619_v12 = vadd.f32 %v1618_v10, %v1617_v8 }
 0x123   : > { %v1230_v16 = vadd.f32 %v1619_v12, %v1189_v4  ;;  %v1268_v19 = vadd.f32 %v1638_v14, %v1227_v11 }
 0x125   : > { %v1271_v20 = vadd.f32 %v1641_v18, %v1230_v16 }
 0x13d   : > { %v1308_v21 = vpop.f32.mrb[8].mxu0 }
 0x13e   : > { %v1309_v22 = vadd.f32 %v1308_v21, %v1268_v19  ;;  %v1669_v23 = vpop.f32.mrb[9].mxu0 }
 0x13f   : > { %v1311_v24 = vpop.f32.mrb[10].mxu0 }
 0x140   : > { %v1312_v25 = vadd.f32 %v1311_v24, %v1271_v20  ;;  %v1670_v26 = vpop.f32.mrb[11].mxu0  ;;  %v1333_v27 = vmul.f32 %v1309_v22, %v1309_v22 }
 0x142   : > { %v1552_v28 = vpack.c.bf16 %v1312_v25, %v1309_v22  ;;  %v1325_v29 = vadd.f32 %v1312_v25, %v1309_v22  ;;  %v1334_v31 = vmul.f32 %v1312_v25, %v1312_v25 }
 0x144   : > { %1553 = vst [vmem:[%s208_s25] sm:$0xff] %v1552_v28   ;;  %v1326_v32 = vrot.slane %v1325_v29, 4  ;;  %v1335_v33 = vadd.f32 %v1334_v31, %v1333_v27 }
 0x146   : > { %v1327_v40 = vadd.f32 %v1326_v32, %v1325_v29  ;;  %v1336_v34 = vrot.slane %v1335_v33, 4 }
 0x148   : > { %v1328_v35 = vrot.slane %v1327_v40, 2  ;;  %v1337_v45 = vadd.f32 %v1336_v34, %v1335_v33 }
 0x14a   : > { %v1329_v30 = vadd.f32 %v1328_v35, %v1327_v40  ;;  %v1338_v37 = vrot.slane %v1337_v45, 2 }
 0x14c   : > { %v1330_v38 = vrot.slane %v1329_v30, 1  ;;  %v1339_v39 = vadd.f32 %v1338_v37, %v1337_v45 }
 0x14e   : > { %v1331_v41 = vadd.f32 %v1330_v38, %v1329_v30  ;;  %v1340_v42 = vrot.slane %v1339_v39, 1 }
 0x150   : > { %1332 = vst [vmem:[%s211_s28] sm:$0x1] %v1331_v41  ;;  %v1341_v43 = vadd.f32 %v1340_v42, %v1339_v39 }
 0x152   : > { %1342 = vst [vmem:[%s214_s5] sm:$0x1] %v1341_v43 }
 0x153 PF: > { %s15_s15 = sadd.s32 1, %s1767_s15  }
 0x154   : > { %p12_p4 = scmp.ge.s32.totalorder %s15_s15, 4  }
 0x156   :  { %14 = sbr.rel (!%p12_p4) target bundleno = 1 (0x1), region = 82 }

</bundles_post_ra>
